<compile_context>
chip_gen: v7x
topology: tpu7x:2x2x1
jax: 0.10.0
libtpu: 0.0.40
codegen_flags: <defaults>
</compile_context>

<pallas_src>
import math

import jax
import jax.numpy as jnp
from jax.experimental import pallas as pl
from jax.experimental.pallas import tpu as pltpu


_LN_EPS = 1e-5
_GELU_C = math.sqrt(2.0 / math.pi)


def _gelu(x):
    # TODO(synk): PyTorch nn.GELU defaults to the exact erf form; the tanh
    # approximation (used in both kernels and the reference) differs <~3e-4.
    return 0.5 * x * (1.0 + jnp.tanh(_GELU_C * (x + 0.044715 * x * x * x)))


def _layernorm(x, gamma, beta):
    # Two-pass (centered) statistics: robust to large per-row means.
    mean = jnp.mean(x, axis=-1, keepdims=True)
    xc = x - mean
    var = jnp.mean(xc * xc, axis=-1, keepdims=True)
    return xc * jax.lax.rsqrt(var + _LN_EPS) * gamma + beta


# ---------------------------------------------------------------------------
# Kernel A: cross-attention branch (incl. fused kv-path) + LN3 + fc1
# ---------------------------------------------------------------------------
def _make_attn_fc1_kernel(*, N1, C1, num_heads):
    hd = C1 // num_heads
    f32, bf16 = jnp.float32, jnp.bfloat16

    def kernel(x_ref, y_ref, pool_ref,
               g1_ref, b1_ref, g2_ref, b2_ref,
               wq_ref, wsr_ref, bsr_ref, gn_ref, bn_ref,
               wk_ref, wv_ref, wproj_ref, bproj_ref,
               g3_ref, b3_ref, wfc1_ref, bfc1_ref,
               x1_ref, h_ref):
        x = x_ref[0].astype(f32)                       # (N1, C1)
        y = y_ref[0].astype(f32)                       # (N2, C2)

        # ---- q path: LN1 -> q projection (scale already folded into w_q)
        xn = _layernorm(x, g1_ref[...], b1_ref[...])
        q = jnp.dot(xn.astype(bf16), wq_ref[...],
                    preferred_element_type=f32)        # (N1, C1)

        # ---- kv path: LN2 -> avg-pool (pool-matrix matmul) -> sr -> LN -> GELU
        yn = _layernorm(y, g2_ref[...], b2_ref[...])   # (N2, C2)
        pooled = jnp.dot(pool_ref[...], yn,
                         preferred_element_type=f32)   # (Np, C2), f32 pooling
        sr = jnp.dot(pooled.astype(bf16), wsr_ref[...],
                     preferred_element_type=f32) + bsr_ref[...]
        sr = _gelu(_layernorm(sr, gn_ref[...], bn_ref[...]))
        srb = sr.astype(bf16)
        k = jnp.dot(srb, wk_ref[...], preferred_element_type=f32)   # (Np, C1)
        v = jnp.dot(srb, wv_ref[...], preferred_element_type=f32)   # (Np, C1)

        # ---- per-head attention; output projection accumulated per head so
        #      no lane-dim concatenation is needed.
        wproj = wproj_ref[...]                         # (C1, C1) f32
        acc = jnp.zeros((N1, C1), f32)
        for h in range(num_heads):
            sl = slice(h * hd, (h + 1) * hd)
            qh = q[:, sl].astype(bf16)                 # (N1, hd)
            kh = k[:, sl].astype(bf16)                 # (Np, hd)
            vh = v[:, sl].astype(bf16)                 # (Np, hd)
            s = jax.lax.dot_general(qh, kh, (((1,), (1,)), ((), ())),
                                    preferred_element_type=f32)     # (N1, Np)
            s = s - jnp.max(s, axis=-1, keepdims=True)
            p = jnp.exp(s)
            p = p * pl.reciprocal(jnp.sum(p, axis=-1, keepdims=True),
                                  approx=True)
            oh = jnp.dot(p.astype(bf16), vh, preferred_element_type=f32)
            acc = acc + jnp.dot(oh.astype(bf16),
                                wproj[sl, :].astype(bf16),
                                preferred_element_type=f32)          # (N1, C1)
        x1 = x + acc + bproj_ref[...]
        x1_ref[0] = x1.astype(x1_ref.dtype)

        # ---- first half of the MLP: LN3 -> fc1 (+bias), bf16 hand-off
        x1n = _layernorm(x1, g3_ref[...], b3_ref[...])
        hh = jnp.dot(x1n.astype(bf16), wfc1_ref[...],
                     preferred_element_type=f32) + bfc1_ref[...]
        h_ref[0] = hh.astype(h_ref.dtype)

    return kernel


# ---------------------------------------------------------------------------
# Kernel B: depthwise 3x3 conv (+bias) + GELU + fc2 (+bias) + residual
# ---------------------------------------------------------------------------
def _make_dwconv_fc2_kernel(*, H1, W1, hidden):
    N1 = H1 * W1
    f32, bf16 = jnp.float32, jnp.bfloat16

    def kernel(hp_ref, w9_ref, bdw_ref, wfc2_ref, bfc2_ref, x1_ref, o_ref):
        hp = hp_ref[0].astype(f32)                     # (H1+2, W1+2, hidden)
        acc = None
        for kh in range(3):
            for kw in range(3):
                term = hp[kh:kh + H1, kw:kw + W1, :] * w9_ref[3 * kh + kw, :]
                acc = term if acc is None else acc + term
        act = _gelu(acc + bdw_ref[0, :])               # (H1, W1, hidden)
        act = act.reshape(N1, hidden)                  # W1 == sublane tile -> cheap
        out = jnp.dot(act.astype(bf16), wfc2_ref[...],
                      preferred_element_type=f32) + bfc2_ref[...]
        o_ref[0] = (x1_ref[0].astype(f32) + out).astype(o_ref.dtype)

    return kernel


# ---------------------------------------------------------------------------
# Block_feed forward
# ---------------------------------------------------------------------------
def block_feed_forward(x, y, params, *, H2, W2, H1, W1, num_heads, pool_ratio):
    B, N1, C1 = x.shape
    _, N2, C2 = y.shape
    assert N1 == H1 * W1 and N2 == H2 * W2
    hidden = params["w_fc1"].shape[1]
    hd = C1 // num_heads
    scale = hd ** -0.5
    p = pool_ratio
    assert H2 % p == 0 and W2 % p == 0, "pool_ratio must divide H2 and W2"
    # TODO(synk): AvgPool2d with a ragged last window (H2 or W2 not divisible
    # by pool_ratio) is not handled.
    Hp, Wp = H2 // p, W2 // p
    Np = Hp * Wp

    f32, bf16 = jnp.float32, jnp.bfloat16
    row = lambda a: a.reshape(1, -1).astype(f32)

    # AvgPool over the H2 x W2 token grid expressed as an (Np, N2) matrix.
    r = jnp.arange(N2, dtype=jnp.int32) // W2
    c = jnp.arange(N2, dtype=jnp.int32) % W2
    cell = (r // p) * Wp + (c // p)
    pool_mat = (jnp.arange(Np, dtype=jnp.int32)[:, None] == cell[None, :]
                ).astype(f32) / float(p * p)

    wq = (params["w_q"] * scale).astype(bf16)          # softmax scale folded in
    wsr = params["w_sr"].astype(bf16)
    wk = params["w_kv"][:, :C1].astype(bf16)
    wv = params["w_kv"][:, C1:].astype(bf16)
    wproj = params["w_proj"].astype(f32)               # row-sliced per head in-kernel
    wfc1 = params["w_fc1"].astype(bf16)
    wfc2 = params["w_fc2"].astype(bf16)

    const2d = lambda shp: pl.BlockSpec(shp, lambda b: (0, 0))
    batch3d = lambda s1, s2: pl.BlockSpec((1, s1, s2), lambda b: (b, 0, 0))

    kernel_a = _make_attn_fc1_kernel(N1=N1, C1=C1, num_heads=num_heads)
    x1, h = pl.pallas_call(
        kernel_a,
        out_shape=(jax.ShapeDtypeStruct((B, N1, C1), f32),
                   jax.ShapeDtypeStruct((B, N1, hidden), bf16)),
        grid_spec=pltpu.PrefetchScalarGridSpec(
            num_scalar_prefetch=0,
            grid=(B,),
            in_specs=[
                batch3d(N1, C1),                         # x
                batch3d(N2, C2),                         # y
                const2d((Np, N2)),                       # pooling matrix
                const2d((1, C1)), const2d((1, C1)),      # g1, b1
                const2d((1, C2)), const2d((1, C2)),      # g2, b2
                const2d((C1, C1)),                       # w_q (scaled, bf16)
                const2d((C2, C2)),                       # w_sr
                const2d((1, C2)),                        # b_sr
                const2d((1, C2)), const2d((1, C2)),      # g_n, b_n
                const2d((C2, C1)), const2d((C2, C1)),    # w_k, w_v
                const2d((C1, C1)),                       # w_proj (f32)
                const2d((1, C1)),                        # b_proj
                const2d((1, C1)), const2d((1, C1)),      # g3, b3
                const2d((C1, hidden)),                   # w_fc1
                const2d((1, hidden)),                    # b_fc1
            ],
            out_specs=[batch3d(N1, C1), batch3d(N1, hidden)],
        ),
        compiler_params=pltpu.CompilerParams(
            dimension_semantics=("parallel",)),
    )(x, y, pool_mat,
      row(params["g1"]), row(params["b1"]),
      row(params["g2"]), row(params["b2"]),
      wq, wsr, row(params["b_sr"]), row(params["g_n"]), row(params["b_n"]),
      wk, wv, wproj, row(params["b_proj"]),
      row(params["g3"]), row(params["b3"]),
      wfc1, row(params["b_fc1"]))

    # Free reshape + 1-pixel halo pad of the bf16 hidden activation: the only
    # XLA glue between the two kernels.
    hp = jnp.pad(h.reshape(B, H1, W1, hidden),
                 ((0, 0), (1, 1), (1, 1), (0, 0)))
    w9 = params["w_dw"].reshape(hidden, 9).T.astype(f32)      # (9, hidden)

    kernel_b = _make_dwconv_fc2_kernel(H1=H1, W1=W1, hidden=hidden)
    out = pl.pallas_call(
        kernel_b,
        out_shape=jax.ShapeDtypeStruct((B, N1, C1), f32),
        grid_spec=pltpu.PrefetchScalarGridSpec(
            num_scalar_prefetch=0,
            grid=(B,),
            in_specs=[
                pl.BlockSpec((1, H1 + 2, W1 + 2, hidden),
                             lambda b: (b, 0, 0, 0)),         # padded image
                const2d((9, hidden)),                         # dw weights
                const2d((1, hidden)),                         # dw bias
                const2d((hidden, C1)),                        # w_fc2 (bf16)
                const2d((1, C1)),                             # b_fc2
                batch3d(N1, C1),                              # x1 residual
            ],
            out_specs=batch3d(N1, C1),
        ),
        compiler_params=pltpu.CompilerParams(
            dimension_semantics=("parallel",)),
    )(hp, w9, row(params["b_dw"]), wfc2, row(params["b_fc2"]), x1)
    return out


# ---------------------------------------------------------------------------
# pure-JAX f32 reference (mirrors the PyTorch forward)
# ---------------------------------------------------------------------------
def _reference(x, y, params, *, H2, W2, H1, W1, num_heads, pool_ratio):
    B, N1, C1 = x.shape
    _, N2, C2 = y.shape
    hd = C1 // num_heads
    scale = hd ** -0.5

    def ln(t, g, b):
        m = jnp.mean(t, axis=-1, keepdims=True)
        v = jnp.mean((t - m) ** 2, axis=-1, keepdims=True)
        return (t - m) / jnp.sqrt(v + _LN_EPS) * g + b

    # CrossAttention
    q = ln(x, params["g1"], params["b1"]) @ params["w_q"]
    q = q.reshape(B, N1, num_heads, hd).transpose(0, 2, 1, 3)
    yn = ln(y, params["g2"], params["b2"])
    p = pool_ratio
    Hp, Wp = H2 // p, W2 // p
    pooled = (yn.reshape(B, Hp, p, Wp, p, C2).mean(axis=(2, 4))
                .reshape(B, Hp * Wp, C2))
    x_ = pooled @ params["w_sr"] + params["b_sr"]
    x_ = _gelu(ln(x_, params["g_n"], params["b_n"]))
    kv = ((x_ @ params["w_kv"])
          .reshape(B, -1, 2, num_heads, hd).transpose(2, 0, 3, 1, 4))
    k, v = kv[0], kv[1]
    attn = jax.nn.softmax((q @ jnp.swapaxes(k, -2, -1)) * scale, axis=-1)
    o = (attn @ v).transpose(0, 2, 1, 3).reshape(B, N1, C1)
    x1 = x + (o @ params["w_proj"] + params["b_proj"])

    # Mlp
    h = ln(x1, params["g3"], params["b3"]) @ params["w_fc1"] + params["b_fc1"]
    C = h.shape[-1]
    himg = h.transpose(0, 2, 1).reshape(B, C, H1, W1)
    hc = jax.lax.conv_general_dilated(
        himg, params["w_dw"].reshape(C, 1, 3, 3),
        window_strides=(1, 1), padding=((1, 1), (1, 1)),
        dimension_numbers=("NCHW", "OIHW", "NCHW"),
        feature_group_count=C)
    hc = hc + params["b_dw"][None, :, None, None]
    h = _gelu(hc.reshape(B, C, H1 * W1).transpose(0, 2, 1))
    out = h @ params["w_fc2"] + params["b_fc2"]
    return x1 + out


if __name__ == "__main__":
    # Small shapes consistent with the module:
    #   dim1 = dim2 = 32, num_heads = 4, mlp_ratio = 4 (hidden = 128),
    #   x tokens from an 8x8 grid (N1 = 64), y tokens from a 16x16 grid
    #   (N2 = 256), pool_ratio = 4 -> 16 pooled kv tokens.
    B = 2
    dim1, dim2 = 32, 32
    num_heads = 4
    hidden = dim1 * 4
    H1 = W1 = 8
    H2 = W2 = 16
    pool_ratio = 4
    N1, N2 = H1 * W1, H2 * W2

    key = jax.random.PRNGKey(0)
    ks = jax.random.split(key, 24)

    def nrm(k, shape, scale=1.0):
        return scale * jax.random.normal(k, shape, dtype=jnp.float32)

    x = nrm(ks[0], (B, N1, dim1))
    y = nrm(ks[1], (B, N2, dim2))

    params = dict(
        g1=1.0 + 0.1 * nrm(ks[2], (dim1,)), b1=0.05 * nrm(ks[3], (dim1,)),
        g2=1.0 + 0.1 * nrm(ks[4], (dim2,)), b2=0.05 * nrm(ks[5], (dim2,)),
        g3=1.0 + 0.1 * nrm(ks[6], (dim1,)), b3=0.05 * nrm(ks[7], (dim1,)),
        w_q=0.02 * nrm(ks[8], (dim1, dim1)),
        w_kv=0.02 * nrm(ks[9], (dim2, 2 * dim1)),
        w_proj=0.02 * nrm(ks[10], (dim1, dim1)),
        b_proj=0.05 * nrm(ks[11], (dim1,)),
        w_sr=math.sqrt(2.0 / dim2) * nrm(ks[12], (dim2, dim2)),
        b_sr=0.05 * nrm(ks[13], (dim2,)),
        g_n=1.0 + 0.1 * nrm(ks[14], (dim2,)), b_n=0.05 * nrm(ks[15], (dim2,)),
        w_fc1=0.02 * nrm(ks[16], (dim1, hidden)),
        b_fc1=0.05 * nrm(ks[17], (hidden,)),
        w_dw=math.sqrt(2.0 / 9.0) * nrm(ks[18], (hidden, 3, 3)),
        b_dw=0.05 * nrm(ks[19], (hidden,)),
        w_fc2=0.02 * nrm(ks[20], (hidden, dim1)),
        b_fc2=0.05 * nrm(ks[21], (dim1,)),
    )

    fwd = jax.jit(block_feed_forward,
                  static_argnames=("H2", "W2", "H1", "W1", "num_heads",
                                   "pool_ratio"))
    out = fwd(x, y, params, H2=H2, W2=W2, H1=H1, W1=W1,
              num_heads=num_heads, pool_ratio=pool_ratio)
    out = jax.block_until_ready(out)

    ref = _reference(x, y, params, H2=H2, W2=W2, H1=H1, W1=W1,
                     num_heads=num_heads, pool_ratio=pool_ratio)
    ref = jax.block_until_ready(ref)

    assert out.shape == (B, N1, dim1)
    err = float(jnp.max(jnp.abs(out - ref)))
    # bf16 MXU operands / bf16 inter-kernel hand-off + approximate softmax
    # reciprocal -> loose tolerance.
    assert err < 1e-2, f"max abs err {err}"

    print("KERNEL_OK")
</pallas_src>

<mosaic_0001>
module attributes {stable_mosaic.version = 11 : i64} {
  func.func @kernel(%arg0: i32, %arg1: memref<1x64x32xf32, #tpu.memory_space<vmem>>, %arg2: memref<1x256x32xf32, #tpu.memory_space<vmem>>, %arg3: memref<16x256xf32, #tpu.memory_space<vmem>>, %arg4: memref<1x32xf32, #tpu.memory_space<vmem>>, %arg5: memref<1x32xf32, #tpu.memory_space<vmem>>, %arg6: memref<1x32xf32, #tpu.memory_space<vmem>>, %arg7: memref<1x32xf32, #tpu.memory_space<vmem>>, %arg8: memref<32x32xbf16, #tpu.memory_space<vmem>>, %arg9: memref<32x32xbf16, #tpu.memory_space<vmem>>, %arg10: memref<1x32xf32, #tpu.memory_space<vmem>>, %arg11: memref<1x32xf32, #tpu.memory_space<vmem>>, %arg12: memref<1x32xf32, #tpu.memory_space<vmem>>, %arg13: memref<32x32xbf16, #tpu.memory_space<vmem>>, %arg14: memref<32x32xbf16, #tpu.memory_space<vmem>>, %arg15: memref<32x32xf32, #tpu.memory_space<vmem>>, %arg16: memref<1x32xf32, #tpu.memory_space<vmem>>, %arg17: memref<1x32xf32, #tpu.memory_space<vmem>>, %arg18: memref<1x32xf32, #tpu.memory_space<vmem>>, %arg19: memref<32x128xbf16, #tpu.memory_space<vmem>>, %arg20: memref<1x128xf32, #tpu.memory_space<vmem>>, %arg21: memref<1x64x32xf32, #tpu.memory_space<vmem>>, %arg22: memref<1x64x128xbf16, #tpu.memory_space<vmem>>) attributes {dimension_semantics = [#tpu.dimension_semantics<parallel>], iteration_bounds = array<i64: 2>, scalar_prefetch = 0 : i64, scratch_operands = 0 : i64, tpu.core_type = #tpu.core_type<tc>, window_params = [{transform_indices = @transform_0, window_bounds = array<i64: 1, 64, 32>}, {transform_indices = @transform_1, window_bounds = array<i64: 1, 256, 32>}, {pipeline_mode = #tpu.pipeline_mode<synchronous>, transform_indices = @transform_2, window_bounds = array<i64: 16, 256>}, {pipeline_mode = #tpu.pipeline_mode<synchronous>, transform_indices = @transform_3, window_bounds = array<i64: 1, 32>}, {pipeline_mode = #tpu.pipeline_mode<synchronous>, transform_indices = @transform_4, window_bounds = array<i64: 1, 32>}, {pipeline_mode = #tpu.pipeline_mode<synchronous>, transform_indices = @transform_5, window_bounds = array<i64: 1, 32>}, {pipeline_mode = #tpu.pipeline_mode<synchronous>, transform_indices = @transform_6, window_bounds = array<i64: 1, 32>}, {pipeline_mode = #tpu.pipeline_mode<synchronous>, transform_indices = @transform_7, window_bounds = array<i64: 32, 32>}, {pipeline_mode = #tpu.pipeline_mode<synchronous>, transform_indices = @transform_8, window_bounds = array<i64: 32, 32>}, {pipeline_mode = #tpu.pipeline_mode<synchronous>, transform_indices = @transform_9, window_bounds = array<i64: 1, 32>}, {pipeline_mode = #tpu.pipeline_mode<synchronous>, transform_indices = @transform_10, window_bounds = array<i64: 1, 32>}, {pipeline_mode = #tpu.pipeline_mode<synchronous>, transform_indices = @transform_11, window_bounds = array<i64: 1, 32>}, {pipeline_mode = #tpu.pipeline_mode<synchronous>, transform_indices = @transform_12, window_bounds = array<i64: 32, 32>}, {pipeline_mode = #tpu.pipeline_mode<synchronous>, transform_indices = @transform_13, window_bounds = array<i64: 32, 32>}, {pipeline_mode = #tpu.pipeline_mode<synchronous>, transform_indices = @transform_14, window_bounds = array<i64: 32, 32>}, {pipeline_mode = #tpu.pipeline_mode<synchronous>, transform_indices = @transform_15, window_bounds = array<i64: 1, 32>}, {pipeline_mode = #tpu.pipeline_mode<synchronous>, transform_indices = @transform_16, window_bounds = array<i64: 1, 32>}, {pipeline_mode = #tpu.pipeline_mode<synchronous>, transform_indices = @transform_17, window_bounds = array<i64: 1, 32>}, {pipeline_mode = #tpu.pipeline_mode<synchronous>, transform_indices = @transform_18, window_bounds = array<i64: 32, 128>}, {pipeline_mode = #tpu.pipeline_mode<synchronous>, transform_indices = @transform_19, window_bounds = array<i64: 1, 128>}, {transform_indices = @transform_20, window_bounds = array<i64: 1, 64, 32>}, {transform_indices = @transform_21, window_bounds = array<i64: 1, 64, 128>}]} {
    %c0 = arith.constant 0 : index
    %c0_0 = arith.constant 0 : index
    %c0_1 = arith.constant 0 : index
    %0 = vector.load %arg1[%c0, %c0_0, %c0_1] : memref<1x64x32xf32, #tpu.memory_space<vmem>>, vector<1x64x32xf32>
    %1 = vector.shape_cast %0 : vector<1x64x32xf32> to vector<64x32xf32>
    %c0_2 = arith.constant 0 : index
    %c0_3 = arith.constant 0 : index
    %c0_4 = arith.constant 0 : index
    %2 = vector.load %arg2[%c0_2, %c0_3, %c0_4] : memref<1x256x32xf32, #tpu.memory_space<vmem>>, vector<1x256x32xf32>
    %3 = vector.shape_cast %2 : vector<1x256x32xf32> to vector<256x32xf32>
    %c0_5 = arith.constant 0 : index
    %c0_6 = arith.constant 0 : index
    %4 = vector.load %arg4[%c0_5, %c0_6] : memref<1x32xf32, #tpu.memory_space<vmem>>, vector<1x32xf32>
    %c0_7 = arith.constant 0 : index
    %c0_8 = arith.constant 0 : index
    %5 = vector.load %arg5[%c0_7, %c0_8] : memref<1x32xf32, #tpu.memory_space<vmem>>, vector<1x32xf32>
    %cst = arith.constant dense<0.000000e+00> : vector<64xf32>
    %6 = vector.multi_reduction <add>, %1, %cst [1] : vector<64x32xf32> to vector<64xf32>
    %7 = vector.shape_cast %6 : vector<64xf32> to vector<64x1xf32>
    %cst_9 = arith.constant 3.200000e+01 : f32
    %8 = vector.broadcast %cst_9 : f32 to vector<64x1xf32>
    %9 = arith.divf %7, %8 : vector<64x1xf32>
    %10 = vector.broadcast %9 : vector<64x1xf32> to vector<64x32xf32>
    %11 = arith.subf %1, %10 : vector<64x32xf32>
    %12 = arith.mulf %11, %11 : vector<64x32xf32>
    %cst_10 = arith.constant dense<0.000000e+00> : vector<64xf32>
    %13 = vector.multi_reduction <add>, %12, %cst_10 [1] : vector<64x32xf32> to vector<64xf32>
    %14 = vector.shape_cast %13 : vector<64xf32> to vector<64x1xf32>
    %cst_11 = arith.constant 3.200000e+01 : f32
    %15 = vector.broadcast %cst_11 : f32 to vector<64x1xf32>
    %16 = arith.divf %14, %15 : vector<64x1xf32>
    %cst_12 = arith.constant 9.99999974E-6 : f32
    %17 = vector.broadcast %cst_12 : f32 to vector<64x1xf32>
    %18 = arith.addf %16, %17 : vector<64x1xf32>
    %19 = math.rsqrt %18 : vector<64x1xf32>
    %20 = vector.broadcast %19 : vector<64x1xf32> to vector<64x32xf32>
    %21 = arith.mulf %11, %20 : vector<64x32xf32>
    %22 = vector.broadcast %4 : vector<1x32xf32> to vector<64x32xf32>
    %23 = arith.mulf %21, %22 : vector<64x32xf32>
    %24 = vector.broadcast %5 : vector<1x32xf32> to vector<64x32xf32>
    %25 = arith.addf %23, %24 : vector<64x32xf32>
    %26 = arith.truncf %25 : vector<64x32xf32> to vector<64x32xbf16>
    %c0_13 = arith.constant 0 : index
    %c0_14 = arith.constant 0 : index
    %27 = vector.load %arg8[%c0_13, %c0_14] : memref<32x32xbf16, #tpu.memory_space<vmem>>, vector<32x32xbf16>
    %cst_15 = arith.constant dense<0.000000e+00> : vector<64x32xf32>
    %28 = tpu.matmul %26, %27, %cst_15 {dimension_numbers = #tpu.dot_dimension_numbers<[1], [0], [0], [1], [0, 0, 1, 1], [], []>} : vector<64x32xbf16>, vector<32x32xbf16>, vector<64x32xf32> -> vector<64x32xf32>
    %c0_16 = arith.constant 0 : index
    %c0_17 = arith.constant 0 : index
    %29 = vector.load %arg6[%c0_16, %c0_17] : memref<1x32xf32, #tpu.memory_space<vmem>>, vector<1x32xf32>
    %c0_18 = arith.constant 0 : index
    %c0_19 = arith.constant 0 : index
    %30 = vector.load %arg7[%c0_18, %c0_19] : memref<1x32xf32, #tpu.memory_space<vmem>>, vector<1x32xf32>
    %cst_20 = arith.constant dense<0.000000e+00> : vector<256xf32>
    %31 = vector.multi_reduction <add>, %3, %cst_20 [1] : vector<256x32xf32> to vector<256xf32>
    %32 = vector.shape_cast %31 : vector<256xf32> to vector<256x1xf32>
    %cst_21 = arith.constant 3.200000e+01 : f32
    %33 = vector.broadcast %cst_21 : f32 to vector<256x1xf32>
    %34 = arith.divf %32, %33 : vector<256x1xf32>
    %35 = vector.broadcast %34 : vector<256x1xf32> to vector<256x32xf32>
    %36 = arith.subf %3, %35 : vector<256x32xf32>
    %37 = arith.mulf %36, %36 : vector<256x32xf32>
    %cst_22 = arith.constant dense<0.000000e+00> : vector<256xf32>
    %38 = vector.multi_reduction <add>, %37, %cst_22 [1] : vector<256x32xf32> to vector<256xf32>
    %39 = vector.shape_cast %38 : vector<256xf32> to vector<256x1xf32>
    %cst_23 = arith.constant 3.200000e+01 : f32
    %40 = vector.broadcast %cst_23 : f32 to vector<256x1xf32>
    %41 = arith.divf %39, %40 : vector<256x1xf32>
    %cst_24 = arith.constant 9.99999974E-6 : f32
    %42 = vector.broadcast %cst_24 : f32 to vector<256x1xf32>
    %43 = arith.addf %41, %42 : vector<256x1xf32>
    %44 = math.rsqrt %43 : vector<256x1xf32>
    %45 = vector.broadcast %44 : vector<256x1xf32> to vector<256x32xf32>
    %46 = arith.mulf %36, %45 : vector<256x32xf32>
    %47 = vector.broadcast %29 : vector<1x32xf32> to vector<256x32xf32>
    %48 = arith.mulf %46, %47 : vector<256x32xf32>
    %49 = vector.broadcast %30 : vector<1x32xf32> to vector<256x32xf32>
    %50 = arith.addf %48, %49 : vector<256x32xf32>
    %c0_25 = arith.constant 0 : index
    %c0_26 = arith.constant 0 : index
    %51 = vector.load %arg3[%c0_25, %c0_26] : memref<16x256xf32, #tpu.memory_space<vmem>>, vector<16x256xf32>
    %cst_27 = arith.constant dense<0.000000e+00> : vector<16x32xf32>
    %52 = tpu.matmul %51, %50, %cst_27 {dimension_numbers = #tpu.dot_dimension_numbers<[1], [0], [0], [1], [0, 0, 1, 1], [], []>} : vector<16x256xf32>, vector<256x32xf32>, vector<16x32xf32> -> vector<16x32xf32>
    %53 = arith.truncf %52 : vector<16x32xf32> to vector<16x32xbf16>
    %c0_28 = arith.constant 0 : index
    %c0_29 = arith.constant 0 : index
    %54 = vector.load %arg9[%c0_28, %c0_29] : memref<32x32xbf16, #tpu.memory_space<vmem>>, vector<32x32xbf16>
    %cst_30 = arith.constant dense<0.000000e+00> : vector<16x32xf32>
    %55 = tpu.matmul %53, %54, %cst_30 {dimension_numbers = #tpu.dot_dimension_numbers<[1], [0], [0], [1], [0, 0, 1, 1], [], []>} : vector<16x32xbf16>, vector<32x32xbf16>, vector<16x32xf32> -> vector<16x32xf32>
    %c0_31 = arith.constant 0 : index
    %c0_32 = arith.constant 0 : index
    %56 = vector.load %arg10[%c0_31, %c0_32] : memref<1x32xf32, #tpu.memory_space<vmem>>, vector<1x32xf32>
    %57 = vector.broadcast %56 : vector<1x32xf32> to vector<16x32xf32>
    %58 = arith.addf %55, %57 : vector<16x32xf32>
    %c0_33 = arith.constant 0 : index
    %c0_34 = arith.constant 0 : index
    %59 = vector.load %arg11[%c0_33, %c0_34] : memref<1x32xf32, #tpu.memory_space<vmem>>, vector<1x32xf32>
    %c0_35 = arith.constant 0 : index
    %c0_36 = arith.constant 0 : index
    %60 = vector.load %arg12[%c0_35, %c0_36] : memref<1x32xf32, #tpu.memory_space<vmem>>, vector<1x32xf32>
    %cst_37 = arith.constant dense<0.000000e+00> : vector<16xf32>
    %61 = vector.multi_reduction <add>, %58, %cst_37 [1] : vector<16x32xf32> to vector<16xf32>
    %62 = vector.shape_cast %61 : vector<16xf32> to vector<16x1xf32>
    %cst_38 = arith.constant 3.200000e+01 : f32
    %63 = vector.broadcast %cst_38 : f32 to vector<16x1xf32>
    %64 = arith.divf %62, %63 : vector<16x1xf32>
    %65 = vector.broadcast %64 : vector<16x1xf32> to vector<16x32xf32>
    %66 = arith.subf %58, %65 : vector<16x32xf32>
    %67 = arith.mulf %66, %66 : vector<16x32xf32>
    %cst_39 = arith.constant dense<0.000000e+00> : vector<16xf32>
    %68 = vector.multi_reduction <add>, %67, %cst_39 [1] : vector<16x32xf32> to vector<16xf32>
    %69 = vector.shape_cast %68 : vector<16xf32> to vector<16x1xf32>
    %cst_40 = arith.constant 3.200000e+01 : f32
    %70 = vector.broadcast %cst_40 : f32 to vector<16x1xf32>
    %71 = arith.divf %69, %70 : vector<16x1xf32>
    %cst_41 = arith.constant 9.99999974E-6 : f32
    %72 = vector.broadcast %cst_41 : f32 to vector<16x1xf32>
    %73 = arith.addf %71, %72 : vector<16x1xf32>
    %74 = math.rsqrt %73 : vector<16x1xf32>
    %75 = vector.broadcast %74 : vector<16x1xf32> to vector<16x32xf32>
    %76 = arith.mulf %66, %75 : vector<16x32xf32>
    %77 = vector.broadcast %59 : vector<1x32xf32> to vector<16x32xf32>
    %78 = arith.mulf %76, %77 : vector<16x32xf32>
    %79 = vector.broadcast %60 : vector<1x32xf32> to vector<16x32xf32>
    %80 = arith.addf %78, %79 : vector<16x32xf32>
    %cst_42 = arith.constant 5.000000e-01 : f32
    %81 = vector.broadcast %cst_42 : f32 to vector<16x32xf32>
    %82 = arith.mulf %81, %80 : vector<16x32xf32>
    %cst_43 = arith.constant 4.471500e-02 : f32
    %83 = vector.broadcast %cst_43 : f32 to vector<16x32xf32>
    %84 = arith.mulf %83, %80 : vector<16x32xf32>
    %85 = arith.mulf %84, %80 : vector<16x32xf32>
    %86 = arith.mulf %85, %80 : vector<16x32xf32>
    %87 = arith.addf %80, %86 : vector<16x32xf32>
    %cst_44 = arith.constant 0.797884583 : f32
    %88 = vector.broadcast %cst_44 : f32 to vector<16x32xf32>
    %89 = arith.mulf %88, %87 : vector<16x32xf32>
    %90 = math.tanh %89 : vector<16x32xf32>
    %cst_45 = arith.constant 1.000000e+00 : f32
    %91 = vector.broadcast %cst_45 : f32 to vector<16x32xf32>
    %92 = arith.addf %91, %90 : vector<16x32xf32>
    %93 = arith.mulf %82, %92 : vector<16x32xf32>
    %94 = arith.truncf %93 : vector<16x32xf32> to vector<16x32xbf16>
    %c0_46 = arith.constant 0 : index
    %c0_47 = arith.constant 0 : index
    %95 = vector.load %arg13[%c0_46, %c0_47] : memref<32x32xbf16, #tpu.memory_space<vmem>>, vector<32x32xbf16>
    %cst_48 = arith.constant dense<0.000000e+00> : vector<16x32xf32>
    %96 = tpu.matmul %94, %95, %cst_48 {dimension_numbers = #tpu.dot_dimension_numbers<[1], [0], [0], [1], [0, 0, 1, 1], [], []>} : vector<16x32xbf16>, vector<32x32xbf16>, vector<16x32xf32> -> vector<16x32xf32>
    %c0_49 = arith.constant 0 : index
    %c0_50 = arith.constant 0 : index
    %97 = vector.load %arg14[%c0_49, %c0_50] : memref<32x32xbf16, #tpu.memory_space<vmem>>, vector<32x32xbf16>
    %cst_51 = arith.constant dense<0.000000e+00> : vector<16x32xf32>
    %98 = tpu.matmul %94, %97, %cst_51 {dimension_numbers = #tpu.dot_dimension_numbers<[1], [0], [0], [1], [0, 0, 1, 1], [], []>} : vector<16x32xbf16>, vector<32x32xbf16>, vector<16x32xf32> -> vector<16x32xf32>
    %c0_52 = arith.constant 0 : index
    %c0_53 = arith.constant 0 : index
    %99 = vector.load %arg15[%c0_52, %c0_53] : memref<32x32xf32, #tpu.memory_space<vmem>>, vector<32x32xf32>
    %cst_54 = arith.constant 0.000000e+00 : f32
    %100 = vector.broadcast %cst_54 : f32 to vector<64x32xf32>
    %101 = vector.extract_strided_slice %28 {offsets = [0, 0], sizes = [64, 8], strides = [1, 1]} : vector<64x32xf32> to vector<64x8xf32>
    %102 = arith.truncf %101 : vector<64x8xf32> to vector<64x8xbf16>
    %103 = vector.extract_strided_slice %96 {offsets = [0, 0], sizes = [16, 8], strides = [1, 1]} : vector<16x32xf32> to vector<16x8xf32>
    %104 = arith.truncf %103 : vector<16x8xf32> to vector<16x8xbf16>
    %105 = vector.extract_strided_slice %98 {offsets = [0, 0], sizes = [16, 8], strides = [1, 1]} : vector<16x32xf32> to vector<16x8xf32>
    %106 = arith.truncf %105 : vector<16x8xf32> to vector<16x8xbf16>
    %cst_55 = arith.constant dense<0.000000e+00> : vector<64x16xf32>
    %107 = tpu.matmul %102, %104, %cst_55 {dimension_numbers = #tpu.dot_dimension_numbers<[1], [1], [0], [0], [0, 0, 1, 0], [], []>} : vector<64x8xbf16>, vector<16x8xbf16>, vector<64x16xf32> -> vector<64x16xf32>
    %cst_56 = arith.constant dense<0xFF800000> : vector<64xf32>
    %108 = vector.multi_reduction <maximumf>, %107, %cst_56 [1] : vector<64x16xf32> to vector<64xf32>
    %109 = vector.shape_cast %108 : vector<64xf32> to vector<64x1xf32>
    %110 = vector.broadcast %109 : vector<64x1xf32> to vector<64x16xf32>
    %111 = arith.subf %107, %110 : vector<64x16xf32>
    %112 = math.exp %111 : vector<64x16xf32>
    %cst_57 = arith.constant dense<0.000000e+00> : vector<64xf32>
    %113 = vector.multi_reduction <add>, %112, %cst_57 [1] : vector<64x16xf32> to vector<64xf32>
    %114 = vector.shape_cast %113 : vector<64xf32> to vector<64x1xf32>
    %115 = tpu.reciprocal %114 {approx = true} : vector<64x1xf32> -> vector<64x1xf32>
    %116 = vector.broadcast %115 : vector<64x1xf32> to vector<64x16xf32>
    %117 = arith.mulf %112, %116 : vector<64x16xf32>
    %118 = arith.truncf %117 : vector<64x16xf32> to vector<64x16xbf16>
    %cst_58 = arith.constant dense<0.000000e+00> : vector<64x8xf32>
    %119 = tpu.matmul %118, %106, %cst_58 {dimension_numbers = #tpu.dot_dimension_numbers<[1], [0], [0], [1], [0, 0, 1, 1], [], []>} : vector<64x16xbf16>, vector<16x8xbf16>, vector<64x8xf32> -> vector<64x8xf32>
    %120 = arith.truncf %119 : vector<64x8xf32> to vector<64x8xbf16>
    %121 = vector.extract_strided_slice %99 {offsets = [0, 0], sizes = [8, 32], strides = [1, 1]} : vector<32x32xf32> to vector<8x32xf32>
    %122 = arith.truncf %121 : vector<8x32xf32> to vector<8x32xbf16>
    %cst_59 = arith.constant dense<0.000000e+00> : vector<64x32xf32>
    %123 = tpu.matmul %120, %122, %cst_59 {dimension_numbers = #tpu.dot_dimension_numbers<[1], [0], [0], [1], [0, 0, 1, 1], [], []>} : vector<64x8xbf16>, vector<8x32xbf16>, vector<64x32xf32> -> vector<64x32xf32>
    %124 = arith.addf %100, %123 : vector<64x32xf32>
    %125 = vector.extract_strided_slice %28 {offsets = [0, 8], sizes = [64, 8], strides = [1, 1]} : vector<64x32xf32> to vector<64x8xf32>
    %126 = arith.truncf %125 : vector<64x8xf32> to vector<64x8xbf16>
    %127 = vector.extract_strided_slice %96 {offsets = [0, 8], sizes = [16, 8], strides = [1, 1]} : vector<16x32xf32> to vector<16x8xf32>
    %128 = arith.truncf %127 : vector<16x8xf32> to vector<16x8xbf16>
    %129 = vector.extract_strided_slice %98 {offsets = [0, 8], sizes = [16, 8], strides = [1, 1]} : vector<16x32xf32> to vector<16x8xf32>
    %130 = arith.truncf %129 : vector<16x8xf32> to vector<16x8xbf16>
    %cst_60 = arith.constant dense<0.000000e+00> : vector<64x16xf32>
    %131 = tpu.matmul %126, %128, %cst_60 {dimension_numbers = #tpu.dot_dimension_numbers<[1], [1], [0], [0], [0, 0, 1, 0], [], []>} : vector<64x8xbf16>, vector<16x8xbf16>, vector<64x16xf32> -> vector<64x16xf32>
    %cst_61 = arith.constant dense<0xFF800000> : vector<64xf32>
    %132 = vector.multi_reduction <maximumf>, %131, %cst_61 [1] : vector<64x16xf32> to vector<64xf32>
    %133 = vector.shape_cast %132 : vector<64xf32> to vector<64x1xf32>
    %134 = vector.broadcast %133 : vector<64x1xf32> to vector<64x16xf32>
    %135 = arith.subf %131, %134 : vector<64x16xf32>
    %136 = math.exp %135 : vector<64x16xf32>
    %cst_62 = arith.constant dense<0.000000e+00> : vector<64xf32>
    %137 = vector.multi_reduction <add>, %136, %cst_62 [1] : vector<64x16xf32> to vector<64xf32>
    %138 = vector.shape_cast %137 : vector<64xf32> to vector<64x1xf32>
    %139 = tpu.reciprocal %138 {approx = true} : vector<64x1xf32> -> vector<64x1xf32>
    %140 = vector.broadcast %139 : vector<64x1xf32> to vector<64x16xf32>
    %141 = arith.mulf %136, %140 : vector<64x16xf32>
    %142 = arith.truncf %141 : vector<64x16xf32> to vector<64x16xbf16>
    %cst_63 = arith.constant dense<0.000000e+00> : vector<64x8xf32>
    %143 = tpu.matmul %142, %130, %cst_63 {dimension_numbers = #tpu.dot_dimension_numbers<[1], [0], [0], [1], [0, 0, 1, 1], [], []>} : vector<64x16xbf16>, vector<16x8xbf16>, vector<64x8xf32> -> vector<64x8xf32>
    %144 = arith.truncf %143 : vector<64x8xf32> to vector<64x8xbf16>
    %145 = vector.extract_strided_slice %99 {offsets = [8, 0], sizes = [8, 32], strides = [1, 1]} : vector<32x32xf32> to vector<8x32xf32>
    %146 = arith.truncf %145 : vector<8x32xf32> to vector<8x32xbf16>
    %cst_64 = arith.constant dense<0.000000e+00> : vector<64x32xf32>
    %147 = tpu.matmul %144, %146, %cst_64 {dimension_numbers = #tpu.dot_dimension_numbers<[1], [0], [0], [1], [0, 0, 1, 1], [], []>} : vector<64x8xbf16>, vector<8x32xbf16>, vector<64x32xf32> -> vector<64x32xf32>
    %148 = arith.addf %124, %147 : vector<64x32xf32>
    %149 = vector.extract_strided_slice %28 {offsets = [0, 16], sizes = [64, 8], strides = [1, 1]} : vector<64x32xf32> to vector<64x8xf32>
    %150 = arith.truncf %149 : vector<64x8xf32> to vector<64x8xbf16>
    %151 = vector.extract_strided_slice %96 {offsets = [0, 16], sizes = [16, 8], strides = [1, 1]} : vector<16x32xf32> to vector<16x8xf32>
    %152 = arith.truncf %151 : vector<16x8xf32> to vector<16x8xbf16>
    %153 = vector.extract_strided_slice %98 {offsets = [0, 16], sizes = [16, 8], strides = [1, 1]} : vector<16x32xf32> to vector<16x8xf32>
    %154 = arith.truncf %153 : vector<16x8xf32> to vector<16x8xbf16>
    %cst_65 = arith.constant dense<0.000000e+00> : vector<64x16xf32>
    %155 = tpu.matmul %150, %152, %cst_65 {dimension_numbers = #tpu.dot_dimension_numbers<[1], [1], [0], [0], [0, 0, 1, 0], [], []>} : vector<64x8xbf16>, vector<16x8xbf16>, vector<64x16xf32> -> vector<64x16xf32>
    %cst_66 = arith.constant dense<0xFF800000> : vector<64xf32>
    %156 = vector.multi_reduction <maximumf>, %155, %cst_66 [1] : vector<64x16xf32> to vector<64xf32>
    %157 = vector.shape_cast %156 : vector<64xf32> to vector<64x1xf32>
    %158 = vector.broadcast %157 : vector<64x1xf32> to vector<64x16xf32>
    %159 = arith.subf %155, %158 : vector<64x16xf32>
    %160 = math.exp %159 : vector<64x16xf32>
    %cst_67 = arith.constant dense<0.000000e+00> : vector<64xf32>
    %161 = vector.multi_reduction <add>, %160, %cst_67 [1] : vector<64x16xf32> to vector<64xf32>
    %162 = vector.shape_cast %161 : vector<64xf32> to vector<64x1xf32>
    %163 = tpu.reciprocal %162 {approx = true} : vector<64x1xf32> -> vector<64x1xf32>
    %164 = vector.broadcast %163 : vector<64x1xf32> to vector<64x16xf32>
    %165 = arith.mulf %160, %164 : vector<64x16xf32>
    %166 = arith.truncf %165 : vector<64x16xf32> to vector<64x16xbf16>
    %cst_68 = arith.constant dense<0.000000e+00> : vector<64x8xf32>
    %167 = tpu.matmul %166, %154, %cst_68 {dimension_numbers = #tpu.dot_dimension_numbers<[1], [0], [0], [1], [0, 0, 1, 1], [], []>} : vector<64x16xbf16>, vector<16x8xbf16>, vector<64x8xf32> -> vector<64x8xf32>
    %168 = arith.truncf %167 : vector<64x8xf32> to vector<64x8xbf16>
    %169 = vector.extract_strided_slice %99 {offsets = [16, 0], sizes = [8, 32], strides = [1, 1]} : vector<32x32xf32> to vector<8x32xf32>
    %170 = arith.truncf %169 : vector<8x32xf32> to vector<8x32xbf16>
    %cst_69 = arith.constant dense<0.000000e+00> : vector<64x32xf32>
    %171 = tpu.matmul %168, %170, %cst_69 {dimension_numbers = #tpu.dot_dimension_numbers<[1], [0], [0], [1], [0, 0, 1, 1], [], []>} : vector<64x8xbf16>, vector<8x32xbf16>, vector<64x32xf32> -> vector<64x32xf32>
    %172 = arith.addf %148, %171 : vector<64x32xf32>
    %173 = vector.extract_strided_slice %28 {offsets = [0, 24], sizes = [64, 8], strides = [1, 1]} : vector<64x32xf32> to vector<64x8xf32>
    %174 = arith.truncf %173 : vector<64x8xf32> to vector<64x8xbf16>
    %175 = vector.extract_strided_slice %96 {offsets = [0, 24], sizes = [16, 8], strides = [1, 1]} : vector<16x32xf32> to vector<16x8xf32>
    %176 = arith.truncf %175 : vector<16x8xf32> to vector<16x8xbf16>
    %177 = vector.extract_strided_slice %98 {offsets = [0, 24], sizes = [16, 8], strides = [1, 1]} : vector<16x32xf32> to vector<16x8xf32>
    %178 = arith.truncf %177 : vector<16x8xf32> to vector<16x8xbf16>
    %cst_70 = arith.constant dense<0.000000e+00> : vector<64x16xf32>
    %179 = tpu.matmul %174, %176, %cst_70 {dimension_numbers = #tpu.dot_dimension_numbers<[1], [1], [0], [0], [0, 0, 1, 0], [], []>} : vector<64x8xbf16>, vector<16x8xbf16>, vector<64x16xf32> -> vector<64x16xf32>
    %cst_71 = arith.constant dense<0xFF800000> : vector<64xf32>
    %180 = vector.multi_reduction <maximumf>, %179, %cst_71 [1] : vector<64x16xf32> to vector<64xf32>
    %181 = vector.shape_cast %180 : vector<64xf32> to vector<64x1xf32>
    %182 = vector.broadcast %181 : vector<64x1xf32> to vector<64x16xf32>
    %183 = arith.subf %179, %182 : vector<64x16xf32>
    %184 = math.exp %183 : vector<64x16xf32>
    %cst_72 = arith.constant dense<0.000000e+00> : vector<64xf32>
    %185 = vector.multi_reduction <add>, %184, %cst_72 [1] : vector<64x16xf32> to vector<64xf32>
    %186 = vector.shape_cast %185 : vector<64xf32> to vector<64x1xf32>
    %187 = tpu.reciprocal %186 {approx = true} : vector<64x1xf32> -> vector<64x1xf32>
    %188 = vector.broadcast %187 : vector<64x1xf32> to vector<64x16xf32>
    %189 = arith.mulf %184, %188 : vector<64x16xf32>
    %190 = arith.truncf %189 : vector<64x16xf32> to vector<64x16xbf16>
    %cst_73 = arith.constant dense<0.000000e+00> : vector<64x8xf32>
    %191 = tpu.matmul %190, %178, %cst_73 {dimension_numbers = #tpu.dot_dimension_numbers<[1], [0], [0], [1], [0, 0, 1, 1], [], []>} : vector<64x16xbf16>, vector<16x8xbf16>, vector<64x8xf32> -> vector<64x8xf32>
    %192 = arith.truncf %191 : vector<64x8xf32> to vector<64x8xbf16>
    %193 = vector.extract_strided_slice %99 {offsets = [24, 0], sizes = [8, 32], strides = [1, 1]} : vector<32x32xf32> to vector<8x32xf32>
    %194 = arith.truncf %193 : vector<8x32xf32> to vector<8x32xbf16>
    %cst_74 = arith.constant dense<0.000000e+00> : vector<64x32xf32>
    %195 = tpu.matmul %192, %194, %cst_74 {dimension_numbers = #tpu.dot_dimension_numbers<[1], [0], [0], [1], [0, 0, 1, 1], [], []>} : vector<64x8xbf16>, vector<8x32xbf16>, vector<64x32xf32> -> vector<64x32xf32>
    %196 = arith.addf %172, %195 : vector<64x32xf32>
    %197 = arith.addf %1, %196 : vector<64x32xf32>
    %c0_75 = arith.constant 0 : index
    %c0_76 = arith.constant 0 : index
    %198 = vector.load %arg16[%c0_75, %c0_76] : memref<1x32xf32, #tpu.memory_space<vmem>>, vector<1x32xf32>
    %199 = vector.broadcast %198 : vector<1x32xf32> to vector<64x32xf32>
    %200 = arith.addf %197, %199 : vector<64x32xf32>
    %c0_77 = arith.constant 0 : index
    %c0_78 = arith.constant 0 : index
    %c0_79 = arith.constant 0 : index
    %201 = vector.load %arg21[%c0_77, %c0_78, %c0_79] : memref<1x64x32xf32, #tpu.memory_space<vmem>>, vector<1x64x32xf32>
    %202 = vector.shape_cast %201 : vector<1x64x32xf32> to vector<64x32xf32>
    %203 = vector.shape_cast %200 : vector<64x32xf32> to vector<1x64x32xf32>
    tpu.vector_store %arg21[%c0_77, %c0_78, %c0_79], %203 {strides = array<i32>} : memref<1x64x32xf32, #tpu.memory_space<vmem>>, vector<1x64x32xf32>,
    %c0_80 = arith.constant 0 : index
    %c0_81 = arith.constant 0 : index
    %204 = vector.load %arg17[%c0_80, %c0_81] : memref<1x32xf32, #tpu.memory_space<vmem>>, vector<1x32xf32>
    %c0_82 = arith.constant 0 : index
    %c0_83 = arith.constant 0 : index
    %205 = vector.load %arg18[%c0_82, %c0_83] : memref<1x32xf32, #tpu.memory_space<vmem>>, vector<1x32xf32>
    %cst_84 = arith.constant dense<0.000000e+00> : vector<64xf32>
    %206 = vector.multi_reduction <add>, %200, %cst_84 [1] : vector<64x32xf32> to vector<64xf32>
    %207 = vector.shape_cast %206 : vector<64xf32> to vector<64x1xf32>
    %cst_85 = arith.constant 3.200000e+01 : f32
    %208 = vector.broadcast %cst_85 : f32 to vector<64x1xf32>
    %209 = arith.divf %207, %208 : vector<64x1xf32>
    %210 = vector.broadcast %209 : vector<64x1xf32> to vector<64x32xf32>
    %211 = arith.subf %200, %210 : vector<64x32xf32>
    %212 = arith.mulf %211, %211 : vector<64x32xf32>
    %cst_86 = arith.constant dense<0.000000e+00> : vector<64xf32>
    %213 = vector.multi_reduction <add>, %212, %cst_86 [1] : vector<64x32xf32> to vector<64xf32>
    %214 = vector.shape_cast %213 : vector<64xf32> to vector<64x1xf32>
    %cst_87 = arith.constant 3.200000e+01 : f32
    %215 = vector.broadcast %cst_87 : f32 to vector<64x1xf32>
    %216 = arith.divf %214, %215 : vector<64x1xf32>
    %cst_88 = arith.constant 9.99999974E-6 : f32
    %217 = vector.broadcast %cst_88 : f32 to vector<64x1xf32>
    %218 = arith.addf %216, %217 : vector<64x1xf32>
    %219 = math.rsqrt %218 : vector<64x1xf32>
    %220 = vector.broadcast %219 : vector<64x1xf32> to vector<64x32xf32>
    %221 = arith.mulf %211, %220 : vector<64x32xf32>
    %222 = vector.broadcast %204 : vector<1x32xf32> to vector<64x32xf32>
    %223 = arith.mulf %221, %222 : vector<64x32xf32>
    %224 = vector.broadcast %205 : vector<1x32xf32> to vector<64x32xf32>
    %225 = arith.addf %223, %224 : vector<64x32xf32>
    %226 = arith.truncf %225 : vector<64x32xf32> to vector<64x32xbf16>
    %c0_89 = arith.constant 0 : index
    %c0_90 = arith.constant 0 : index
    %227 = vector.load %arg19[%c0_89, %c0_90] : memref<32x128xbf16, #tpu.memory_space<vmem>>, vector<32x128xbf16>
    %cst_91 = arith.constant dense<0.000000e+00> : vector<64x128xf32>
    %228 = tpu.matmul %226, %227, %cst_91 {dimension_numbers = #tpu.dot_dimension_numbers<[1], [0], [0], [1], [0, 0, 1, 1], [], []>} : vector<64x32xbf16>, vector<32x128xbf16>, vector<64x128xf32> -> vector<64x128xf32>
    %c0_92 = arith.constant 0 : index
    %c0_93 = arith.constant 0 : index
    %229 = vector.load %arg20[%c0_92, %c0_93] : memref<1x128xf32, #tpu.memory_space<vmem>>, vector<1x128xf32>
    %230 = vector.broadcast %229 : vector<1x128xf32> to vector<64x128xf32>
    %231 = arith.addf %228, %230 : vector<64x128xf32>
    %232 = arith.truncf %231 : vector<64x128xf32> to vector<64x128xbf16>
    %c0_94 = arith.constant 0 : index
    %c0_95 = arith.constant 0 : index
    %c0_96 = arith.constant 0 : index
    %233 = vector.load %arg22[%c0_94, %c0_95, %c0_96] : memref<1x64x128xbf16, #tpu.memory_space<vmem>>, vector<1x64x128xbf16>
    %234 = vector.shape_cast %233 : vector<1x64x128xbf16> to vector<64x128xbf16>
    %235 = vector.shape_cast %232 : vector<64x128xbf16> to vector<1x64x128xbf16>
    tpu.vector_store %arg22[%c0_94, %c0_95, %c0_96], %235 {strides = array<i32>} : memref<1x64x128xbf16, #tpu.memory_space<vmem>>, vector<1x64x128xbf16>,
    return
  }
  func.func @transform_0(%arg0: i32) -> (i32, i32, i32) {
    %c0_i32 = arith.constant 0 : i32
    %c0_i32_0 = arith.constant 0 : i32
    %c0_i32_1 = arith.constant 0 : i32
    return %arg0, %c0_i32, %c0_i32_0 : i32, i32, i32
  }
  func.func @transform_1(%arg0: i32) -> (i32, i32, i32) {
    %c0_i32 = arith.constant 0 : i32
    %c0_i32_0 = arith.constant 0 : i32
    %c0_i32_1 = arith.constant 0 : i32
    return %arg0, %c0_i32, %c0_i32_0 : i32, i32, i32
  }
  func.func @transform_2(%arg0: i32) -> (i32, i32) {
    %c0_i32 = arith.constant 0 : i32
    %c0_i32_0 = arith.constant 0 : i32
    %c0_i32_1 = arith.constant 0 : i32
    return %c0_i32, %c0_i32_0 : i32, i32
  }
  func.func @transform_3(%arg0: i32) -> (i32, i32) {
    %c0_i32 = arith.constant 0 : i32
    %c0_i32_0 = arith.constant 0 : i32
    %c0_i32_1 = arith.constant 0 : i32
    return %c0_i32, %c0_i32_0 : i32, i32
  }
  func.func @transform_4(%arg0: i32) -> (i32, i32) {
    %c0_i32 = arith.constant 0 : i32
    %c0_i32_0 = arith.constant 0 : i32
    %c0_i32_1 = arith.constant 0 : i32
    return %c0_i32, %c0_i32_0 : i32, i32
  }
  func.func @transform_5(%arg0: i32) -> (i32, i32) {
    %c0_i32 = arith.constant 0 : i32
    %c0_i32_0 = arith.constant 0 : i32
    %c0_i32_1 = arith.constant 0 : i32
    return %c0_i32, %c0_i32_0 : i32, i32
  }
  func.func @transform_6(%arg0: i32) -> (i32, i32) {
    %c0_i32 = arith.constant 0 : i32
    %c0_i32_0 = arith.constant 0 : i32
    %c0_i32_1 = arith.constant 0 : i32
    return %c0_i32, %c0_i32_0 : i32, i32
  }
  func.func @transform_7(%arg0: i32) -> (i32, i32) {
    %c0_i32 = arith.constant 0 : i32
    %c0_i32_0 = arith.constant 0 : i32
    %c0_i32_1 = arith.constant 0 : i32
    return %c0_i32, %c0_i32_0 : i32, i32
  }
  func.func @transform_8(%arg0: i32) -> (i32, i32) {
    %c0_i32 = arith.constant 0 : i32
    %c0_i32_0 = arith.constant 0 : i32
    %c0_i32_1 = arith.constant 0 : i32
    return %c0_i32, %c0_i32_0 : i32, i32
  }
  func.func @transform_9(%arg0: i32) -> (i32, i32) {
    %c0_i32 = arith.constant 0 : i32
    %c0_i32_0 = arith.constant 0 : i32
    %c0_i32_1 = arith.constant 0 : i32
    return %c0_i32, %c0_i32_0 : i32, i32
  }
  func.func @transform_10(%arg0: i32) -> (i32, i32) {
    %c0_i32 = arith.constant 0 : i32
    %c0_i32_0 = arith.constant 0 : i32
    %c0_i32_1 = arith.constant 0 : i32
    return %c0_i32, %c0_i32_0 : i32, i32
  }
  func.func @transform_11(%arg0: i32) -> (i32, i32) {
    %c0_i32 = arith.constant 0 : i32
    %c0_i32_0 = arith.constant 0 : i32
    %c0_i32_1 = arith.constant 0 : i32
    return %c0_i32, %c0_i32_0 : i32, i32
  }
  func.func @transform_12(%arg0: i32) -> (i32, i32) {
    %c0_i32 = arith.constant 0 : i32
    %c0_i32_0 = arith.constant 0 : i32
    %c0_i32_1 = arith.constant 0 : i32
    return %c0_i32, %c0_i32_0 : i32, i32
  }
  func.func @transform_13(%arg0: i32) -> (i32, i32) {
    %c0_i32 = arith.constant 0 : i32
    %c0_i32_0 = arith.constant 0 : i32
    %c0_i32_1 = arith.constant 0 : i32
    return %c0_i32, %c0_i32_0 : i32, i32
  }
  func.func @transform_14(%arg0: i32) -> (i32, i32) {
    %c0_i32 = arith.constant 0 : i32
    %c0_i32_0 = arith.constant 0 : i32
    %c0_i32_1 = arith.constant 0 : i32
    return %c0_i32, %c0_i32_0 : i32, i32
  }
  func.func @transform_15(%arg0: i32) -> (i32, i32) {
    %c0_i32 = arith.constant 0 : i32
    %c0_i32_0 = arith.constant 0 : i32
    %c0_i32_1 = arith.constant 0 : i32
    return %c0_i32, %c0_i32_0 : i32, i32
  }
  func.func @transform_16(%arg0: i32) -> (i32, i32) {
    %c0_i32 = arith.constant 0 : i32
    %c0_i32_0 = arith.constant 0 : i32
    %c0_i32_1 = arith.constant 0 : i32
    return %c0_i32, %c0_i32_0 : i32, i32
  }
  func.func @transform_17(%arg0: i32) -> (i32, i32) {
    %c0_i32 = arith.constant 0 : i32
    %c0_i32_0 = arith.constant 0 : i32
    %c0_i32_1 = arith.constant 0 : i32
    return %c0_i32, %c0_i32_0 : i32, i32
  }
  func.func @transform_18(%arg0: i32) -> (i32, i32) {
    %c0_i32 = arith.constant 0 : i32
    %c0_i32_0 = arith.constant 0 : i32
    %c0_i32_1 = arith.constant 0 : i32
    return %c0_i32, %c0_i32_0 : i32, i32
  }
  func.func @transform_19(%arg0: i32) -> (i32, i32) {
    %c0_i32 = arith.constant 0 : i32
    %c0_i32_0 = arith.constant 0 : i32
    %c0_i32_1 = arith.constant 0 : i32
    return %c0_i32, %c0_i32_0 : i32, i32
  }
  func.func @transform_20(%arg0: i32) -> (i32, i32, i32) {
    %c0_i32 = arith.constant 0 : i32
    %c0_i32_0 = arith.constant 0 : i32
    %c0_i32_1 = arith.constant 0 : i32
    return %arg0, %c0_i32, %c0_i32_0 : i32, i32, i32
  }
  func.func @transform_21(%arg0: i32) -> (i32, i32, i32) {
    %c0_i32 = arith.constant 0 : i32
    %c0_i32_0 = arith.constant 0 : i32
    %c0_i32_1 = arith.constant 0 : i32
    return %arg0, %c0_i32, %c0_i32_0 : i32, i32, i32
  }
}

module attributes {stable_mosaic.version = 11 : i64} {
  func.func @kernel(%arg0: i32, %arg1: memref<1x10x10x128xbf16, #tpu.memory_space<vmem>>, %arg2: memref<9x128xf32, #tpu.memory_space<vmem>>, %arg3: memref<1x128xf32, #tpu.memory_space<vmem>>, %arg4: memref<128x32xbf16, #tpu.memory_space<vmem>>, %arg5: memref<1x32xf32, #tpu.memory_space<vmem>>, %arg6: memref<1x64x32xf32, #tpu.memory_space<vmem>>, %arg7: memref<1x64x32xf32, #tpu.memory_space<vmem>>) attributes {dimension_semantics = [#tpu.dimension_semantics<parallel>], iteration_bounds = array<i64: 2>, scalar_prefetch = 0 : i64, scratch_operands = 0 : i64, tpu.core_type = #tpu.core_type<tc>, window_params = [{transform_indices = @transform_0, window_bounds = array<i64: 1, 10, 10, 128>}, {pipeline_mode = #tpu.pipeline_mode<synchronous>, transform_indices = @transform_1, window_bounds = array<i64: 9, 128>}, {pipeline_mode = #tpu.pipeline_mode<synchronous>, transform_indices = @transform_2, window_bounds = array<i64: 1, 128>}, {pipeline_mode = #tpu.pipeline_mode<synchronous>, transform_indices = @transform_3, window_bounds = array<i64: 128, 32>}, {pipeline_mode = #tpu.pipeline_mode<synchronous>, transform_indices = @transform_4, window_bounds = array<i64: 1, 32>}, {transform_indices = @transform_5, window_bounds = array<i64: 1, 64, 32>}, {transform_indices = @transform_6, window_bounds = array<i64: 1, 64, 32>}]} {
    %c0 = arith.constant 0 : index
    %c0_0 = arith.constant 0 : index
    %c0_1 = arith.constant 0 : index
    %c0_2 = arith.constant 0 : index
    %0 = vector.load %arg1[%c0, %c0_0, %c0_1, %c0_2] : memref<1x10x10x128xbf16, #tpu.memory_space<vmem>>, vector<1x10x10x128xbf16>
    %1 = vector.shape_cast %0 : vector<1x10x10x128xbf16> to vector<10x10x128xbf16>
    %2 = arith.extf %1 : vector<10x10x128xbf16> to vector<10x10x128xf32>
    %3 = vector.extract_strided_slice %2 {offsets = [0, 0, 0], sizes = [8, 8, 128], strides = [1, 1, 1]} : vector<10x10x128xf32> to vector<8x8x128xf32>
    %c0_3 = arith.constant 0 : index
    %c0_4 = arith.constant 0 : index
    %4 = vector.load %arg2[%c0_3, %c0_4] : memref<9x128xf32, #tpu.memory_space<vmem>>, vector<1x128xf32>
    %5 = vector.shape_cast %4 : vector<1x128xf32> to vector<128xf32>
    %6 = vector.shape_cast %5 : vector<128xf32> to vector<1x1x128xf32>
    %7 = vector.broadcast %6 : vector<1x1x128xf32> to vector<8x8x128xf32>
    %8 = arith.mulf %3, %7 : vector<8x8x128xf32>
    %9 = vector.extract_strided_slice %2 {offsets = [0, 1, 0], sizes = [8, 8, 128], strides = [1, 1, 1]} : vector<10x10x128xf32> to vector<8x8x128xf32>
    %c1 = arith.constant 1 : index
    %c0_5 = arith.constant 0 : index
    %10 = vector.load %arg2[%c1, %c0_5] : memref<9x128xf32, #tpu.memory_space<vmem>>, vector<1x128xf32>
    %11 = vector.shape_cast %10 : vector<1x128xf32> to vector<128xf32>
    %12 = vector.shape_cast %11 : vector<128xf32> to vector<1x1x128xf32>
    %13 = vector.broadcast %12 : vector<1x1x128xf32> to vector<8x8x128xf32>
    %14 = arith.mulf %9, %13 : vector<8x8x128xf32>
    %15 = arith.addf %8, %14 : vector<8x8x128xf32>
    %16 = vector.extract_strided_slice %2 {offsets = [0, 2, 0], sizes = [8, 8, 128], strides = [1, 1, 1]} : vector<10x10x128xf32> to vector<8x8x128xf32>
    %c2 = arith.constant 2 : index
    %c0_6 = arith.constant 0 : index
    %17 = vector.load %arg2[%c2, %c0_6] : memref<9x128xf32, #tpu.memory_space<vmem>>, vector<1x128xf32>
    %18 = vector.shape_cast %17 : vector<1x128xf32> to vector<128xf32>
    %19 = vector.shape_cast %18 : vector<128xf32> to vector<1x1x128xf32>
    %20 = vector.broadcast %19 : vector<1x1x128xf32> to vector<8x8x128xf32>
    %21 = arith.mulf %16, %20 : vector<8x8x128xf32>
    %22 = arith.addf %15, %21 : vector<8x8x128xf32>
    %23 = vector.extract_strided_slice %2 {offsets = [1, 0, 0], sizes = [8, 8, 128], strides = [1, 1, 1]} : vector<10x10x128xf32> to vector<8x8x128xf32>
    %c3 = arith.constant 3 : index
    %c0_7 = arith.constant 0 : index
    %24 = vector.load %arg2[%c3, %c0_7] : memref<9x128xf32, #tpu.memory_space<vmem>>, vector<1x128xf32>
    %25 = vector.shape_cast %24 : vector<1x128xf32> to vector<128xf32>
    %26 = vector.shape_cast %25 : vector<128xf32> to vector<1x1x128xf32>
    %27 = vector.broadcast %26 : vector<1x1x128xf32> to vector<8x8x128xf32>
    %28 = arith.mulf %23, %27 : vector<8x8x128xf32>
    %29 = arith.addf %22, %28 : vector<8x8x128xf32>
    %30 = vector.extract_strided_slice %2 {offsets = [1, 1, 0], sizes = [8, 8, 128], strides = [1, 1, 1]} : vector<10x10x128xf32> to vector<8x8x128xf32>
    %c4 = arith.constant 4 : index
    %c0_8 = arith.constant 0 : index
    %31 = vector.load %arg2[%c4, %c0_8] : memref<9x128xf32, #tpu.memory_space<vmem>>, vector<1x128xf32>
    %32 = vector.shape_cast %31 : vector<1x128xf32> to vector<128xf32>
    %33 = vector.shape_cast %32 : vector<128xf32> to vector<1x1x128xf32>
    %34 = vector.broadcast %33 : vector<1x1x128xf32> to vector<8x8x128xf32>
    %35 = arith.mulf %30, %34 : vector<8x8x128xf32>
    %36 = arith.addf %29, %35 : vector<8x8x128xf32>
    %37 = vector.extract_strided_slice %2 {offsets = [1, 2, 0], sizes = [8, 8, 128], strides = [1, 1, 1]} : vector<10x10x128xf32> to vector<8x8x128xf32>
    %c5 = arith.constant 5 : index
    %c0_9 = arith.constant 0 : index
    %38 = vector.load %arg2[%c5, %c0_9] : memref<9x128xf32, #tpu.memory_space<vmem>>, vector<1x128xf32>
    %39 = vector.shape_cast %38 : vector<1x128xf32> to vector<128xf32>
    %40 = vector.shape_cast %39 : vector<128xf32> to vector<1x1x128xf32>
    %41 = vector.broadcast %40 : vector<1x1x128xf32> to vector<8x8x128xf32>
    %42 = arith.mulf %37, %41 : vector<8x8x128xf32>
    %43 = arith.addf %36, %42 : vector<8x8x128xf32>
    %44 = vector.extract_strided_slice %2 {offsets = [2, 0, 0], sizes = [8, 8, 128], strides = [1, 1, 1]} : vector<10x10x128xf32> to vector<8x8x128xf32>
    %c6 = arith.constant 6 : index
    %c0_10 = arith.constant 0 : index
    %45 = vector.load %arg2[%c6, %c0_10] : memref<9x128xf32, #tpu.memory_space<vmem>>, vector<1x128xf32>
    %46 = vector.shape_cast %45 : vector<1x128xf32> to vector<128xf32>
    %47 = vector.shape_cast %46 : vector<128xf32> to vector<1x1x128xf32>
    %48 = vector.broadcast %47 : vector<1x1x128xf32> to vector<8x8x128xf32>
    %49 = arith.mulf %44, %48 : vector<8x8x128xf32>
    %50 = arith.addf %43, %49 : vector<8x8x128xf32>
    %51 = vector.extract_strided_slice %2 {offsets = [2, 1, 0], sizes = [8, 8, 128], strides = [1, 1, 1]} : vector<10x10x128xf32> to vector<8x8x128xf32>
    %c7 = arith.constant 7 : index
    %c0_11 = arith.constant 0 : index
    %52 = vector.load %arg2[%c7, %c0_11] : memref<9x128xf32, #tpu.memory_space<vmem>>, vector<1x128xf32>
    %53 = vector.shape_cast %52 : vector<1x128xf32> to vector<128xf32>
    %54 = vector.shape_cast %53 : vector<128xf32> to vector<1x1x128xf32>
    %55 = vector.broadcast %54 : vector<1x1x128xf32> to vector<8x8x128xf32>
    %56 = arith.mulf %51, %55 : vector<8x8x128xf32>
    %57 = arith.addf %50, %56 : vector<8x8x128xf32>
    %58 = vector.extract_strided_slice %2 {offsets = [2, 2, 0], sizes = [8, 8, 128], strides = [1, 1, 1]} : vector<10x10x128xf32> to vector<8x8x128xf32>
    %c8 = arith.constant 8 : index
    %c0_12 = arith.constant 0 : index
    %59 = vector.load %arg2[%c8, %c0_12] : memref<9x128xf32, #tpu.memory_space<vmem>>, vector<1x128xf32>
    %60 = vector.shape_cast %59 : vector<1x128xf32> to vector<128xf32>
    %61 = vector.shape_cast %60 : vector<128xf32> to vector<1x1x128xf32>
    %62 = vector.broadcast %61 : vector<1x1x128xf32> to vector<8x8x128xf32>
    %63 = arith.mulf %58, %62 : vector<8x8x128xf32>
    %64 = arith.addf %57, %63 : vector<8x8x128xf32>
    %c0_13 = arith.constant 0 : index
    %c0_14 = arith.constant 0 : index
    %65 = vector.load %arg3[%c0_13, %c0_14] : memref<1x128xf32, #tpu.memory_space<vmem>>, vector<1x128xf32>
    %66 = vector.shape_cast %65 : vector<1x128xf32> to vector<128xf32>
    %67 = vector.shape_cast %66 : vector<128xf32> to vector<1x1x128xf32>
    %68 = vector.broadcast %67 : vector<1x1x128xf32> to vector<8x8x128xf32>
    %69 = arith.addf %64, %68 : vector<8x8x128xf32>
    %cst = arith.constant 5.000000e-01 : f32
    %70 = vector.broadcast %cst : f32 to vector<8x8x128xf32>
    %71 = arith.mulf %70, %69 : vector<8x8x128xf32>
    %cst_15 = arith.constant 4.471500e-02 : f32
    %72 = vector.broadcast %cst_15 : f32 to vector<8x8x128xf32>
    %73 = arith.mulf %72, %69 : vector<8x8x128xf32>
    %74 = arith.mulf %73, %69 : vector<8x8x128xf32>
    %75 = arith.mulf %74, %69 : vector<8x8x128xf32>
    %76 = arith.addf %69, %75 : vector<8x8x128xf32>
    %cst_16 = arith.constant 0.797884583 : f32
    %77 = vector.broadcast %cst_16 : f32 to vector<8x8x128xf32>
    %78 = arith.mulf %77, %76 : vector<8x8x128xf32>
    %79 = math.tanh %78 : vector<8x8x128xf32>
    %cst_17 = arith.constant 1.000000e+00 : f32
    %80 = vector.broadcast %cst_17 : f32 to vector<8x8x128xf32>
    %81 = arith.addf %80, %79 : vector<8x8x128xf32>
    %82 = arith.mulf %71, %81 : vector<8x8x128xf32>
    %83 = vector.shape_cast %82 : vector<8x8x128xf32> to vector<64x128xf32>
    %84 = arith.truncf %83 : vector<64x128xf32> to vector<64x128xbf16>
    %c0_18 = arith.constant 0 : index
    %c0_19 = arith.constant 0 : index
    %85 = vector.load %arg4[%c0_18, %c0_19] : memref<128x32xbf16, #tpu.memory_space<vmem>>, vector<128x32xbf16>
    %cst_20 = arith.constant dense<0.000000e+00> : vector<64x32xf32>
    %86 = tpu.matmul %84, %85, %cst_20 {dimension_numbers = #tpu.dot_dimension_numbers<[1], [0], [0], [1], [0, 0, 1, 1], [], []>} : vector<64x128xbf16>, vector<128x32xbf16>, vector<64x32xf32> -> vector<64x32xf32>
    %c0_21 = arith.constant 0 : index
    %c0_22 = arith.constant 0 : index
    %87 = vector.load %arg5[%c0_21, %c0_22] : memref<1x32xf32, #tpu.memory_space<vmem>>, vector<1x32xf32>
    %88 = vector.broadcast %87 : vector<1x32xf32> to vector<64x32xf32>
    %89 = arith.addf %86, %88 : vector<64x32xf32>
    %c0_23 = arith.constant 0 : index
    %c0_24 = arith.constant 0 : index
    %c0_25 = arith.constant 0 : index
    %90 = vector.load %arg6[%c0_23, %c0_24, %c0_25] : memref<1x64x32xf32, #tpu.memory_space<vmem>>, vector<1x64x32xf32>
    %91 = vector.shape_cast %90 : vector<1x64x32xf32> to vector<64x32xf32>
    %92 = arith.addf %91, %89 : vector<64x32xf32>
    %c0_26 = arith.constant 0 : index
    %c0_27 = arith.constant 0 : index
    %c0_28 = arith.constant 0 : index
    %93 = vector.load %arg7[%c0_26, %c0_27, %c0_28] : memref<1x64x32xf32, #tpu.memory_space<vmem>>, vector<1x64x32xf32>
    %94 = vector.shape_cast %93 : vector<1x64x32xf32> to vector<64x32xf32>
    %95 = vector.shape_cast %92 : vector<64x32xf32> to vector<1x64x32xf32>
    tpu.vector_store %arg7[%c0_26, %c0_27, %c0_28], %95 {strides = array<i32>} : memref<1x64x32xf32, #tpu.memory_space<vmem>>, vector<1x64x32xf32>,
    return
  }
  func.func @transform_0(%arg0: i32) -> (i32, i32, i32, i32) {
    %c0_i32 = arith.constant 0 : i32
    %c0_i32_0 = arith.constant 0 : i32
    %c0_i32_1 = arith.constant 0 : i32
    %c0_i32_2 = arith.constant 0 : i32
    return %arg0, %c0_i32, %c0_i32_0, %c0_i32_1 : i32, i32, i32, i32
  }
  func.func @transform_1(%arg0: i32) -> (i32, i32) {
    %c0_i32 = arith.constant 0 : i32
    %c0_i32_0 = arith.constant 0 : i32
    %c0_i32_1 = arith.constant 0 : i32
    return %c0_i32, %c0_i32_0 : i32, i32
  }
  func.func @transform_2(%arg0: i32) -> (i32, i32) {
    %c0_i32 = arith.constant 0 : i32
    %c0_i32_0 = arith.constant 0 : i32
    %c0_i32_1 = arith.constant 0 : i32
    return %c0_i32, %c0_i32_0 : i32, i32
  }
  func.func @transform_3(%arg0: i32) -> (i32, i32) {
    %c0_i32 = arith.constant 0 : i32
    %c0_i32_0 = arith.constant 0 : i32
    %c0_i32_1 = arith.constant 0 : i32
    return %c0_i32, %c0_i32_0 : i32, i32
  }
  func.func @transform_4(%arg0: i32) -> (i32, i32) {
    %c0_i32 = arith.constant 0 : i32
    %c0_i32_0 = arith.constant 0 : i32
    %c0_i32_1 = arith.constant 0 : i32
    return %c0_i32, %c0_i32_0 : i32, i32
  }
  func.func @transform_5(%arg0: i32) -> (i32, i32, i32) {
    %c0_i32 = arith.constant 0 : i32
    %c0_i32_0 = arith.constant 0 : i32
    %c0_i32_1 = arith.constant 0 : i32
    return %arg0, %c0_i32, %c0_i32_0 : i32, i32, i32
  }
  func.func @transform_6(%arg0: i32) -> (i32, i32, i32) {
    %c0_i32 = arith.constant 0 : i32
    %c0_i32_0 = arith.constant 0 : i32
    %c0_i32_1 = arith.constant 0 : i32
    return %arg0, %c0_i32, %c0_i32_0 : i32, i32, i32
  }
}

</mosaic_0001>

<bundles_post_ra>
// kernel: block_feed_forward.3
= control target key start
LH: loop header
LB: loop body
LE: loop exit
PB: predicated region body
PF: predicated region fallthrough
CT: control target
= control target key end

     0   :  { %s1312_s21 = smov 0   ;;  %s1806_s0 = inlined_call_operand.vmem [shape: bf16[2,10,10,128], index: 0, kind: input, shape index: {}]   ;;  %s1807_s1 = inlined_call_operand.vmem [shape: f32[9,128], index: 1, kind: input, shape index: {}]   ;;  %s1808_s2 = inlined_call_operand.vmem [shape: f32[1,128], index: 2, kind: input, shape index: {}]   ;;  %s1809_s3 = inlined_call_operand.vmem [shape: bf16[128,32], index: 3, kind: input, shape index: {}]   ;;  %s1810_s4 = inlined_call_operand.vmem [shape: f32[1,32], index: 4, kind: input, shape index: {}]   ;;  %s1811_s5 = inlined_call_operand.vmem [shape: f32[2,64,32], index: 5, kind: input, shape index: {}]   ;;  %s1812_s6 = inlined_call_operand.vmem [shape: f32[2,64,32], index: 6, kind: output, shape index: {}]  }
   0x1 LB: > { %s1151_s22 = sadd.s32 4294967295, %s1275_s21   ;;  %p1155_p0 = scmp.ge.s32.totalorder %s1275_s21, 1  ;;  %s1275_s21 = sphi %s1312_s21, %s16_s21  }
   0x2   : > { %p222_p1 = scmp.lt.s32.totalorder %s1275_s21, 3 }
   0x4   : > { %p223_p2 = pnand %p1155_p0, %p222_p1 }
   0x5   : > { %v1245_v0 = vld [vmem:[%s1809_s3] sm:$0xff] (!%p223_p2)   ;;  %p257_p3 = scmp.lt.s32.totalorder (!%p223_p2), %s1151_s22, 1  ;;  %v1246_v1 = vld [vmem:[%s1809_s3 + $0x8] sm:$0xff] (!%p223_p2)   ;;  %v1247_v2 = vld [vmem:[%s1809_s3 + $0x10] sm:$0xff] (!%p223_p2)   ;;  %vm363_vm0 = vcmask (!%p223_p2), 1046528   ;;  %vm441_vm1 = vcmask (!%p223_p2), 1045504  }
   0x6   : > { %226 = sbr.rel (%p223_p2) target bundleno = 372 (0x174), region = 44  ;;  %1196 = vmatprep.subr.bf16.mxu0 (!%p223_p2), %v1245_v0  ;;  %1220 = vmatprep.subr.bf16.mxu1 (!%p223_p2), %v1245_v0  ;;  %v1248_v3 = vld [vmem:[%s1809_s3 + $0x18] sm:$0xff] (!%p223_p2)   ;;  %v1355_v16 = vld [vmem:[%s1807_s1] ss:$0 sm:$0xff] (!%p223_p2)  ;;  %v1360_v17 = vld [vmem:[%s1807_s1 + $0x1] ss:$0 sm:$0xff] (!%p223_p2) }
   0x7   : > { %1197 = vmatpush3.bf16.msra.mxu0 (!%p223_p2), %v1245_v0  ;;  %1228 = vmatpush3.bf16.msra.mxu1 (!%p223_p2), %v1245_v0  ;;  %v1365_v18 = vld [vmem:[%s1807_s1 + $0x2] ss:$0 sm:$0xff] (!%p223_p2)  ;;  %v1384_v28 = vld [vmem:[%s1807_s1 + $0x3] ss:$0 sm:$0xff] (!%p223_p2)  ;;  %v1394_v37 = vld [vmem:[%s1807_s1 + $0x4] ss:$0 sm:$0xff] (!%p223_p2) }
   0x8   : > { %1198 = vmatprep.subr.bf16.mxu0 (!%p223_p2), %v1246_v1  ;;  %1221 = vmatprep.subr.bf16.mxu1 (!%p223_p2), %v1246_v1  ;;  %v1249_v23 = vld [vmem:[%s1809_s3 + $0x20] sm:$0xff] (!%p223_p2)   ;;  %v1250_v42 = vld [vmem:[%s1809_s3 + $0x28] sm:$0xff] (!%p223_p2)   ;;  %v1251_v60 = vld [vmem:[%s1809_s3 + $0x30] sm:$0xff] (!%p223_p2)   ;;  %vm1075_vm2 = vcmask (!%p223_p2), 261120  }
   0x9   : > { %v1407_v47 = vld [vmem:[%s1807_s1 + $0x5] ss:$0 sm:$0xff] (!%p223_p2) }
   0xb   : > { %1199 = vmatpush3.bf16.msra.mxu0 (!%p223_p2), %v1246_v1  ;;  %1229 = vmatpush3.bf16.msra.mxu1 (!%p223_p2), %v1246_v1 }
   0xc   : > { %1200 = vmatprep.subr.bf16.mxu0 (!%p223_p2), %v1247_v2  ;;  %1222 = vmatprep.subr.bf16.mxu1 (!%p223_p2), %v1247_v2 }
   0xd   : > { %s1814_s22 = smov (!%p257_p3, %s1151_s22), 1 }
   0xe   : > { %s1236_s29 = smul.u32 80, %s1814_s22 }
   0xf   : > { %1201 = vmatpush3.bf16.msra.mxu0 %v1247_v2  ;;  %1230 = vmatpush3.bf16.msra.mxu1 %v1247_v2 }
  0x10   : > { %s1335_s8 = scalar_lea.vmem %s1806_s0, %s1236_s29  ;;  %1202 = vmatprep.subr.bf16.mxu0 %v1248_v3  ;;  %1223 = vmatprep.subr.bf16.mxu1 %v1248_v3 }
  0x11   : > { %v273_v4 = vld [vmem:[%s1335_s8] ss:$8 sps:$4 sm:$0xff]   ;;  %v274_v5 = vld [vmem:[%s1335_s8 + $0x4] sm:$0x1]  ;;  %v276_v6 = vld [vmem:[%s1335_s8 + $0xc] sm:$0x1] }
  0x12   : > { %v277_v7 = vld [vmem:[%s1335_s8 + $0x10] ss:$8 sps:$4 sm:$0xff]   ;;  %v278_v8 = vld [vmem:[%s1335_s8 + $0x14] sm:$0x1]  ;;  %v280_v9 = vld [vmem:[%s1335_s8 + $0x1c] sm:$0x1]  ;;  %v293_v10 = vunpack.c.l.bf16 %v273_v4  ;;  %v294_v11 = vunpack.c.l.bf16 %v274_v5  ;;  %v295_v12 = vunpack.c.h.bf16 %v273_v4  ;;  %v1346_v13 = vunpack.c.l.bf16 %v276_v6 }
  0x13   : > { %v1348_v14 = vunpack.c.l.bf16 %v277_v7  ;;  %v1350_v15 = vunpack.c.l.bf16 %v278_v8  ;;  %v1367_v19 = vunpack.c.h.bf16 %v277_v7  ;;  %v1375_v24 = vunpack.c.l.bf16 %v280_v9  ;;  %1203 = vmatpush3.bf16.msra.mxu0 %v1248_v3  ;;  %1231 = vmatpush3.bf16.msra.mxu1 %v1248_v3  ;;  %v1431_v5 = vld [vmem:[%s1807_s1 + $0x6] ss:$0 sm:$0xff]  ;;  %v281_v6 = vld [vmem:[%s1335_s8 + $0x20] ss:$8 sps:$4 sm:$0xff]  }
  0x14   : > { %v318_v20 = vmul.f32 %v1355_v16, %v293_v10  ;;  %v319_v21 = vmul.f32 %v1355_v16, %v295_v12  ;;  %v331_v22 = vmul.f32 %v1360_v17, %v293_v10  ;;  %v332_v25 = vmul.f32 %v1360_v17, %v294_v11  ;;  %1204 = vmatprep.subr.bf16.mxu0 %v1249_v23 }
  0x15   : > { %v333_v26 = vmul.f32 %v1360_v17, %v295_v12  ;;  %v334_v27 = vmul.f32 %v1360_v17, %v1346_v13  ;;  %v409_v30 = vmul.f32 %v1365_v18, %v293_v10  ;;  %v410_v31 = vmul.f32 %v1365_v18, %v294_v11  ;;  %1224 = vmatprep.subr.bf16.mxu1 %v1249_v23  ;;  %v1439_v11 = vld [vmem:[%s1807_s1 + $0x7] ss:$0 sm:$0xff] }
  0x16   : > { %v364_v29 = vrot.slane %v331_v22, 1  ;;  %v411_v32 = vmul.f32 %v1365_v18, %v295_v12  ;;  %v365_v33 = vrot.slane %v332_v25, 1  ;;  %v412_v36 = vmul.f32 %v1365_v18, %v1346_v13  ;;  %v1444_v22 = vld [vmem:[%s1807_s1 + $0x8] ss:$0 sm:$0xff] }
  0x17   : > { %v367_v34 = vrot.slane %v333_v26, 1  ;;  %v368_v35 = vrot.slane %v334_v27, 1  ;;  %v442_v38 = vrot.slane %v409_v30, 2  ;;  %v443_v39 = vrot.slane %v410_v31, 2  ;;  %1205 = vmatpush3.bf16.msra.mxu0 %v1249_v23  ;;  %1232 = vmatpush3.bf16.msra.mxu1 %v1249_v23  ;;  %v1252_v23 = vld [vmem:[%s1809_s3 + $0x38] sm:$0xff]  }
  0x18   : > { %v445_v40 = vrot.slane %v411_v32, 2  ;;  %v487_v41 = vmul.f32 %v1384_v28, %v295_v12  ;;  %v366_v43 = vsel %vm363_vm0, %v364_v29, %v365_v33  ;;  %v446_v45 = vrot.slane %v412_v36, 2  ;;  %1206 = vmatprep.subr.bf16.mxu0 %v1250_v42  ;;  %1225 = vmatprep.subr.bf16.mxu1 %v1250_v42 }
  0x19   : > { %v369_v44 = vsel %vm363_vm0, %v367_v34, %v368_v35  ;;  %v488_v46 = vmul.f32 %v1384_v28, %v1348_v14  ;;  %v396_v48 = vadd.f32 %v366_v43, %v318_v20  ;;  %v444_v50 = vsel %vm441_vm1, %v442_v38, %v443_v39  ;;  %v282_v43 = vld [vmem:[%s1335_s8 + $0x24] sm:$0x1] }
  0x1a   : > { %v397_v49 = vadd.f32 %v369_v44, %v319_v21  ;;  %v508_v51 = vmul.f32 %v1394_v37, %v295_v12  ;;  %v447_v52 = vsel %vm441_vm1, %v445_v40, %v446_v45  ;;  %v509_v53 = vmul.f32 %v1394_v37, %v1346_v13 }
  0x1b   : > { %v510_v54 = vmul.f32 %v1394_v37, %v1348_v14  ;;  %v511_v55 = vmul.f32 %v1394_v37, %v1350_v15  ;;  %v474_v56 = vadd.f32 %v444_v50, %v396_v48  ;;  %v585_v59 = vmul.f32 %v1407_v47, %v295_v12  ;;  %1207 = vmatpush3.bf16.msra.mxu0 %v1250_v42 }
  0x1c   : > { %v475_v57 = vadd.f32 %v447_v52, %v397_v49  ;;  %v540_v58 = vrot.slane %v508_v51, 1  ;;  %v541_v61 = vrot.slane %v509_v53, 1  ;;  %v586_v0 = vmul.f32 %v1407_v47, %v1346_v13  ;;  %1233 = vmatpush3.bf16.msra.mxu1 %v1250_v42  ;;  %1208 = vmatprep.subr.bf16.mxu0 %v1251_v60  ;;  %v284_v49 = vld [vmem:[%s1335_s8 + $0x2c] sm:$0x1] }
  0x1d   : > { %v543_v62 = vrot.slane %v510_v54, 1  ;;  %v544_v63 = vrot.slane %v511_v55, 1  ;;  %v495_v1 = vadd.f32 %v487_v41, %v474_v56  ;;  %v587_v3 = vmul.f32 %v1407_v47, %v1348_v14  ;;  %1226 = vmatprep.subr.bf16.mxu1 %v1251_v60  ;;  %v285_v54 = vld [vmem:[%s1335_s8 + $0x30] ss:$8 sps:$4 sm:$0xff]   ;;  %v286_v55 = vld [vmem:[%s1335_s8 + $0x34] sm:$0x1] }
  0x1e   : > { %v496_v2 = vadd.f32 %v488_v46, %v475_v57  ;;  %v588_v4 = vmul.f32 %v1407_v47, %v1350_v15  ;;  %v542_v7 = vsel %vm363_vm0, %v540_v58, %v541_v61  ;;  %v617_v9 = vrot.slane %v585_v59, 2  ;;  %v288_v59 = vld [vmem:[%s1335_s8 + $0x3c] sm:$0x1] }
  0x1f   : > { %v545_v8 = vsel %vm363_vm0, %v543_v62, %v544_v63  ;;  %v618_v10 = vrot.slane %v586_v0, 2  ;;  %v572_v12 = vadd.f32 %v542_v7, %v495_v1  ;;  %v620_v20 = vrot.slane %v587_v3, 2  ;;  %1209 = vmatpush3.bf16.msra.mxu0 %v1251_v60  ;;  %v1486_v0 = vld [vmem:[%s1808_s2] ss:$0 sm:$0xff] }
  0x20   : > { %v573_v13 = vadd.f32 %v545_v8, %v496_v2  ;;  %v621_v21 = vrot.slane %v588_v4, 2  ;;  %v662_v26 = vmul.f32 %v1431_v5, %v1348_v14  ;;  %v663_v27 = vmul.f32 %v1431_v5, %v1367_v19  ;;  %1234 = vmatpush3.bf16.msra.mxu1 %v1251_v60  ;;  %1210 = vmatprep.subr.bf16.mxu0 %v1252_v23 }
  0x21   : > { %v619_v25 = vsel %vm441_vm1, %v617_v9, %v618_v10  ;;  %v1454_v29 = vunpack.c.l.bf16 %v281_v6  ;;  %v683_v32 = vmul.f32 %v1439_v11, %v1348_v14  ;;  %v684_v33 = vmul.f32 %v1439_v11, %v1350_v15  ;;  %1227 = vmatprep.subr.bf16.mxu1 %v1252_v23 }
  0x22   : > { %v622_v30 = vsel %vm441_vm1, %v620_v20, %v621_v21  ;;  %v649_v31 = vadd.f32 %v619_v25, %v572_v12  ;;  %v685_v35 = vmul.f32 %v1439_v11, %v1367_v19  ;;  %v686_v36 = vmul.f32 %v1439_v11, %v1375_v24 }
  0x23   : > { %v650_v34 = vadd.f32 %v622_v30, %v573_v13  ;;  %v760_v38 = vmul.f32 %v1444_v22, %v1348_v14  ;;  %v715_v40 = vrot.slane %v683_v32, 1  ;;  %v716_v41 = vrot.slane %v684_v33, 1  ;;  %1211 = vmatpush3.bf16.msra.mxu0 %v1252_v23 }
  0x24   : > { %v670_v39 = vadd.f32 %v662_v26, %v649_v31  ;;  %v761_v42 = vmul.f32 %v1444_v22, %v1350_v15  ;;  %v718_v45 = vrot.slane %v685_v35, 1  ;;  %v719_v46 = vrot.slane %v686_v36, 1  ;;  %1235 = vmatpush3.bf16.msra.mxu1 %v1252_v23 }
  0x25   : > { %v671_v44 = vadd.f32 %v663_v27, %v650_v34  ;;  %v762_v48 = vmul.f32 %v1444_v22, %v1367_v19  ;;  %v717_v50 = vsel %vm363_vm0, %v715_v40, %v716_v41  ;;  %v763_v51 = vmul.f32 %v1444_v22, %v1375_v24 }
  0x26   : > { %v792_v52 = vrot.slane %v760_v38, 2  ;;  %v793_v53 = vrot.slane %v761_v42, 2  ;;  %v720_v56 = vsel %vm363_vm0, %v718_v45, %v719_v46  ;;  %v747_v57 = vadd.f32 %v717_v50, %v670_v39 }
  0x27   : > { %v795_v58 = vrot.slane %v762_v48, 2  ;;  %v1480_v60 = vunpack.c.l.bf16 %v282_v43  ;;  %v748_v61 = vadd.f32 %v720_v56, %v671_v44  ;;  %v796_v63 = vrot.slane %v763_v51, 2 }
  0x28   : > { %v794_v62 = vsel %vm441_vm1, %v792_v52, %v793_v53  ;;  %v1488_v1 = vunpack.c.h.bf16 %v281_v6  ;;  %v1490_v3 = vunpack.c.l.bf16 %v284_v49  ;;  %v1492_v4 = vunpack.c.l.bf16 %v285_v54 }
  0x29   : > { %v824_v2 = vadd.f32 %v794_v62, %v747_v57  ;;  %v1494_v7 = vunpack.c.l.bf16 %v286_v55  ;;  %v797_v8 = vsel %vm441_vm1, %v795_v58, %v796_v63  ;;  %v1497_v9 = vunpack.c.h.bf16 %v285_v54 }
  0x2a   : > { %v1499_v10 = vunpack.c.l.bf16 %v288_v59  ;;  %v322_v12 = vmul.f32 %v1355_v16, %v1454_v29  ;;  %v825_v13 = vadd.f32 %v797_v8, %v748_v61  ;;  %v323_v20 = vmul.f32 %v1355_v16, %v1488_v1 }
  0x2b   : > { %v839_v6 = vadd.f32 %v1486_v0, %v824_v2  ;;  %v339_v21 = vmul.f32 %v1360_v17, %v1454_v29  ;;  %v340_v23 = vmul.f32 %v1360_v17, %v1480_v60  ;;  %v341_v25 = vmul.f32 %v1360_v17, %v1488_v1 }
  0x2c   : > { %v342_v26 = vmul.f32 %v1360_v17, %v1490_v3  ;;  %v417_v27 = vmul.f32 %v1365_v18, %v1454_v29  ;;  %v840_v30 = vadd.f32 %v1486_v0, %v825_v13  ;;  %v418_v38 = vmul.f32 %v1365_v18, %v1480_v60 }
  0x2d   : > { %v1517_v31 = vmul.f32 0.5, %v839_v6  ;;  %v855_v32 = vmul.f32 0.044715, %v839_v6  ;;  %v376_v33 = vrot.slane %v339_v21, 1  ;;  %v377_v34 = vrot.slane %v340_v23, 1 }
  0x2e   : > { %v379_v35 = vrot.slane %v341_v25, 1  ;;  %v380_v36 = vrot.slane %v342_v26, 1  ;;  %v1521_v39 = vmul.f32 0.5, %v840_v30  ;;  %v856_v40 = vmul.f32 0.044715, %v840_v30 }
  0x2f   : > { %v863_v41 = vmul.f32 %v855_v32, %v839_v6  ;;  %v419_v42 = vmul.f32 %v1365_v18, %v1488_v1  ;;  %v378_v43 = vsel %vm363_vm0, %v376_v33, %v377_v34  ;;  %v420_v45 = vmul.f32 %v1365_v18, %v1490_v3 }
  0x30   : > { %v381_v44 = vsel %vm363_vm0, %v379_v35, %v380_v36  ;;  %v454_v46 = vrot.slane %v417_v27, 2  ;;  %v864_v48 = vmul.f32 %v856_v40, %v840_v30  ;;  %v400_v50 = vadd.f32 %v378_v43, %v322_v12 }
  0x31   : > { %v871_v49 = vmul.f32 %v863_v41, %v839_v6  ;;  %v401_v51 = vadd.f32 %v381_v44, %v323_v20  ;;  %v455_v52 = vrot.slane %v418_v38, 2  ;;  %v457_v53 = vrot.slane %v419_v42, 2 }
  0x32   : > { %v458_v54 = vrot.slane %v420_v45, 2  ;;  %v491_v55 = vmul.f32 %v1384_v28, %v1488_v1  ;;  %v872_v56 = vmul.f32 %v864_v48, %v840_v30  ;;  %v492_v58 = vmul.f32 %v1384_v28, %v1492_v4 }
  0x33   : > { %v879_v57 = vadd.f32 %v871_v49, %v839_v6  ;;  %v516_v59 = vmul.f32 %v1394_v37, %v1488_v1  ;;  %v456_v61 = vsel %vm441_vm1, %v454_v46, %v455_v52  ;;  %v517_v63 = vmul.f32 %v1394_v37, %v1490_v3 }
  0x34   : > { %v459_v62 = vsel %vm441_vm1, %v457_v53, %v458_v54  ;;  %v518_v2 = vmul.f32 %v1394_v37, %v1492_v4  ;;  %v880_v8 = vadd.f32 %v872_v56, %v840_v30  ;;  %v478_v13 = vadd.f32 %v456_v61, %v400_v50 }
  0x35   : > { %v887_v12 = vmul.f32 0.7978846, %v879_v57  ;;  %v479_v6 = vadd.f32 %v459_v62, %v401_v51  ;;  %v519_v20 = vmul.f32 %v1394_v37, %v1494_v7  ;;  %v552_v21 = vrot.slane %v516_v59, 1 }
  0x36   : > { %v553_v23 = vrot.slane %v517_v63, 1  ;;  %v555_v25 = vrot.slane %v518_v2, 1  ;;  %v888_v26 = vmul.f32 0.7978846, %v880_v8  ;;  %v499_v27 = vadd.f32 %v491_v55, %v478_v13 }
  0x37   : > { %1253 = vtanh.f32 %v887_v12  ;;  %v500_v32 = vadd.f32 %v492_v58, %v479_v6  ;;  %v556_v34 = vrot.slane %v519_v20, 1  ;;  %v593_v35 = vmul.f32 %v1407_v47, %v1488_v1 }
  0x38   : > { %v554_v33 = vsel %vm363_vm0, %v552_v21, %v553_v23  ;;  %v594_v30 = vmul.f32 %v1407_v47, %v1490_v3  ;;  %1255 = vtanh.f32 %v888_v26  ;;  %v595_v38 = vmul.f32 %v1407_v47, %v1492_v4 }
  0x39   : > { %v576_v36 = vadd.f32 %v554_v33, %v499_v27  ;;  %v596_v40 = vmul.f32 %v1407_v47, %v1494_v7  ;;  %v557_v41 = vsel %vm363_vm0, %v555_v25, %v556_v34  ;;  %v629_v42 = vrot.slane %v593_v35, 2 }
  0x3a   : > { %v630_v43 = vrot.slane %v594_v30, 2  ;;  %v666_v44 = vmul.f32 %v1431_v5, %v1492_v4  ;;  %v577_v45 = vadd.f32 %v557_v41, %v500_v32  ;;  %v632_v46 = vrot.slane %v595_v38, 2 }
  0x3b   : > { %v633_v48 = vrot.slane %v596_v40, 2  ;;  %v667_v49 = vmul.f32 %v1431_v5, %v1497_v9  ;;  %v691_v51 = vmul.f32 %v1439_v11, %v1492_v4  ;;  %v692_v52 = vmul.f32 %v1439_v11, %v1494_v7 }
  0x3c   : > { %v631_v50 = vsel %vm441_vm1, %v629_v42, %v630_v43  ;;  %v693_v53 = vmul.f32 %v1439_v11, %v1497_v9  ;;  %v694_v56 = vmul.f32 %v1439_v11, %v1499_v10  ;;  %v768_v57 = vmul.f32 %v1444_v22, %v1492_v4 }
  0x3d   : > { %v634_v54 = vsel %vm441_vm1, %v632_v46, %v633_v48  ;;  %v653_v55 = vadd.f32 %v631_v50, %v576_v36  ;;  %v727_v59 = vrot.slane %v691_v51, 1  ;;  %v728_v61 = vrot.slane %v692_v52, 1 }
  0x3e   : > { %v654_v58 = vadd.f32 %v634_v54, %v577_v45  ;;  %v730_v62 = vrot.slane %v693_v53, 1  ;;  %v731_v2 = vrot.slane %v694_v56, 1  ;;  %v769_v8 = vmul.f32 %v1444_v22, %v1494_v7 }
  0x3f   : > { %v674_v63 = vadd.f32 %v666_v44, %v653_v55  ;;  %v770_v12 = vmul.f32 %v1444_v22, %v1497_v9  ;;  %v729_v6 = vsel %vm363_vm0, %v727_v59, %v728_v61  ;;  %v771_v20 = vmul.f32 %v1444_v22, %v1499_v10 }
  0x40   : > { %v675_v13 = vadd.f32 %v667_v49, %v654_v58  ;;  %v804_v21 = vrot.slane %v768_v57, 2  ;;  %v732_v25 = vsel %vm363_vm0, %v730_v62, %v731_v2  ;;  %v805_v27 = vrot.slane %v769_v8, 2 }
  0x41   : > { %v1254_v23 = vpop.eup %1253  ;;  %v751_v26 = vadd.f32 %v729_v6, %v674_v63  ;;  %v807_v32 = vrot.slane %v770_v12, 2  ;;  %v808_v35 = vrot.slane %v771_v20, 2  ;;  %v320_v30 = vmul.f32 %v1355_v16, %v1348_v14 }
  0x42   : > { %v903_v33 = vadd.f32 1.0, %v1254_v23  ;;  %v752_v34 = vadd.f32 %v732_v25, %v675_v13  ;;  %v1256_v36 = vpop.eup %1255  ;;  %v806_v38 = vsel %vm441_vm1, %v804_v21, %v805_v27  ;;  %v321_v40 = vmul.f32 %v1355_v16, %v1367_v19 }
  0x43   : > { %v335_v41 = vmul.f32 %v1360_v17, %v1348_v14  ;;  %v336_v42 = vmul.f32 %v1360_v17, %v1350_v15  ;;  %v904_v43 = vadd.f32 1.0, %v1256_v36  ;;  %v809_v45 = vsel %vm441_vm1, %v807_v32, %v808_v35 }
  0x44   : > { %v911_v44 = vmul.f32 %v903_v33, %v1517_v31  ;;  %v828_v46 = vadd.f32 %v806_v38, %v751_v26  ;;  %v829_v48 = vadd.f32 %v809_v45, %v752_v34  ;;  %v337_v49 = vmul.f32 %v1360_v17, %v1367_v19 }
  0x45   : > { %v338_v50 = vmul.f32 %v1360_v17, %v1375_v24  ;;  %v370_v51 = vrot.slane %v335_v41, 1  ;;  %v912_v52 = vmul.f32 %v904_v43, %v1521_v39  ;;  %v371_v54 = vrot.slane %v336_v42, 1 }
  0x46   : > { %v843_v53 = vadd.f32 %v1486_v0, %v828_v46  ;;  %v413_v55 = vmul.f32 %v1365_v18, %v1348_v14  ;;  %v1597_v31 = vadd.f32 %v1486_v0, %v829_v48  ;;  %v373_v56 = vrot.slane %v337_v49, 1 }
  0x47   : > { %v374_v57 = vrot.slane %v338_v50, 1  ;;  %v414_v58 = vmul.f32 %v1365_v18, %v1350_v15  ;;  %v919_v59 = vpack.c.bf16 %v912_v52, %v911_v44  ;;  %v372_v62 = vsel %vm363_vm0, %v370_v51, %v371_v54 }
  0x48   : > { %v859_v61 = vmul.f32 0.044715, %v843_v53  ;;  %v1602_v63 = vmul.f32 0.5, %v843_v53  ;;  %v860_v39 = vmul.f32 0.044715, %v1597_v31  ;;  %v398_v8 = vadd.f32 %v372_v62, %v320_v30 }
  0x49   : > { %v375_v2 = vsel %vm363_vm0, %v373_v56, %v374_v57  ;;  %1212 = vmatprep.mubr.bf16.mxu0 %v919_v59  ;;  %v415_v13 = vmul.f32 %v1365_v18, %v1367_v19  ;;  %v416_v15 = vmul.f32 %v1365_v18, %v1375_v24  ;;  %v448_v20 = vrot.slane %v413_v55, 2 }
  0x4a   : > { %v867_v14 = vmul.f32 %v859_v61, %v843_v53  ;;  %v399_v12 = vadd.f32 %v375_v2, %v321_v40  ;;  %v868_v6 = vmul.f32 %v860_v39, %v1597_v31  ;;  %v449_v21 = vrot.slane %v414_v58, 2 }
  0x4b   : > { %v489_v23 = vmul.f32 %v1384_v28, %v1367_v19  ;;  %v451_v26 = vrot.slane %v415_v13, 2  ;;  %v452_v27 = vrot.slane %v416_v15, 2  ;;  %v490_v32 = vmul.f32 %v1384_v28, %v1454_v29 }
  0x4c   : > { %v875_v25 = vmul.f32 %v867_v14, %v843_v53  ;;  %v876_v33 = vmul.f32 %v868_v6, %v1597_v31  ;;  %v450_v34 = vsel %vm441_vm1, %v448_v20, %v449_v21  ;;  %v512_v35 = vmul.f32 %v1394_v37, %v1367_v19 }
  0x4d   : > { %v513_v30 = vmul.f32 %v1394_v37, %v1375_v24  ;;  %v453_v38 = vsel %vm441_vm1, %v451_v26, %v452_v27  ;;  %v476_v40 = vadd.f32 %v450_v34, %v398_v8  ;;  %v514_v41 = vmul.f32 %v1394_v37, %v1454_v29 }
  0x4e   : > { %v883_v36 = vadd.f32 %v875_v25, %v843_v53  ;;  %v884_v42 = vadd.f32 %v876_v33, %v1597_v31  ;;  %v477_v43 = vadd.f32 %v453_v38, %v399_v12  ;;  %v515_v44 = vmul.f32 %v1394_v37, %v1480_v60 }
  0x4f   : > { %v546_v45 = vrot.slane %v512_v35, 1  ;;  %v497_v48 = vadd.f32 %v489_v23, %v476_v40  ;;  %v547_v49 = vrot.slane %v513_v30, 1  ;;  %v549_v50 = vrot.slane %v514_v41, 1  ;;  %v289_v40 = vld [vmem:[%s1335_s8 + $0x40] ss:$8 sps:$4 sm:$0xff]  }
  0x50   : > { %v891_v46 = vmul.f32 0.7978846, %v883_v36  ;;  %v892_v51 = vmul.f32 0.7978846, %v884_v42  ;;  %v498_v52 = vadd.f32 %v490_v32, %v477_v43  ;;  %v550_v53 = vrot.slane %v515_v44, 1 }
  0x51   : > { %v589_v54 = vmul.f32 %v1407_v47, %v1367_v19  ;;  %v548_v55 = vsel %vm363_vm0, %v546_v45, %v547_v49  ;;  %v590_v56 = vmul.f32 %v1407_v47, %v1375_v24  ;;  %v591_v57 = vmul.f32 %v1407_v47, %v1454_v29  ;;  %v290_v41 = vld [vmem:[%s1335_s8 + $0x44] sm:$0x1] }
  0x52   : > { %1257 = vtanh.f32 %v891_v46  ;;  %v551_v58 = vsel %vm363_vm0, %v549_v50, %v550_v53  ;;  %v574_v59 = vadd.f32 %v548_v55, %v497_v48  ;;  %v592_v61 = vmul.f32 %v1407_v47, %v1480_v60  ;;  %v1664_v50 = vld [vmem:[%s1335_s8 + $0x4c] sm:$0x1]  ;;  %s1182_s8 = sshll.u32 %s1814_s22, 6 }
  0x53   : > { %1259 = vtanh.f32 %v892_v51  ;;  %v575_v62 = vadd.f32 %v551_v58, %v498_v52  ;;  %v623_v39 = vrot.slane %v589_v54, 2  ;;  %v624_v2 = vrot.slane %v590_v56, 2  ;;  %s1769_s20 = scalar_lea.vmem %s1811_s5, %s1182_s8  ;;  %s1779_s26 = scalar_lea.vmem %s1812_s6, %s1182_s8 }
  0x54   : > { %v626_v19 = vrot.slane %v591_v57, 2  ;;  %v627_v8 = vrot.slane %v592_v61, 2  ;;  %v664_v14 = vmul.f32 %v1431_v5, %v1454_v29  ;;  %v665_v24 = vmul.f32 %v1431_v5, %v1488_v1 }
  0x55   : > { %v687_v12 = vmul.f32 %v1439_v11, %v1454_v29  ;;  %v625_v13 = vsel %vm441_vm1, %v623_v39, %v624_v2  ;;  %v688_v15 = vmul.f32 %v1439_v11, %v1480_v60  ;;  %v689_v6 = vmul.f32 %v1439_v11, %v1488_v1 }
  0x56   : > { %v690_v20 = vmul.f32 %v1439_v11, %v1490_v3  ;;  %v628_v21 = vsel %vm441_vm1, %v626_v19, %v627_v8  ;;  %v651_v23 = vadd.f32 %v625_v13, %v574_v59  ;;  %v764_v26 = vmul.f32 %v1444_v22, %v1454_v29 }
  0x57   : > { %v721_v25 = vrot.slane %v687_v12, 1  ;;  %v652_v27 = vadd.f32 %v628_v21, %v575_v62  ;;  %v722_v32 = vrot.slane %v688_v15, 1  ;;  %v724_v33 = vrot.slane %v689_v6, 1 }
  0x58   : > { %v725_v34 = vrot.slane %v690_v20, 1  ;;  %v672_v35 = vadd.f32 %v664_v14, %v651_v23  ;;  %v765_v30 = vmul.f32 %v1444_v22, %v1480_v60  ;;  %v766_v36 = vmul.f32 %v1444_v22, %v1488_v1 }
  0x59   : > { %v767_v38 = vmul.f32 %v1444_v22, %v1490_v3  ;;  %v673_v42 = vadd.f32 %v665_v24, %v652_v27  ;;  %v723_v29 = vsel %vm363_vm0, %v721_v25, %v722_v32  ;;  %v798_v44 = vrot.slane %v764_v26, 2 }
  0x5a   : > { %v726_v43 = vsel %vm363_vm0, %v724_v33, %v725_v34  ;;  %v749_v45 = vadd.f32 %v723_v29, %v672_v35  ;;  %v799_v46 = vrot.slane %v765_v30, 2  ;;  %v801_v48 = vrot.slane %v766_v36, 2 }
  0x5b   : > { %v802_v49 = vrot.slane %v767_v38, 2  ;;  %v852_v1 = vmul.f32 0.5, %v1597_v31  ;;  %v750_v51 = vadd.f32 %v726_v43, %v673_v42  ;;  %v1667_v52 = vunpack.c.l.bf16 %v289_v40 }
  0x5c   : > { %v1258_v60 = vpop.eup %1257  ;;  %v1669_v3 = vunpack.c.l.bf16 %v290_v41  ;;  %v800_v55 = vsel %vm441_vm1, %v798_v44, %v799_v46  ;;  %v1673_v57 = vunpack.c.h.bf16 %v289_v40  ;;  %v312_v62 = vunpack.c.l.bf16 %v1664_v50 }
  0x5d   : > { %v1260_v53 = vpop.eup %1259  ;;  %v907_v54 = vadd.f32 1.0, %v1258_v60  ;;  %v803_v56 = vsel %vm441_vm1, %v801_v48, %v802_v49  ;;  %v826_v59 = vadd.f32 %v800_v55, %v749_v45  ;;  %v324_v39 = vmul.f32 %v1355_v16, %v1492_v4 }
  0x5e   : > { %v908_v58 = vadd.f32 1.0, %v1260_v53  ;;  %v827_v61 = vadd.f32 %v803_v56, %v750_v51  ;;  %v343_v2 = vmul.f32 %v1360_v17, %v1492_v4  ;;  %v344_v19 = vmul.f32 %v1360_v17, %v1494_v7 }
  0x5f   : > { %v915_v31 = vmul.f32 %v907_v54, %v1602_v63  ;;  %v841_v14 = vadd.f32 %v1486_v0, %v826_v59  ;;  %v345_v12 = vmul.f32 %v1360_v17, %v1497_v9  ;;  %v346_v63 = vmul.f32 %v1360_v17, %v1499_v10 }
  0x60   : > { %v916_v8 = vmul.f32 %v908_v58, %v852_v1  ;;  %v1685_v24 = vadd.f32 %v1486_v0, %v827_v61  ;;  %v382_v13 = vrot.slane %v343_v2, 1  ;;  %v383_v15 = vrot.slane %v344_v19, 1 }
  0x61   : > { %v421_v6 = vmul.f32 %v1365_v18, %v1492_v4  ;;  %v1693_v21 = vmul.f32 0.5, %v841_v14  ;;  %v857_v23 = vmul.f32 0.044715, %v841_v14  ;;  %v325_v25 = vmul.f32 %v1355_v16, %v1497_v9 }
  0x62   : > { %v921_v20 = vpack.c.bf16 %v916_v8, %v915_v31  ;;  %v858_v26 = vmul.f32 0.044715, %v1685_v24  ;;  %v384_v27 = vsel %vm363_vm0, %v382_v13, %v383_v15  ;;  %v385_v32 = vrot.slane %v345_v12, 1 }
  0x63   : > { %v386_v33 = vrot.slane %v346_v63, 1  ;;  %v865_v17 = vmul.f32 %v857_v23, %v841_v14  ;;  %v402_v34 = vadd.f32 %v384_v27, %v324_v39  ;;  %v422_v35 = vmul.f32 %v1365_v18, %v1494_v7 }
  0x64   : > { %1216 = vmatprep.mubr.bf16.mxu1 %v921_v20  ;;  %v423_v4 = vmul.f32 %v1365_v18, %v1497_v9  ;;  %v866_v30 = vmul.f32 %v858_v26, %v1685_v24  ;;  %v424_v16 = vmul.f32 %v1365_v18, %v1499_v10  ;;  %v460_v38 = vrot.slane %v421_v6, 2 }
  0x65   : > { %v387_v36 = vsel %vm363_vm0, %v385_v32, %v386_v33  ;;  %v873_v40 = vmul.f32 %v865_v17, %v841_v14  ;;  %v461_v42 = vrot.slane %v422_v35, 2  ;;  %v493_v7 = vmul.f32 %v1384_v28, %v1497_v9 }
  0x66   : > { %v403_v41 = vadd.f32 %v387_v36, %v325_v25  ;;  %v463_v29 = vrot.slane %v423_v4, 2  ;;  %v874_v43 = vmul.f32 %v866_v30, %v1685_v24  ;;  %v464_v44 = vrot.slane %v424_v16, 2 }
  0x67   : > { %v494_v45 = vmul.f32 %v1384_v28, %v1667_v52  ;;  %v881_v46 = vadd.f32 %v873_v40, %v841_v14  ;;  %v462_v48 = vsel %vm441_vm1, %v460_v38, %v461_v42  ;;  %v520_v18 = vmul.f32 %v1394_v37, %v1497_v9 }
  0x68   : > { %v521_v49 = vmul.f32 %v1394_v37, %v1499_v10  ;;  %v882_v60 = vadd.f32 %v874_v43, %v1685_v24  ;;  %v465_v1 = vsel %vm441_vm1, %v463_v29, %v464_v44  ;;  %v480_v51 = vadd.f32 %v462_v48, %v402_v34 }
  0x69   : > { %v522_v53 = vmul.f32 %v1394_v37, %v1667_v52  ;;  %v889_v54 = vmul.f32 0.7978846, %v881_v46  ;;  %v481_v55 = vadd.f32 %v465_v1, %v403_v41  ;;  %v523_v28 = vmul.f32 %v1394_v37, %v1669_v3 }
  0x6a   : > { %v558_v56 = vrot.slane %v520_v18, 1  ;;  %v890_v58 = vmul.f32 0.7978846, %v882_v60  ;;  %v501_v59 = vadd.f32 %v493_v7, %v480_v51  ;;  %v559_v61 = vrot.slane %v521_v49, 1 }
  0x6b   : > { %v561_v31 = vrot.slane %v522_v53, 1  ;;  %1261 = vtanh.f32 %v889_v54  ;;  %v502_v39 = vadd.f32 %v494_v45, %v481_v55  ;;  %v562_v2 = vrot.slane %v523_v28, 1 }
  0x6c   : > { %v597_v19 = vmul.f32 %v1407_v47, %v1497_v9  ;;  %1263 = vtanh.f32 %v890_v58  ;;  %v560_v8 = vsel %vm363_vm0, %v558_v56, %v559_v61  ;;  %v598_v14 = vmul.f32 %v1407_v47, %v1499_v10 }
  0x6d   : > { %v599_v37 = vmul.f32 %v1407_v47, %v1667_v52  ;;  %v563_v12 = vsel %vm363_vm0, %v561_v31, %v562_v2  ;;  %v578_v63 = vadd.f32 %v560_v8, %v501_v59  ;;  %v600_v13 = vmul.f32 %v1407_v47, %v1669_v3 }
  0x6e   : > { %v635_v15 = vrot.slane %v597_v19, 2  ;;  %v579_v6 = vadd.f32 %v563_v12, %v502_v39  ;;  %v636_v20 = vrot.slane %v598_v14, 2  ;;  %v668_v9 = vmul.f32 %v1431_v5, %v1667_v52 }
  0x6f   : > { %v638_v23 = vrot.slane %v599_v37, 2  ;;  %v639_v25 = vrot.slane %v600_v13, 2  ;;  %v669_v10 = vmul.f32 %v1431_v5, %v1673_v57  ;;  %v695_v26 = vmul.f32 %v1439_v11, %v1667_v52 }
  0x70   : > { %v696_v27 = vmul.f32 %v1439_v11, %v1669_v3  ;;  %v637_v32 = vsel %vm441_vm1, %v635_v15, %v636_v20  ;;  %v697_v47 = vmul.f32 %v1439_v11, %v1673_v57  ;;  %v698_v33 = vmul.f32 %v1439_v11, %v312_v62  ;;  %v1171_v20 = vld [vmem:[%s1810_s4] ss:$0 sm:$0xff] }
  0x71   : > { %v772_v17 = vmul.f32 %v1444_v22, %v1667_v52  ;;  %v640_v5 = vsel %vm441_vm1, %v638_v23, %v639_v25  ;;  %v655_v34 = vadd.f32 %v637_v32, %v578_v63  ;;  %v733_v35 = vrot.slane %v695_v26, 1  ;;  %v1059_v26 = vld [vmem:[%s1769_s20] sm:$0xff] }
  0x72   : > { %v734_v4 = vrot.slane %v696_v27, 1  ;;  %v656_v30 = vadd.f32 %v640_v5, %v579_v6  ;;  %v736_v36 = vrot.slane %v697_v47, 1  ;;  %v737_v16 = vrot.slane %v698_v33, 1  ;;  %v1062_v47 = vld [vmem:[%s1769_s20 + $0x18] sm:$0xff] }
  0x73   : > { %v773_v38 = vmul.f32 %v1444_v22, %v1669_v3  ;;  %v676_v40 = vadd.f32 %v668_v9, %v655_v34  ;;  %v774_v11 = vmul.f32 %v1444_v22, %v1673_v57  ;;  %v775_v52 = vmul.f32 %v1444_v22, %v312_v62  ;;  %v1061_v9 = vld [vmem:[%s1769_s20 + $0x10] sm:$0xff]  ;;  %v1060_v34 = vld [vmem:[%s1769_s20 + $0x8] sm:$0xff] }
  0x74   : > { %v735_v41 = vsel %vm363_vm0, %v733_v35, %v734_v4  ;;  %v677_v42 = vadd.f32 %v669_v10, %v656_v30  ;;  %v738_v29 = vsel %vm363_vm0, %v736_v36, %v737_v16  ;;  %v810_v43 = vrot.slane %v772_v17, 2 }
  0x75   : > { %v811_v44 = vrot.slane %v773_v38, 2  ;;  %v1262_v7 = vpop.eup %1261  ;;  %v850_v45 = vmul.f32 0.5, %v1685_v24  ;;  %v753_v46 = vadd.f32 %v735_v41, %v676_v40  ;;  %v813_v3 = vrot.slane %v774_v11, 2  ;;  %v1065_v38 = vld [vmem:[%s1769_s20 + $0x30] sm:$0xff]  ;;  %v1063_v11 = vld [vmem:[%s1769_s20 + $0x20] sm:$0xff] }
  0x76   : > { %v814_v48 = vrot.slane %v775_v52, 2  ;;  %v1264_v18 = vpop.eup %1263  ;;  %v905_v49 = vadd.f32 1.0, %v1262_v7  ;;  %v754_v60 = vadd.f32 %v738_v29, %v677_v42  ;;  %v1066_v29 = vld [vmem:[%s1769_s20 + $0x38] sm:$0xff] }
  0x77   : > { %v812_v57 = vsel %vm441_vm1, %v810_v43, %v811_v44  ;;  %v906_v1 = vadd.f32 1.0, %v1264_v18 }
  0x78   : > { %v815_v50 = vsel %vm441_vm1, %v813_v3, %v814_v48  ;;  %v830_v22 = vadd.f32 %v812_v57, %v753_v46  ;;  %v913_v62 = vmul.f32 %v905_v49, %v1693_v21 }
  0x79   : > { %v831_v51 = vadd.f32 %v815_v50, %v754_v60  ;;  %v914_v53 = vmul.f32 %v906_v1, %v850_v45  ;;  %v1064_v45 = vld [vmem:[%s1769_s20 + $0x28] sm:$0xff] }
  0x7a   : > { %v845_v54 = vadd.f32 %v1486_v0, %v830_v22 }
  0x7b   : > { %v846_v24 = vadd.f32 %v1486_v0, %v831_v51  ;;  %v920_v55 = vpack.c.bf16 %v914_v53, %v913_v62 }
  0x7c   : > { %v861_v28 = vmul.f32 0.044715, %v845_v54  ;;  %v853_v21 = vmul.f32 0.5, %v845_v54 }
  0x7d   : > { %v862_v56 = vmul.f32 0.044715, %v846_v24  ;;  %1213 = vmatmul.mubr.bf16.vlgmr.msra.gmra.mrb[0].mxu0 %v920_v55  ;;  %v854_v37 = vmul.f32 0.5, %v846_v24 }
  0x7e   : > { %v869_v58 = vmul.f32 %v861_v28, %v845_v54 }
  0x7f   : > { %v870_v59 = vmul.f32 %v862_v56, %v846_v24 }
  0x80   : > { %v877_v61 = vmul.f32 %v869_v58, %v845_v54 }
  0x81   : > { %v878_v31 = vmul.f32 %v870_v59, %v846_v24 }
  0x82   : > { %v885_v39 = vadd.f32 %v877_v61, %v845_v54 }
  0x83   : > { %v886_v2 = vadd.f32 %v878_v31, %v846_v24 }
  0x84   : > { %v893_v19 = vmul.f32 0.7978846, %v885_v39 }
  0x85   : > { %v894_v8 = vmul.f32 0.7978846, %v886_v2 }
  0x86   : > { %1265 = vtanh.f32 %v893_v19 }
  0x87   : > { %1267 = vtanh.f32 %v894_v8 }
  0x90   : > { %v1266_v14 = vpop.eup %1265 }
  0x91   : > { %v1268_v12 = vpop.eup %1267  ;;  %v909_v0 = vadd.f32 1.0, %v1266_v14 }
  0x92   : > { %v910_v63 = vadd.f32 1.0, %v1268_v12 }
  0x93   : > { %v917_v13 = vmul.f32 %v909_v0, %v853_v21 }
  0x94   : > { %v918_v15 = vmul.f32 %v910_v63, %v854_v37 }
  0x96   : > { %v922_v6 = vpack.c.bf16 %v918_v15, %v917_v13 }
  0x98   : > { %1217 = vmatmul.mubr.bf16.vlgmr.msra.gmra.mrb[0].mxu1 %v922_v6 }
 0x150   : > { %v1214_v23 = vpop.f32.mrb[0].mxu0 }
 0x151   : > { %v1037_v25 = vadd.f32 %v1214_v23, %v1171_v20  ;;  %v1028_v10 = vpop.f32.mrb[1].mxu0 }
 0x152   : > { %v1029_v27 = vadd.f32 %v1171_v20, %v1028_v10  ;;  %v1215_v32 = vpop.f32.mrb[2].mxu0 }
 0x153   : > { %v1069_v33 = vadd.f32 %v1061_v9, %v1037_v25  ;;  %v1040_v17 = vadd.f32 %v1215_v32, %v1171_v20  ;;  %v1031_v5 = vpop.f32.mrb[3].mxu0 }
 0x154   : > { %v1067_v35 = vadd.f32 %v1059_v26, %v1029_v27  ;;  %v1032_v4 = vadd.f32 %v1171_v20, %v1031_v5 }
 0x155   : > { %1078 = vst.msk [vmem:[%s1779_s26 + $0x10] sm:$0xff] %vm1075_vm2, %v1069_v33  ;;  %v1070_v30 = vadd.f32 %v1062_v47, %v1040_v17 }
 0x156   : > { %1076 = vst.msk [vmem:[%s1779_s26] sm:$0xff] %vm1075_vm2, %v1067_v35  ;;  %v1068_v36 = vadd.f32 %v1060_v34, %v1032_v4 }
 0x157   : > { %1079 = vst.msk [vmem:[%s1779_s26 + $0x18] sm:$0xff] %vm1075_vm2, %v1070_v30 }
 0x158   : > { %1077 = vst.msk [vmem:[%s1779_s26 + $0x8] sm:$0xff] %vm1075_vm2, %v1068_v36 }
 0x16b   : > { %v1218_v16 = vpop.f32.mrb[0].mxu1 }
 0x16c   : > { %v1053_v40 = vadd.f32 %v1218_v16, %v1171_v20  ;;  %v1044_v41 = vpop.f32.mrb[1].mxu1 }
 0x16d   : > { %v1045_v52 = vadd.f32 %v1171_v20, %v1044_v41  ;;  %v1219_v42 = vpop.f32.mrb[2].mxu1 }
 0x16e   : > { %v1073_v43 = vadd.f32 %v1065_v38, %v1053_v40  ;;  %v1056_v44 = vadd.f32 %v1219_v42, %v1171_v20  ;;  %v1047_v7 = vpop.f32.mrb[3].mxu1 }
 0x16f   : > { %v1071_v46 = vadd.f32 %v1063_v11, %v1045_v52  ;;  %v1048_v3 = vadd.f32 %v1171_v20, %v1047_v7 }
 0x170   : > { %1082 = vst.msk [vmem:[%s1779_s26 + $0x30] sm:$0xff] %vm1075_vm2, %v1073_v43  ;;  %v1074_v48 = vadd.f32 %v1066_v29, %v1056_v44 }
 0x171   : > { %1080 = vst.msk [vmem:[%s1779_s26 + $0x20] sm:$0xff] %vm1075_vm2, %v1071_v46  ;;  %v1072_v18 = vadd.f32 %v1064_v45, %v1048_v3 }
 0x172   : > { %1083 = vst.msk [vmem:[%s1779_s26 + $0x38] sm:$0xff] %vm1075_vm2, %v1074_v48 }
 0x173   : > { %1081 = vst.msk [vmem:[%s1779_s26 + $0x28] sm:$0xff] %vm1075_vm2, %v1072_v18 }
 0x174 PF: > { %s16_s21 = sadd.s32 1, %s1275_s21  }
 0x175   : > { %p13_p4 = scmp.ge.s32.totalorder %s16_s21, 4  }
 0x177   :  { %15 = sbr.rel (!%p13_p4) target bundleno = 1 (0x1), region = 77 }

// kernel: block_feed_forward.2
= control target key start
LH: loop header
LB: loop body
LE: loop exit
PB: predicated region body
PF: predicated region fallthrough
CT: control target
= control target key end

     0   :  { %s5563_s0 = inlined_call_operand.vmem [shape: f32[2,64,32], index: 0, kind: input, shape index: {}]   ;;  %s5564_s1 = inlined_call_operand.vmem [shape: f32[2,256,32], index: 1, kind: input, shape index: {}]   ;;  %s5565_s2 = inlined_call_operand.vmem [shape: f32[16,256], index: 2, kind: input, shape index: {}]   ;;  %s5566_s3 = inlined_call_operand.vmem [shape: f32[1,32], index: 3, kind: input, shape index: {}]   ;;  %s5567_s4 = inlined_call_operand.vmem [shape: f32[1,32], index: 4, kind: input, shape index: {}]   ;;  %s5568_s5 = inlined_call_operand.vmem [shape: f32[1,32], index: 5, kind: input, shape index: {}]   ;;  %s5569_s6 = inlined_call_operand.vmem [shape: f32[1,32], index: 6, kind: input, shape index: {}]   ;;  %s5570_s7 = inlined_call_operand.vmem [shape: bf16[32,32], index: 7, kind: input, shape index: {}]   ;;  %s5571_s8 = inlined_call_operand.vmem [shape: bf16[32,32], index: 8, kind: input, shape index: {}]   ;;  %s5572_s9 = inlined_call_operand.vmem [shape: f32[1,32], index: 9, kind: input, shape index: {}]   ;;  %s5573_s10 = inlined_call_operand.vmem [shape: f32[1,32], index: 10, kind: input, shape index: {}]   ;;  %s5574_s11 = inlined_call_operand.vmem [shape: f32[1,32], index: 11, kind: input, shape index: {}]   ;;  %s5575_s12 = inlined_call_operand.vmem [shape: bf16[32,32], index: 12, kind: input, shape index: {}]   ;;  %s5576_s13 = inlined_call_operand.vmem [shape: bf16[32,32], index: 13, kind: input, shape index: {}]   ;;  %s5577_s14 = inlined_call_operand.vmem [shape: f32[32,32], index: 14, kind: input, shape index: {}]   ;;  %s5578_s15 = inlined_call_operand.vmem [shape: f32[1,32], index: 15, kind: input, shape index: {}]   ;;  %s5579_s16 = inlined_call_operand.vmem [shape: f32[1,32], index: 16, kind: input, shape index: {}]   ;;  %s5580_s17 = inlined_call_operand.vmem [shape: f32[1,32], index: 17, kind: input, shape index: {}]   ;;  %s5581_s18 = inlined_call_operand.vmem [shape: bf16[32,128], index: 18, kind: input, shape index: {}]   ;;  %s5582_s19 = inlined_call_operand.vmem [shape: f32[1,128], index: 19, kind: input, shape index: {}]   ;;  %s5583_s20 = inlined_call_operand.vmem [shape: f32[2,64,32], index: 20, kind: output, shape index: {0}]   ;;  %s5584_s21 = inlined_call_operand.vmem [shape: bf16[2,64,128], index: 21, kind: output, shape index: {1}]  }
   0x1   :  { %5586 = sst [smem:[#allocation2_spill]] %s5563_s0 }
   0x2   :  { %5587 = sst [smem:[#allocation3_spill]] %s5564_s1 }
   0x3   :  { %5588 = sst [smem:[#allocation4_spill]] %s5565_s2  ;;  %s4479_s2 = smov 0  }
   0x4   :  { %5589 = sst [smem:[#allocation5_spill]] %s5566_s3 }
   0x5   :  { %5590 = sst [smem:[#allocation6_spill]] %s5567_s4 }
   0x6   :  { %5591 = sst [smem:[#allocation7_spill]] %s5568_s5 }
   0x7 LB: > { %s3604_s25 = sadd.s32 4294967295, %s4362_s2   ;;  %p3608_p0 = scmp.ge.s32.totalorder %s4362_s2, 1  ;;  %s4362_s2 = sphi %s4479_s2, %s32_s2  }
   0x8   : > { %p600_p1 = scmp.lt.s32.totalorder %s4362_s2, 3 }
   0xa   : > { %p601_p2 = pnand %p3608_p0, %p600_p1 }
   0xb   : > { %p670_p3 = scmp.lt.s32.totalorder (!%p601_p2), %s3604_s25, 1  ;;  %vm733_vm0 = vcmask (!%p601_p2), 261120   ;;  %s5592_s28 = sld [smem:[#allocation3_spill]] (!%p601_p2)  ;;  %vm4365_vm1 = vmmov (!%p601_p2), 0   ;;  %vm1795_vm2 = vcmask (!%p601_p2), 64512   ;;  %vm1876_vm3 = vcmask (!%p601_p2), 130048  }
   0xc   : > { %604 = sbr.rel (%p601_p2) target bundleno = 4166 (0x1046), region = 100  ;;  %s5593_s5 = sld [smem:[#allocation2_spill]] (!%p601_p2)  ;;  %vm2336_vm4 = vcmask (!%p601_p2), 1043456  }
   0xd   : > { %s5594_s24 = sld [smem:[#allocation4_spill]] (!%p601_p2)  ;;  %s5595_s3 = sld [smem:[#allocation7_spill]] (!%p601_p2) }
   0xe   : > { %s4368_s4 = smov (!%p601_p2), 104  }
  0x13   : > { %s5599_s25 = smov (!%p670_p3, %s3604_s25), 1 }
  0x14   : > { %s3708_s26 = sshll.u32 %s5599_s25, 8  ;;  %s3707_s0 = sshll.u32 %s5599_s25, 6 }
  0x15   : > { %s4493_s29 = scalar_lea.vmem %s5592_s28, %s3708_s26  ;;  %s4846_s22 = scalar_lea.vmem %s5593_s5, %s3707_s0 }
  0x16   : > { %v4496_v0 = vld [vmem:[%s4493_s29 + $0x80] sm:$0xff]  ;;  %v4499_v1 = vld [vmem:[%s4493_s29 + $0x88] sm:$0xff]  ;;  %v4516_v8 = vld [vmem:[%s4493_s29 + $0x90] sm:$0xff]  ;;  %s5596_s5 = sld [smem:[#allocation5_spill]]  ;;  %s5597_s26 = sld [smem:[#allocation6_spill]] }
  0x17   : > { %v4502_v2 = vld [vmem:[%s4493_s29] sm:$0xff]  ;;  %v1014_v3 = vsel %vm733_vm0, %v4496_v0, 0.0  ;;  %v4509_v5 = vld [vmem:[%s4493_s29 + $0x8] sm:$0xff]  ;;  %v1017_v6 = vsel %vm733_vm0, %v4499_v1, 0.0  ;;  %v4519_v9 = vld [vmem:[%s4493_s29 + $0x98] sm:$0xff]  ;;  %v1020_v10 = vsel %vm733_vm0, %v4516_v8, 0.0 }
  0x18   : > { %v966_v4 = vsel %vm733_vm0, %v4502_v2, 0.0  ;;  %1015 = vadd.xlane.f32.xlu0 %v1014_v3  ;;  %v969_v7 = vsel %vm733_vm0, %v4509_v5, 0.0  ;;  %v4524_v11 = vld [vmem:[%s4493_s29 + $0x10] sm:$0xff]  ;;  %v1023_v12 = vsel %vm733_vm0, %v4519_v9, 0.0  ;;  %v4529_v13 = vld [vmem:[%s4493_s29 + $0x18] sm:$0xff]  ;;  %v4534_v15 = vld [vmem:[%s4493_s29 + $0xa0] sm:$0xff] }
  0x19   : > { %967 = vadd.xlane.f32.xlu1 %v966_v4  ;;  %v972_v14 = vsel %vm733_vm0, %v4524_v11, 0.0  ;;  %v975_v16 = vsel %vm733_vm0, %v4529_v13, 0.0  ;;  %v4539_v17 = vld [vmem:[%s4493_s29 + $0xa8] sm:$0xff]  ;;  %v1026_v18 = vsel %vm733_vm0, %v4534_v15, 0.0  ;;  %v4546_v20 = vld [vmem:[%s4493_s29 + $0x20] sm:$0xff]  ;;  %v4556_v24 = vld [vmem:[%s4493_s29 + $0xb0] sm:$0xff] }
  0x1a   : > { %v1029_v19 = vsel %vm733_vm0, %v4539_v17, 0.0  ;;  %v4549_v21 = vld [vmem:[%s4493_s29 + $0x28] sm:$0xff]  ;;  %v978_v22 = vsel %vm733_vm0, %v4546_v20, 0.0  ;;  %v4559_v25 = vld [vmem:[%s4493_s29 + $0xb8] sm:$0xff]  ;;  %v1032_v26 = vsel %vm733_vm0, %v4556_v24, 0.0  ;;  %v4566_v28 = vld [vmem:[%s4493_s29 + $0x30] sm:$0xff] }
  0x1b   : > { %v981_v23 = vsel %vm733_vm0, %v4549_v21, 0.0  ;;  %v1035_v27 = vsel %vm733_vm0, %v4559_v25, 0.0  ;;  %v4569_v29 = vld [vmem:[%s4493_s29 + $0x38] sm:$0xff]  ;;  %v984_v30 = vsel %vm733_vm0, %v4566_v28, 0.0  ;;  %v4576_v32 = vld [vmem:[%s4493_s29 + $0xc0] sm:$0xff]  ;;  %v4579_v33 = vld [vmem:[%s4493_s29 + $0xc8] sm:$0xff] }
  0x1c   : > { %1018 = vadd.xlane.f32.xlu0 %v1017_v6  ;;  %v987_v31 = vsel %vm733_vm0, %v4569_v29, 0.0  ;;  %v1038_v34 = vsel %vm733_vm0, %v4576_v32, 0.0  ;;  %v1041_v35 = vsel %vm733_vm0, %v4579_v33, 0.0  ;;  %v4586_v36 = vld [vmem:[%s4493_s29 + $0x40] sm:$0xff]  ;;  %v4589_v37 = vld [vmem:[%s4493_s29 + $0x48] sm:$0xff]  ;;  %v4596_v40 = vld [vmem:[%s4493_s29 + $0xd0] sm:$0xff] }
  0x1d   : > { %970 = vadd.xlane.f32.xlu1 %v969_v7  ;;  %v990_v38 = vsel %vm733_vm0, %v4586_v36, 0.0  ;;  %v993_v39 = vsel %vm733_vm0, %v4589_v37, 0.0  ;;  %v4599_v41 = vld [vmem:[%s4493_s29 + $0xd8] sm:$0xff]  ;;  %v1044_v42 = vsel %vm733_vm0, %v4596_v40, 0.0  ;;  %v4606_v44 = vld [vmem:[%s4493_s29 + $0x50] sm:$0xff]  ;;  %v4616_v48 = vld [vmem:[%s4493_s29 + $0xe0] sm:$0xff] }
  0x1e   : > { %v1047_v43 = vsel %vm733_vm0, %v4599_v41, 0.0  ;;  %v4609_v45 = vld [vmem:[%s4493_s29 + $0x58] sm:$0xff]  ;;  %v996_v46 = vsel %vm733_vm0, %v4606_v44, 0.0  ;;  %v4619_v49 = vld [vmem:[%s4493_s29 + $0xe8] sm:$0xff]  ;;  %v1050_v50 = vsel %vm733_vm0, %v4616_v48, 0.0  ;;  %v4626_v52 = vld [vmem:[%s4493_s29 + $0x60] sm:$0xff] }
  0x1f   : > { %v999_v47 = vsel %vm733_vm0, %v4609_v45, 0.0  ;;  %v1053_v51 = vsel %vm733_vm0, %v4619_v49, 0.0  ;;  %v4629_v53 = vld [vmem:[%s4493_s29 + $0x68] sm:$0xff]  ;;  %v1002_v54 = vsel %vm733_vm0, %v4626_v52, 0.0  ;;  %v4636_v56 = vld [vmem:[%s4493_s29 + $0xf0] sm:$0xff]  ;;  %v4639_v57 = vld [vmem:[%s4493_s29 + $0xf8] sm:$0xff] }
  0x20   : > { %1021 = vadd.xlane.f32.xlu0 %v1020_v10  ;;  %v1005_v55 = vsel %vm733_vm0, %v4629_v53, 0.0  ;;  %v1056_v58 = vsel %vm733_vm0, %v4636_v56, 0.0  ;;  %v1059_v59 = vsel %vm733_vm0, %v4639_v57, 0.0  ;;  %v4646_v60 = vld [vmem:[%s4493_s29 + $0x70] sm:$0xff]  ;;  %v4649_v61 = vld [vmem:[%s4493_s29 + $0x78] sm:$0xff]  ;;  %s5456_s29 = scalar_lea.vmem %s5583_s20, %s3707_s0  ;;  %s3710_s28 = sshll.u32 %s5599_s25, 5 }
  0x21   : > { %1024 = vadd.xlane.f32.xlu1 %v1023_v12  ;;  %v1008_v62 = vsel %vm733_vm0, %v4646_v60, 0.0  ;;  %v1011_v63 = vsel %vm733_vm0, %v4649_v61, 0.0 }
  0x24   : > { %973 = vadd.xlane.f32.xlu0 %v972_v14 }
  0x25   : > { %976 = vadd.xlane.f32.xlu1 %v975_v16 }
  0x28   : > { %1027 = vadd.xlane.f32.xlu0 %v1026_v18 }
  0x29   : > { %1030 = vadd.xlane.f32.xlu1 %v1029_v19 }
  0x2c   : > { %979 = vadd.xlane.f32.xlu0 %v978_v22 }
  0x2d   : > { %982 = vadd.xlane.f32.xlu1 %v981_v23 }
  0x30   : > { %1033 = vadd.xlane.f32.xlu0 %v1032_v26 }
  0x31   : > { %1036 = vadd.xlane.f32.xlu1 %v1035_v27 }
  0x34   : > { %985 = vadd.xlane.f32.xlu0 %v984_v30 }
  0x35   : > { %988 = vadd.xlane.f32.xlu1 %v987_v31 }
  0x38   : > { %1039 = vadd.xlane.f32.xlu0 %v1038_v34 }
  0x39   : > { %1042 = vadd.xlane.f32.xlu1 %v1041_v35 }
  0x3c   : > { %991 = vadd.xlane.f32.xlu0 %v990_v38 }
  0x3d   : > { %994 = vadd.xlane.f32.xlu1 %v993_v39 }
  0x40   : > { %1045 = vadd.xlane.f32.xlu0 %v1044_v42 }
  0x41   : > { %1048 = vadd.xlane.f32.xlu1 %v1047_v43 }
  0x44   : > { %997 = vadd.xlane.f32.xlu0 %v996_v46 }
  0x45   : > { %1000 = vadd.xlane.f32.xlu1 %v999_v47 }
  0x48   : > { %1051 = vadd.xlane.f32.xlu0 %v1050_v50 }
  0x49   : > { %1054 = vadd.xlane.f32.xlu1 %v1053_v51 }
  0x4c   : > { %1003 = vadd.xlane.f32.xlu0 %v1002_v54 }
  0x4d   : > { %1006 = vadd.xlane.f32.xlu1 %v1005_v55 }
  0x50   : > { %1057 = vadd.xlane.f32.xlu0 %v1056_v58 }
  0x51   : > { %1060 = vadd.xlane.f32.xlu1 %v1059_v59 }
  0x54   : > { %1009 = vadd.xlane.f32.xlu0 %v1008_v62 }
  0x55   : > { %1012 = vadd.xlane.f32.xlu1 %v1011_v63 }
  0xa5   : > { %v1016_v3 = vpop.xlane.xlu0 %1015 }
  0xa6   : > { %v968_v4 = vpop.xlane.xlu1 %967  ;;  %v1078_v6 = vmul.f32 0.03125, %v1016_v3 }
  0xa7   : > { %v1062_v7 = vmul.f32 0.03125, %v968_v4 }
  0xa8   : > { %v4656_v10 = vsub.f32 %v4496_v0, %v1078_v6 }
  0xa9   : > { %v4659_v12 = vsub.f32 %v4502_v2, %v1062_v7  ;;  %v1019_v14 = vpop.xlane.xlu0 %1018 }
  0xaa   : > { %v971_v16 = vpop.xlane.xlu1 %970  ;;  %v1079_v18 = vmul.f32 0.03125, %v1019_v14  ;;  %v1142_v19 = vmul.f32 %v4656_v10, %v4656_v10 }
  0xab   : > { %v1063_v22 = vmul.f32 0.03125, %v971_v16  ;;  %v1126_v23 = vmul.f32 %v4659_v12, %v4659_v12 }
  0xac   : > { %v4666_v26 = vsub.f32 %v4499_v1, %v1079_v18  ;;  %v1206_v27 = vsel %vm733_vm0, %v1142_v19, 0.0 }
  0xad   : > { %v4670_v0 = vsub.f32 %v4509_v5, %v1063_v22  ;;  %v1022_v2 = vpop.xlane.xlu0 %1021  ;;  %1207 = vadd.xlane.f32.xlu0 %v1206_v27  ;;  %v1158_v30 = vsel %vm733_vm0, %v1126_v23, 0.0 }
  0xae   : > { %v1025_v31 = vpop.xlane.xlu1 %1024  ;;  %v1080_v34 = vmul.f32 0.03125, %v1022_v2  ;;  %v1143_v35 = vmul.f32 %v4666_v26, %v4666_v26 }
  0xaf   : > { %v1081_v38 = vmul.f32 0.03125, %v1025_v31  ;;  %v1127_v39 = vmul.f32 %v4670_v0, %v4670_v0 }
  0xb0   : > { %v4678_v1 = vsub.f32 %v4516_v8, %v1080_v34  ;;  %v1209_v42 = vsel %vm733_vm0, %v1143_v35, 0.0 }
  0xb1   : > { %v4682_v5 = vsub.f32 %v4519_v9, %v1081_v38  ;;  %v974_v43 = vpop.xlane.xlu0 %973  ;;  %1210 = vadd.xlane.f32.xlu1 %v1209_v42  ;;  %1159 = vadd.xlane.f32.xlu0 %v1158_v30  ;;  %v1161_v46 = vsel %vm733_vm0, %v1127_v39, 0.0 }
  0xb2   : > { %v977_v47 = vpop.xlane.xlu1 %976  ;;  %v1064_v50 = vmul.f32 0.03125, %v974_v43  ;;  %v1144_v51 = vmul.f32 %v4678_v1, %v4678_v1 }
  0xb3   : > { %v1065_v54 = vmul.f32 0.03125, %v977_v47  ;;  %v1145_v8 = vmul.f32 %v4682_v5, %v4682_v5 }
  0xb4   : > { %v4690_v55 = vsub.f32 %v4524_v11, %v1064_v50  ;;  %v1212_v9 = vsel %vm733_vm0, %v1144_v51, 0.0 }
  0xb5   : > { %v4694_v58 = vsub.f32 %v4529_v13, %v1065_v54  ;;  %v1028_v59 = vpop.xlane.xlu0 %1027  ;;  %1213 = vadd.xlane.f32.xlu0 %v1212_v9  ;;  %1162 = vadd.xlane.f32.xlu1 %v1161_v46  ;;  %v1215_v62 = vsel %vm733_vm0, %v1145_v8, 0.0 }
  0xb6   : > { %v1031_v63 = vpop.xlane.xlu1 %1030  ;;  %v1082_v3 = vmul.f32 0.03125, %v1028_v59  ;;  %v1128_v4 = vmul.f32 %v4690_v55, %v4690_v55 }
  0xb7   : > { %v1083_v6 = vmul.f32 0.03125, %v1031_v63  ;;  %v1129_v11 = vmul.f32 %v4694_v58, %v4694_v58 }
  0xb8   : > { %v4702_v7 = vsub.f32 %v4534_v15, %v1082_v3  ;;  %v1164_v13 = vsel %vm733_vm0, %v1128_v4, 0.0 }
  0xb9   : > { %v4706_v14 = vsub.f32 %v4539_v17, %v1083_v6  ;;  %v980_v16 = vpop.xlane.xlu0 %979  ;;  %1165 = vadd.xlane.f32.xlu0 %v1164_v13  ;;  %1216 = vadd.xlane.f32.xlu1 %v1215_v62  ;;  %v1167_v18 = vsel %vm733_vm0, %v1129_v11, 0.0 }
  0xba   : > { %v983_v19 = vpop.xlane.xlu1 %982  ;;  %v1066_v22 = vmul.f32 0.03125, %v980_v16  ;;  %v1146_v23 = vmul.f32 %v4702_v7, %v4702_v7 }
  0xbb   : > { %v1067_v27 = vmul.f32 0.03125, %v983_v19  ;;  %v1147_v15 = vmul.f32 %v4706_v14, %v4706_v14 }
  0xbc   : > { %v4714_v2 = vsub.f32 %v4546_v20, %v1066_v22  ;;  %v1218_v17 = vsel %vm733_vm0, %v1146_v23, 0.0 }
  0xbd   : > { %v4718_v30 = vsub.f32 %v4549_v21, %v1067_v27  ;;  %v1034_v31 = vpop.xlane.xlu0 %1033  ;;  %1219 = vadd.xlane.f32.xlu0 %v1218_v17  ;;  %1168 = vadd.xlane.f32.xlu1 %v1167_v18  ;;  %v1221_v34 = vsel %vm733_vm0, %v1147_v15, 0.0 }
  0xbe   : > { %v1037_v35 = vpop.xlane.xlu1 %1036  ;;  %v1084_v38 = vmul.f32 0.03125, %v1034_v31  ;;  %v1130_v39 = vmul.f32 %v4714_v2, %v4714_v2 }
  0xbf   : > { %v1085_v42 = vmul.f32 0.03125, %v1037_v35  ;;  %v1131_v20 = vmul.f32 %v4718_v30, %v4718_v30 }
  0xc0   : > { %v4726_v43 = vsub.f32 %v4556_v24, %v1084_v38  ;;  %v1170_v21 = vsel %vm733_vm0, %v1130_v39, 0.0 }
  0xc1   : > { %v4730_v46 = vsub.f32 %v4559_v25, %v1085_v42  ;;  %v986_v47 = vpop.xlane.xlu0 %985  ;;  %1171 = vadd.xlane.f32.xlu0 %v1170_v21  ;;  %1222 = vadd.xlane.f32.xlu1 %v1221_v34  ;;  %v1173_v50 = vsel %vm733_vm0, %v1131_v20, 0.0 }
  0xc2   : > { %v989_v51 = vpop.xlane.xlu1 %988  ;;  %v1068_v54 = vmul.f32 0.03125, %v986_v47  ;;  %v1148_v8 = vmul.f32 %v4726_v43, %v4726_v43 }
  0xc3   : > { %v1069_v9 = vmul.f32 0.03125, %v989_v51  ;;  %v1149_v24 = vmul.f32 %v4730_v46, %v4730_v46 }
  0xc4   : > { %v4738_v59 = vsub.f32 %v4566_v28, %v1068_v54  ;;  %v1224_v25 = vsel %vm733_vm0, %v1148_v8, 0.0 }
  0xc5   : > { %v4742_v62 = vsub.f32 %v4569_v29, %v1069_v9  ;;  %v1040_v63 = vpop.xlane.xlu0 %1039  ;;  %1225 = vadd.xlane.f32.xlu0 %v1224_v25  ;;  %1174 = vadd.xlane.f32.xlu1 %v1173_v50  ;;  %v1227_v3 = vsel %vm733_vm0, %v1149_v24, 0.0 }
  0xc6   : > { %v1043_v4 = vpop.xlane.xlu1 %1042  ;;  %v1086_v6 = vmul.f32 0.03125, %v1040_v63  ;;  %v1132_v11 = vmul.f32 %v4738_v59, %v4738_v59 }
  0xc7   : > { %v1087_v13 = vmul.f32 0.03125, %v1043_v4  ;;  %v1133_v28 = vmul.f32 %v4742_v62, %v4742_v62 }
  0xc8   : > { %v4750_v16 = vsub.f32 %v4576_v32, %v1086_v6  ;;  %v1176_v29 = vsel %vm733_vm0, %v1132_v11, 0.0 }
  0xc9   : > { %v4754_v18 = vsub.f32 %v4579_v33, %v1087_v13  ;;  %v992_v19 = vpop.xlane.xlu0 %991  ;;  %1177 = vadd.xlane.f32.xlu0 %v1176_v29  ;;  %1228 = vadd.xlane.f32.xlu1 %v1227_v3  ;;  %v1179_v22 = vsel %vm733_vm0, %v1133_v28, 0.0 }
  0xca   : > { %v995_v23 = vpop.xlane.xlu1 %994  ;;  %v1070_v27 = vmul.f32 0.03125, %v992_v19  ;;  %v1150_v15 = vmul.f32 %v4750_v16, %v4750_v16 }
  0xcb   : > { %v1071_v17 = vmul.f32 0.03125, %v995_v23  ;;  %v1151_v32 = vmul.f32 %v4754_v18, %v4754_v18 }
  0xcc   : > { %v4762_v31 = vsub.f32 %v4586_v36, %v1070_v27  ;;  %v1230_v33 = vsel %vm733_vm0, %v1150_v15, 0.0 }
  0xcd   : > { %v4766_v34 = vsub.f32 %v4589_v37, %v1071_v17  ;;  %v1046_v35 = vpop.xlane.xlu0 %1045  ;;  %1231 = vadd.xlane.f32.xlu0 %v1230_v33  ;;  %1180 = vadd.xlane.f32.xlu1 %v1179_v22  ;;  %v1233_v38 = vsel %vm733_vm0, %v1151_v32, 0.0 }
  0xce   : > { %v1049_v39 = vpop.xlane.xlu1 %1048  ;;  %v1088_v42 = vmul.f32 0.03125, %v1046_v35  ;;  %v1134_v20 = vmul.f32 %v4762_v31, %v4762_v31 }
  0xcf   : > { %v1089_v21 = vmul.f32 0.03125, %v1049_v39  ;;  %v1135_v36 = vmul.f32 %v4766_v34, %v4766_v34 }
  0xd0   : > { %v4774_v47 = vsub.f32 %v4596_v40, %v1088_v42  ;;  %v1182_v37 = vsel %vm733_vm0, %v1134_v20, 0.0 }
  0xd1   : > { %v4778_v50 = vsub.f32 %v4599_v41, %v1089_v21  ;;  %v998_v51 = vpop.xlane.xlu0 %997  ;;  %1183 = vadd.xlane.f32.xlu0 %v1182_v37  ;;  %1234 = vadd.xlane.f32.xlu1 %v1233_v38  ;;  %v1185_v54 = vsel %vm733_vm0, %v1135_v36, 0.0 }
  0xd2   : > { %v1001_v8 = vpop.xlane.xlu1 %1000  ;;  %v1072_v9 = vmul.f32 0.03125, %v998_v51  ;;  %v1152_v24 = vmul.f32 %v4774_v47, %v4774_v47 }
  0xd3   : > { %v1073_v25 = vmul.f32 0.03125, %v1001_v8  ;;  %v1153_v40 = vmul.f32 %v4778_v50, %v4778_v50 }
  0xd4   : > { %v4786_v63 = vsub.f32 %v4606_v44, %v1072_v9  ;;  %v1236_v41 = vsel %vm733_vm0, %v1152_v24, 0.0 }
  0xd5   : > { %v4790_v3 = vsub.f32 %v4609_v45, %v1073_v25  ;;  %v1052_v4 = vpop.xlane.xlu0 %1051  ;;  %1237 = vadd.xlane.f32.xlu0 %v1236_v41  ;;  %1186 = vadd.xlane.f32.xlu1 %v1185_v54  ;;  %v1239_v6 = vsel %vm733_vm0, %v1153_v40, 0.0 }
  0xd6   : > { %v1055_v11 = vpop.xlane.xlu1 %1054  ;;  %v1090_v13 = vmul.f32 0.03125, %v1052_v4  ;;  %v1136_v28 = vmul.f32 %v4786_v63, %v4786_v63 }
  0xd7   : > { %v1091_v29 = vmul.f32 0.03125, %v1055_v11  ;;  %v1137_v44 = vmul.f32 %v4790_v3, %v4790_v3 }
  0xd8   : > { %v4798_v19 = vsub.f32 %v4616_v48, %v1090_v13  ;;  %v1188_v45 = vsel %vm733_vm0, %v1136_v28, 0.0  ;;  %v4854_v13 = vld [vmem:[%s4846_s22] sm:$0xff] }
  0xd9   : > { %v4802_v22 = vsub.f32 %v4619_v49, %v1091_v29  ;;  %v1004_v23 = vpop.xlane.xlu0 %1003  ;;  %1189 = vadd.xlane.f32.xlu0 %v1188_v45  ;;  %1240 = vadd.xlane.f32.xlu1 %v1239_v6  ;;  %v1191_v27 = vsel %vm733_vm0, %v1137_v44, 0.0  ;;  %v734_v44 = vsel %vm733_vm0, %v4854_v13, 0.0  ;;  %v4861_v45 = vld [vmem:[%s4846_s22 + $0x8] sm:$0xff] }
  0xda   : > { %v1007_v15 = vpop.xlane.xlu1 %1006  ;;  %v1074_v17 = vmul.f32 0.03125, %v1004_v23  ;;  %v1154_v32 = vmul.f32 %v4798_v19, %v4798_v19  ;;  %v4864_v23 = vld [vmem:[%s4846_s22 + $0x10] sm:$0xff] }
  0xdb   : > { %v1075_v33 = vmul.f32 0.03125, %v1007_v15  ;;  %v1155_v48 = vmul.f32 %v4802_v22, %v4802_v22  ;;  %v740_v15 = vsel %vm733_vm0, %v4864_v23, 0.0 }
  0xdc   : > { %v4810_v35 = vsub.f32 %v4626_v52, %v1074_v17  ;;  %v1242_v49 = vsel %vm733_vm0, %v1154_v32, 0.0  ;;  %v4871_v17 = vld [vmem:[%s4846_s22 + $0x18] sm:$0xff]  ;;  %v4874_v32 = vld [vmem:[%s4846_s22 + $0x20] sm:$0xff] }
  0xdd   : > { %v4814_v38 = vsub.f32 %v4629_v53, %v1075_v33  ;;  %v1058_v39 = vpop.xlane.xlu0 %1057  ;;  %1243 = vadd.xlane.f32.xlu0 %v1242_v49  ;;  %1192 = vadd.xlane.f32.xlu1 %v1191_v27  ;;  %v1245_v42 = vsel %vm733_vm0, %v1155_v48, 0.0  ;;  %v737_v27 = vsel %vm733_vm0, %v4861_v45, 0.0  ;;  %v743_v33 = vsel %vm733_vm0, %v4871_v17, 0.0  ;;  %v4881_v49 = vld [vmem:[%s4846_s22 + $0x28] sm:$0xff] }
  0xde   : > { %v1061_v20 = vpop.xlane.xlu1 %1060  ;;  %v1092_v21 = vmul.f32 0.03125, %v1058_v39  ;;  %v1138_v36 = vmul.f32 %v4810_v35, %v4810_v35  ;;  %v746_v48 = vsel %vm733_vm0, %v4874_v32, 0.0  ;;  %v4884_v39 = vld [vmem:[%s4846_s22 + $0x30] sm:$0xff] }
  0xdf   : > { %v1093_v37 = vmul.f32 0.03125, %v1061_v20  ;;  %v1139_v52 = vmul.f32 %v4814_v38, %v4814_v38  ;;  %v752_v20 = vsel %vm733_vm0, %v4884_v39, 0.0 }
  0xe0   : > { %v4822_v51 = vsub.f32 %v4636_v56, %v1092_v21  ;;  %v1194_v53 = vsel %vm733_vm0, %v1138_v36, 0.0  ;;  %v4891_v21 = vld [vmem:[%s4846_s22 + $0x38] sm:$0xff] }
  0xe1   : > { %v4826_v54 = vsub.f32 %v4639_v57, %v1093_v37  ;;  %v1010_v8 = vpop.xlane.xlu0 %1009  ;;  %1195 = vadd.xlane.f32.xlu0 %v1194_v53  ;;  %1246 = vadd.xlane.f32.xlu1 %v1245_v42  ;;  %v1197_v9 = vsel %vm733_vm0, %v1139_v52, 0.0  ;;  %v749_v42 = vsel %vm733_vm0, %v4881_v49, 0.0  ;;  %v755_v36 = vsel %vm733_vm0, %v4891_v21, 0.0  ;;  %v1459_v37 = vld [vmem:[%s5594_s24 + $0x8] sm:$0xff] }
  0xe2   : > { %v1013_v24 = vpop.xlane.xlu1 %1012  ;;  %v1076_v25 = vmul.f32 0.03125, %v1010_v8  ;;  %v1156_v40 = vmul.f32 %v4822_v51, %v4822_v51  ;;  %1526 = vmatprep.mubr.f32.mxu1 %v1459_v37 }
  0xe3   : > { %v1077_v41 = vmul.f32 0.03125, %v1013_v24  ;;  %v1157_v56 = vmul.f32 %v4826_v54, %v4826_v54 }
  0xe4   : > { %v4835_v4 = vsub.f32 %v4646_v60, %v1076_v25  ;;  %v1248_v57 = vsel %vm733_vm0, %v1156_v40, 0.0 }
  0xe5   : > { %v4839_v6 = vsub.f32 %v4649_v61, %v1077_v41  ;;  %1249 = vadd.xlane.f32.xlu0 %v1248_v57  ;;  %1198 = vadd.xlane.f32.xlu1 %v1197_v9  ;;  %v1251_v11 = vsel %vm733_vm0, %v1157_v56, 0.0 }
  0xe6   : > { %v1140_v60 = vmul.f32 %v4835_v4, %v4835_v4 }
  0xe7   : > { %v1141_v61 = vmul.f32 %v4839_v6, %v4839_v6 }
  0xe8   : > { %v1200_v28 = vsel %vm733_vm0, %v1140_v60, 0.0 }
  0xe9   : > { %1201 = vadd.xlane.f32.xlu0 %v1200_v28  ;;  %1252 = vadd.xlane.f32.xlu1 %v1251_v11  ;;  %v1203_v29 = vsel %vm733_vm0, %v1141_v61, 0.0 }
  0xed   : > { %1204 = vadd.xlane.f32.xlu1 %v1203_v29  ;;  %735 = vadd.xlane.f32.xlu0 %v734_v44 }
  0xf1   : > { %738 = vadd.xlane.f32.xlu1 %v737_v27  ;;  %741 = vadd.xlane.f32.xlu0 %v740_v15 }
  0xf5   : > { %744 = vadd.xlane.f32.xlu1 %v743_v33  ;;  %747 = vadd.xlane.f32.xlu0 %v746_v48 }
  0xf9   : > { %750 = vadd.xlane.f32.xlu1 %v749_v42  ;;  %753 = vadd.xlane.f32.xlu0 %v752_v20 }
  0xfd   : > { %756 = vadd.xlane.f32.xlu1 %v755_v36 }
 0x13a   : > { %v1208_v52 = vpop.xlane.xlu0 %1207 }
 0x13b   : > { %v1270_v53 = vmul.f32 0.03125, %v1208_v52 }
 0x13d   : > { %v1302_v8 = vadd.f32 1e-05, %v1270_v53 }
 0x13e   : > { %v1160_v9 = vpop.xlane.xlu0 %1159  ;;  %v1211_v24 = vpop.xlane.xlu1 %1210 }
 0x13f   : > { %4116 = vrsqrt.f32 %v1302_v8  ;;  %v1254_v25 = vmul.f32 0.03125, %v1160_v9  ;;  %v1271_v40 = vmul.f32 0.03125, %v1211_v24  ;;  %v4902_v9 = vld [vmem:[%s5595_s3] ss:$0 sm:$0xff] }
 0x141   : > { %v1286_v41 = vadd.f32 1e-05, %v1254_v25  ;;  %v1303_v56 = vadd.f32 1e-05, %v1271_v40 }
 0x142   : > { %v1214_v57 = vpop.xlane.xlu0 %1213  ;;  %v1163_v60 = vpop.xlane.xlu1 %1162 }
 0x143   : > { %4118 = vrsqrt.f32 %v1286_v41  ;;  %v1272_v11 = vmul.f32 0.03125, %v1214_v57  ;;  %v1255_v61 = vmul.f32 0.03125, %v1163_v60 }
 0x144   : > { %4120 = vrsqrt.f32 %v1303_v56 }
 0x145   : > { %v1304_v28 = vadd.f32 1e-05, %v1272_v11  ;;  %v1287_v29 = vadd.f32 1e-05, %v1255_v61  ;;  %v4908_v61 = vld [vmem:[%s5569_s6] ss:$0 sm:$0xff] }
 0x146   : > { %v1166_v44 = vpop.xlane.xlu0 %1165  ;;  %v1217_v27 = vpop.xlane.xlu1 %1216 }
 0x147   : > { %4122 = vrsqrt.f32 %v1304_v28  ;;  %v1256_v15 = vmul.f32 0.03125, %v1166_v44  ;;  %v1273_v33 = vmul.f32 0.03125, %v1217_v27 }
 0x148   : > { %4124 = vrsqrt.f32 %v1287_v29 }
 0x149   : > { %v4117_v48 = vpop.eup %4116  ;;  %v1288_v42 = vadd.f32 1e-05, %v1256_v15  ;;  %v1305_v20 = vadd.f32 1e-05, %v1273_v33 }
 0x14a   : > { %v1220_v36 = vpop.xlane.xlu0 %1219  ;;  %v1169_v37 = vpop.xlane.xlu1 %1168  ;;  %v1366_v52 = vmul.f32 %v4117_v48, %v4656_v10 }
 0x14b   : > { %4126 = vrsqrt.f32 %v1288_v42  ;;  %v1274_v53 = vmul.f32 0.03125, %v1220_v36  ;;  %v1257_v8 = vmul.f32 0.03125, %v1169_v37 }
 0x14c   : > { %4128 = vrsqrt.f32 %v1305_v20  ;;  %v1404_v60 = vmul.f32 %v4902_v9, %v1366_v52 }
 0x14d   : > { %v4119_v24 = vpop.eup %4118  ;;  %v1306_v25 = vadd.f32 1e-05, %v1274_v53  ;;  %v1289_v40 = vadd.f32 1e-05, %v1257_v8 }
 0x14e   : > { %v4121_v41 = vpop.eup %4120  ;;  %v1172_v56 = vpop.xlane.xlu0 %1171  ;;  %v1350_v29 = vmul.f32 %v4119_v24, %v4659_v12  ;;  %v1442_v36 = vadd.f32 %v4908_v61, %v1404_v60 }
 0x14f   : > { %v1223_v57 = vpop.xlane.xlu1 %1222  ;;  %4130 = vrsqrt.f32 %v1306_v25  ;;  %v1258_v11 = vmul.f32 0.03125, %v1172_v56  ;;  %v1367_v28 = vmul.f32 %v4121_v41, %v4666_v26 }
 0x150   : > { %v1275_v10 = vmul.f32 0.03125, %v1223_v57  ;;  %4132 = vrsqrt.f32 %v1289_v40  ;;  %v1388_v8 = vmul.f32 %v4902_v9, %v1350_v29 }
 0x151   : > { %v4123_v44 = vpop.eup %4122  ;;  %v1290_v27 = vadd.f32 1e-05, %v1258_v11  ;;  %v1405_v33 = vmul.f32 %v4902_v9, %v1367_v28 }
 0x152   : > { %v1307_v15 = vadd.f32 1e-05, %v1275_v10  ;;  %v4125_v48 = vpop.eup %4124  ;;  %v1226_v42 = vpop.xlane.xlu0 %1225  ;;  %v1368_v37 = vmul.f32 %v4123_v44, %v4678_v1 }
 0x153   : > { %v1175_v20 = vpop.xlane.xlu1 %1174  ;;  %4134 = vrsqrt.f32 %v1290_v27  ;;  %v1276_v52 = vmul.f32 0.03125, %v1226_v42  ;;  %v1443_v26 = vadd.f32 %v4908_v61, %v1405_v33  ;;  %v1351_v12 = vmul.f32 %v4125_v48, %v4670_v0 }
 0x154   : > { %v1259_v53 = vmul.f32 0.03125, %v1175_v20  ;;  %4136 = vrsqrt.f32 %v1307_v15  ;;  %v1406_v1 = vmul.f32 %v4902_v9, %v1368_v37  ;;  %v1426_v0 = vadd.f32 %v4908_v61, %v1388_v8 }
 0x155   : > { %v4127_v24 = vpop.eup %4126  ;;  %v1308_v25 = vadd.f32 1e-05, %v1276_v52  ;;  %v4029_v41 = vpack.c.bf16 %v1443_v26, %v1442_v36  ;;  %v1389_v60 = vmul.f32 %v4902_v9, %v1351_v12 }
 0x156   : > { %v1291_v40 = vadd.f32 1e-05, %v1259_v53  ;;  %v4129_v56 = vpop.eup %4128  ;;  %v1178_v57 = vpop.xlane.xlu0 %1177  ;;  %v1352_v27 = vmul.f32 %v4127_v24, %v4690_v55  ;;  %v1444_v53 = vadd.f32 %v4908_v61, %v1406_v1 }
 0x157   : > { %v1229_v11 = vpop.xlane.xlu1 %1228  ;;  %4138 = vrsqrt.f32 %v1308_v25  ;;  %v1260_v10 = vmul.f32 0.03125, %v1178_v57  ;;  %4030 = vmatprep.subr.bf16.mxu1 %v4029_v41  ;;  %v1369_v44 = vmul.f32 %v4129_v56, %v4682_v5  ;;  %v1427_v29 = vadd.f32 %v4908_v61, %v1389_v60 }
 0x158   : > { %v1277_v28 = vmul.f32 0.03125, %v1229_v11  ;;  %4140 = vrsqrt.f32 %v1291_v40  ;;  %v1390_v24 = vmul.f32 %v4902_v9, %v1352_v27 }
 0x159   : > { %v4131_v15 = vpop.eup %4130  ;;  %v1292_v33 = vadd.f32 1e-05, %v1260_v10  ;;  %v1407_v42 = vmul.f32 %v4902_v9, %v1369_v44  ;;  %v4031_v37 = vpack.c.bf16 %v1427_v29, %v1426_v0 }
 0x15a   : > { %v1309_v48 = vadd.f32 1e-05, %v1277_v28  ;;  %v4133_v20 = vpop.eup %4132  ;;  %v1232_v36 = vpop.xlane.xlu0 %1231  ;;  %v1370_v5 = vmul.f32 %v4131_v15, %v4702_v7 }
 0x15b   : > { %v1181_v52 = vpop.xlane.xlu1 %1180  ;;  %4142 = vrsqrt.f32 %v1292_v33  ;;  %v1278_v26 = vmul.f32 0.03125, %v1232_v36  ;;  %v1445_v8 = vadd.f32 %v4908_v61, %v1407_v42  ;;  %4032 = vmatpush3.bf16.msra.mxu1 %v4031_v37  ;;  %v1353_v55 = vmul.f32 %v4133_v20, %v4694_v58 }
 0x15c   : > { %v1261_v12 = vmul.f32 0.03125, %v1181_v52  ;;  %4144 = vrsqrt.f32 %v1309_v48  ;;  %v1408_v1 = vmul.f32 %v4902_v9, %v1370_v5  ;;  %v1428_v58 = vadd.f32 %v4908_v61, %v1390_v24 }
 0x15d   : > { %v4135_v25 = vpop.eup %4134  ;;  %v1310_v40 = vadd.f32 1e-05, %v1278_v26  ;;  %v4033_v56 = vpack.c.bf16 %v1445_v8, %v1444_v53  ;;  %v1391_v7 = vmul.f32 %v4902_v9, %v1353_v55 }
 0x15e   : > { %v1293_v41 = vadd.f32 1e-05, %v1261_v12  ;;  %v4137_v57 = vpop.eup %4136  ;;  %v1184_v11 = vpop.xlane.xlu0 %1183  ;;  %v1354_v29 = vmul.f32 %v4135_v25, %v4714_v2  ;;  %v1446_v52 = vadd.f32 %v4908_v61, %v1408_v1 }
 0x15f   : > { %v1235_v60 = vpop.xlane.xlu1 %1234  ;;  %4146 = vrsqrt.f32 %v1310_v40  ;;  %v1262_v10 = vmul.f32 0.03125, %v1184_v11  ;;  %4034 = vmatprep.subr.bf16.mxu1 %v4033_v56  ;;  %v1371_v44 = vmul.f32 %v4137_v57, %v4706_v14  ;;  %v1429_v0 = vadd.f32 %v4908_v61, %v1391_v7 }
 0x160   : > { %v1279_v28 = vmul.f32 0.03125, %v1235_v60  ;;  %4148 = vrsqrt.f32 %v1293_v41  ;;  %v1392_v12 = vmul.f32 %v4902_v9, %v1354_v29 }
 0x161   : > { %v4139_v27 = vpop.eup %4138  ;;  %v1294_v15 = vadd.f32 1e-05, %v1262_v10  ;;  %v1409_v48 = vmul.f32 %v4902_v9, %v1371_v44  ;;  %v4035_v36 = vpack.c.bf16 %v1429_v0, %v1428_v58 }
 0x162   : > { %v1311_v33 = vadd.f32 1e-05, %v1279_v28  ;;  %v4141_v42 = vpop.eup %4140  ;;  %v1238_v20 = vpop.xlane.xlu0 %1237  ;;  %v1372_v14 = vmul.f32 %v4139_v27, %v4726_v43 }
 0x163   : > { %v1187_v37 = vpop.xlane.xlu1 %1186  ;;  %4150 = vrsqrt.f32 %v1294_v15  ;;  %v1280_v53 = vmul.f32 0.03125, %v1238_v20  ;;  %v1447_v26 = vadd.f32 %v4908_v61, %v1409_v48  ;;  %4036 = vmatpush3.bf16.msra.mxu1 %v4035_v36  ;;  %v1355_v2 = vmul.f32 %v4141_v42, %v4718_v30 }
 0x164   : > { %v1263_v5 = vmul.f32 0.03125, %v1187_v37  ;;  %4152 = vrsqrt.f32 %v1311_v33  ;;  %v1410_v57 = vmul.f32 %v4902_v9, %v1372_v14  ;;  %v1430_v30 = vadd.f32 %v4908_v61, %v1392_v12 }
 0x165   : > { %v4143_v8 = vpop.eup %4142  ;;  %v1312_v55 = vadd.f32 1e-05, %v1280_v53  ;;  %v4037_v25 = vpack.c.bf16 %v1447_v26, %v1446_v52  ;;  %v1393_v43 = vmul.f32 %v4902_v9, %v1355_v2 }
 0x166   : > { %v1295_v24 = vadd.f32 1e-05, %v1263_v5  ;;  %v4145_v40 = vpop.eup %4144  ;;  %v1190_v41 = vpop.xlane.xlu0 %1189  ;;  %v1356_v10 = vmul.f32 %v4143_v8, %v4738_v59  ;;  %v1448_v48 = vadd.f32 %v4908_v61, %v1410_v57 }
 0x167   : > { %v1241_v56 = vpop.xlane.xlu1 %1240  ;;  %4154 = vrsqrt.f32 %v1312_v55  ;;  %v1264_v11 = vmul.f32 0.03125, %v1190_v41  ;;  %4038 = vmatprep.subr.bf16.mxu1 %v4037_v25  ;;  %v1373_v7 = vmul.f32 %v4145_v40, %v4730_v46  ;;  %v1431_v1 = vadd.f32 %v4908_v61, %v1393_v43 }
 0x168   : > { %v1281_v60 = vmul.f32 0.03125, %v1241_v56  ;;  %4156 = vrsqrt.f32 %v1295_v24  ;;  %v1394_v37 = vmul.f32 %v4902_v9, %v1356_v10 }
 0x169   : > { %v4147_v28 = vpop.eup %4146  ;;  %v1296_v44 = vadd.f32 1e-05, %v1264_v11  ;;  %v1411_v0 = vmul.f32 %v4902_v9, %v1373_v7  ;;  %v4039_v15 = vpack.c.bf16 %v1431_v1, %v1430_v30 }
 0x16a   : > { %v1313_v58 = vadd.f32 1e-05, %v1281_v60  ;;  %v4149_v29 = vpop.eup %4148  ;;  %v1244_v27 = vpop.xlane.xlu0 %1243  ;;  %v1374_v46 = vmul.f32 %v4147_v28, %v4750_v16 }
 0x16b   : > { %v1193_v33 = vpop.xlane.xlu1 %1192  ;;  %4158 = vrsqrt.f32 %v1296_v44  ;;  %v1282_v42 = vmul.f32 0.03125, %v1244_v27  ;;  %v1449_v36 = vadd.f32 %v4908_v61, %v1411_v0  ;;  %4040 = vmatpush3.bf16.msra.mxu1 %v4039_v15  ;;  %v1357_v59 = vmul.f32 %v4149_v29, %v4742_v62 }
 0x16c   : > { %v1265_v20 = vmul.f32 0.03125, %v1193_v33  ;;  %4160 = vrsqrt.f32 %v1313_v58  ;;  %v1412_v8 = vmul.f32 %v4902_v9, %v1374_v46  ;;  %v1432_v62 = vadd.f32 %v4908_v61, %v1394_v37 }
 0x16d   : > { %v4151_v52 = vpop.eup %4150  ;;  %v1314_v14 = vadd.f32 1e-05, %v1282_v42  ;;  %v4041_v5 = vpack.c.bf16 %v1449_v36, %v1448_v48  ;;  %v1395_v16 = vmul.f32 %v4902_v9, %v1357_v59 }
 0x16e   : > { %v1297_v53 = vadd.f32 1e-05, %v1265_v20  ;;  %v4153_v26 = vpop.eup %4152  ;;  %v1196_v2 = vpop.xlane.xlu0 %1195  ;;  %v1358_v41 = vmul.f32 %v4151_v52, %v4762_v31  ;;  %v1450_v10 = vadd.f32 %v4908_v61, %v1412_v8 }
 0x16f   : > { %v1247_v12 = vpop.xlane.xlu1 %1246  ;;  %4162 = vrsqrt.f32 %v1314_v14  ;;  %v1266_v55 = vmul.f32 0.03125, %v1196_v2  ;;  %4042 = vmatprep.subr.bf16.mxu1 %v4041_v5  ;;  %v1375_v25 = vmul.f32 %v4153_v26, %v4754_v18  ;;  %v1433_v40 = vadd.f32 %v4908_v61, %v1395_v16 }
 0x170   : > { %v1283_v24 = vmul.f32 0.03125, %v1247_v12  ;;  %4164 = vrsqrt.f32 %v1297_v53  ;;  %v1396_v0 = vmul.f32 %v4902_v9, %v1358_v41 }
 0x171   : > { %v4155_v56 = vpop.eup %4154  ;;  %v1298_v43 = vadd.f32 1e-05, %v1266_v55  ;;  %v1413_v11 = vmul.f32 %v4902_v9, %v1375_v25  ;;  %v4043_v30 = vpack.c.bf16 %v1433_v40, %v1432_v62 }
 0x172   : > { %v1315_v57 = vadd.f32 1e-05, %v1283_v24  ;;  %v4157_v60 = vpop.eup %4156  ;;  %v1250_v7 = vpop.xlane.xlu0 %1249  ;;  %v1376_v18 = vmul.f32 %v4155_v56, %v4774_v47 }
 0x173   : > { %v1199_v1 = vpop.xlane.xlu1 %1198  ;;  %4166 = vrsqrt.f32 %v1298_v43  ;;  %v1284_v28 = vmul.f32 0.03125, %v1250_v7  ;;  %v1451_v58 = vadd.f32 %v4908_v61, %v1413_v11  ;;  %4044 = vmatpush3.bf16.msra.mxu1 %v4043_v30  ;;  %v1359_v31 = vmul.f32 %v4157_v60, %v4766_v34 }
 0x174   : > { %v1267_v44 = vmul.f32 0.03125, %v1199_v1  ;;  %4168 = vrsqrt.f32 %v1315_v57  ;;  %v1414_v20 = vmul.f32 %v4902_v9, %v1376_v18  ;;  %v1434_v34 = vadd.f32 %v4908_v61, %v1396_v0 }
 0x175   : > { %v4159_v29 = vpop.eup %4158  ;;  %v1316_v27 = vadd.f32 1e-05, %v1284_v28  ;;  %v4045_v33 = vpack.c.bf16 %v1451_v58, %v1450_v10  ;;  %v1397_v47 = vmul.f32 %v4902_v9, %v1359_v31 }
 0x176   : > { %v1299_v15 = vadd.f32 1e-05, %v1267_v44  ;;  %v4161_v48 = vpop.eup %4160  ;;  %v1202_v46 = vpop.xlane.xlu0 %1201  ;;  %v1360_v14 = vmul.f32 %v4159_v29, %v4786_v63  ;;  %v1452_v24 = vadd.f32 %v4908_v61, %v1414_v20 }
 0x177   : > { %v1253_v42 = vpop.xlane.xlu1 %1252  ;;  %4170 = vrsqrt.f32 %v1316_v27  ;;  %v1268_v36 = vmul.f32 0.03125, %v1202_v46  ;;  %4046 = vmatprep.subr.bf16.mxu1 %v4045_v33  ;;  %v1377_v37 = vmul.f32 %v4161_v48, %v4778_v50  ;;  %v1435_v52 = vadd.f32 %v4908_v61, %v1397_v47 }
 0x178   : > { %v1285_v59 = vmul.f32 0.03125, %v1253_v42  ;;  %4172 = vrsqrt.f32 %v1299_v15  ;;  %v1398_v40 = vmul.f32 %v4902_v9, %v1360_v14 }
 0x179   : > { %v4163_v53 = vpop.eup %4162  ;;  %v1300_v5 = vadd.f32 1e-05, %v1268_v36  ;;  %v1415_v2 = vmul.f32 %v4902_v9, %v1377_v37  ;;  %v4047_v16 = vpack.c.bf16 %v1435_v52, %v1434_v34 }
 0x17a   : > { %v1317_v26 = vadd.f32 1e-05, %v1285_v59  ;;  %v4165_v12 = vpop.eup %4164  ;;  %v736_v55 = vpop.xlane.xlu0 %735  ;;  %v1378_v41 = vmul.f32 %v4163_v53, %v4798_v19  ;;  %v1436_v28 = vadd.f32 %v4908_v61, %v1398_v40 }
 0x17b   : > { %v1205_v8 = vpop.xlane.xlu1 %1204  ;;  %4174 = vrsqrt.f32 %v1300_v5  ;;  %v759_v25 = vmul.f32 0.03125, %v736_v55  ;;  %v1453_v62 = vadd.f32 %v4908_v61, %v1415_v2  ;;  %4048 = vmatpush3.bf16.msra.mxu1 %v4047_v16  ;;  %v1361_v63 = vmul.f32 %v4165_v12, %v4790_v3 }
 0x17c   : > { %v1269_v50 = vmul.f32 0.03125, %v1205_v8  ;;  %4176 = vrsqrt.f32 %v1317_v26  ;;  %v1416_v58 = vmul.f32 %v4902_v9, %v1378_v41 }
 0x17d   : > { %v4167_v56 = vpop.eup %4166  ;;  %v4979_v57 = vsub.f32 %v4854_v13, %v759_v25  ;;  %v4049_v11 = vpack.c.bf16 %v1453_v62, %v1452_v24  ;;  %v1399_v1 = vmul.f32 %v4902_v9, %v1361_v63 }
 0x17e   : > { %v1301_v43 = vadd.f32 1e-05, %v1269_v50  ;;  %v4169_v60 = vpop.eup %4168  ;;  %v742_v30 = vpop.xlane.xlu0 %741  ;;  %v1362_v10 = vmul.f32 %v4167_v56, %v4810_v35  ;;  %v1454_v20 = vadd.f32 %v4908_v61, %v1416_v58 }
 0x17f   : > { %v739_v7 = vpop.xlane.xlu1 %738  ;;  %4050 = vmatprep.subr.bf16.mxu1 %v4049_v11  ;;  %v761_v18 = vmul.f32 0.03125, %v742_v30  ;;  %v775_v19 = vmul.f32 %v4979_v57, %v4979_v57  ;;  %v1437_v13 = vadd.f32 %v4908_v61, %v1399_v1  ;;  %v1379_v44 = vmul.f32 %v4169_v60, %v4802_v22 }
 0x180   : > { %4178 = vrsqrt.f32 %v1301_v43  ;;  %v760_v3 = vmul.f32 0.03125, %v739_v7  ;;  %v1400_v22 = vmul.f32 %v4902_v9, %v1362_v10 }
 0x181   : > { %v4171_v31 = vpop.eup %4170  ;;  %v4993_v35 = vsub.f32 %v4864_v23, %v761_v18  ;;  %v783_v29 = vsel %vm733_vm0, %v775_v19, 0.0  ;;  %v4051_v15 = vpack.c.bf16 %v1437_v13, %v1436_v28  ;;  %v1417_v46 = vmul.f32 %v4902_v9, %v1379_v44 }
 0x182   : > { %v4990_v0 = vsub.f32 %v4861_v45, %v760_v3  ;;  %v4173_v27 = vpop.eup %4172  ;;  %784 = vadd.xlane.f32.xlu0 %v783_v29  ;;  %v748_v48 = vpop.xlane.xlu0 %747  ;;  %v1380_v37 = vmul.f32 %v4171_v31, %v4822_v51  ;;  %v1438_v51 = vadd.f32 %v4908_v61, %v1400_v22  ;;  %v1461_v29 = vld [vmem:[%s5594_s24 + $0x18] sm:$0xff] }
 0x183   : > { %v745_v33 = vpop.xlane.xlu1 %744  ;;  %v763_v47 = vmul.f32 0.03125, %v748_v48  ;;  %v777_v23 = vmul.f32 %v4993_v35, %v4993_v35  ;;  %4052 = vmatpush3.bf16.msra.mxu1 %v4051_v15  ;;  %v1455_v36 = vadd.f32 %v4908_v61, %v1417_v46  ;;  %v1363_v59 = vmul.f32 %v4173_v27, %v4814_v38  ;;  %v4106_v27 = vld [vmem:[%s5570_s7] sm:$0xff]   ;;  %v4107_v15 = vld [vmem:[%s5570_s7 + $0x8] sm:$0xff]  }
 0x184   : > { %v762_v42 = vmul.f32 0.03125, %v745_v33  ;;  %v776_v45 = vmul.f32 %v4990_v0, %v4990_v0  ;;  %v1418_v25 = vmul.f32 %v4902_v9, %v1380_v37  ;;  %3861 = vmatprep.subr.bf16.mxu0 %v4106_v27  ;;  %v4364_v33 = vmov 0.0  }
 0x185   : > { %v4175_v34 = vpop.eup %4174  ;;  %v5010_v14 = vsub.f32 %v4874_v32, %v763_v47  ;;  %v789_v5 = vsel %vm733_vm0, %v777_v23, 0.0  ;;  %v4053_v2 = vpack.c.bf16 %v1455_v36, %v1454_v20  ;;  %v1401_v38 = vmul.f32 %v4902_v9, %v1363_v59  ;;  %3862 = vmatpush3.bf16.msra.mxu0 %v4106_v27 }
 0x186   : > { %v5007_v52 = vsub.f32 %v4871_v17, %v762_v42  ;;  %v786_v53 = vsel %vm733_vm0, %v776_v45, 0.0  ;;  %v4177_v26 = vpop.eup %4176  ;;  %790 = vadd.xlane.f32.xlu0 %v789_v5  ;;  %v754_v16 = vpop.xlane.xlu0 %753  ;;  %v1364_v62 = vmul.f32 %v4175_v34, %v4835_v4  ;;  %v1456_v1 = vadd.f32 %v4908_v61, %v1418_v25  ;;  %3863 = vmatprep.subr.bf16.mxu0 %v4107_v15 }
 0x187   : > { %787 = vadd.xlane.f32.xlu1 %v786_v53  ;;  %v751_v12 = vpop.xlane.xlu1 %750  ;;  %v765_v17 = vmul.f32 0.03125, %v754_v16  ;;  %v779_v55 = vmul.f32 %v5010_v14, %v5010_v14  ;;  %4054 = vmatprep.subr.bf16.mxu1 %v4053_v2  ;;  %v1439_v24 = vadd.f32 %v4908_v61, %v1401_v38  ;;  %v1381_v50 = vmul.f32 %v4177_v26, %v4826_v54 }
 0x188   : > { %v764_v8 = vmul.f32 0.03125, %v751_v12  ;;  %v778_v32 = vmul.f32 %v5007_v52, %v5007_v52  ;;  %v1402_v30 = vmul.f32 %v4902_v9, %v1364_v62 }
 0x189   : > { %v5028_v41 = vsub.f32 %v4884_v39, %v765_v17  ;;  %v795_v43 = vsel %vm733_vm0, %v779_v55, 0.0  ;;  %v4055_v11 = vpack.c.bf16 %v1439_v24, %v1438_v51  ;;  %v1419_v54 = vmul.f32 %v4902_v9, %v1381_v50  ;;  %3864 = vmatpush3.bf16.msra.mxu0 %v4107_v15  ;;  %v3617_v50 = vld [vmem:[%s5596_s5] ss:$0 sm:$0xff]  ;;  %s4366_s5 = smov 120  }
 0x18a   : > { %v4179_v63 = vpop.eup %4178  ;;  %v5025_v40 = vsub.f32 %v4881_v49, %v764_v8  ;;  %v792_v56 = vsel %vm733_vm0, %v778_v32, 0.0  ;;  %796 = vadd.xlane.f32.xlu0 %v795_v43  ;;  %v1440_v13 = vadd.f32 %v4908_v61, %v1402_v30  ;;  %3873 = vmatprep.subr.bf16.mxu0 %v4364_v33 }
 0x18b   : > { %793 = vadd.xlane.f32.xlu1 %v792_v56  ;;  %v757_v60 = vpop.xlane.xlu1 %756  ;;  %v1365_v7 = vmul.f32 %v4179_v63, %v4839_v6  ;;  %v781_v39 = vmul.f32 %v5028_v41, %v5028_v41  ;;  %4056 = vmatpush3.bf16.msra.mxu1 %v4055_v11  ;;  %v1457_v10 = vadd.f32 %v4908_v61, %v1419_v54  ;;  %v3618_v11 = vld [vmem:[%s5597_s26] ss:$0 sm:$0xff] }
 0x18c   : > { %v766_v4 = vmul.f32 0.03125, %v757_v60  ;;  %v780_v49 = vmul.f32 %v5025_v40, %v5025_v40 }
 0x18d   : > { %v1403_v3 = vmul.f32 %v4902_v9, %v1365_v7  ;;  %v801_v19 = vsel %vm733_vm0, %v781_v39, 0.0  ;;  %v4057_v28 = vpack.c.bf16 %v1457_v10, %v1456_v1 }
 0x18e   : > { %v5043_v18 = vsub.f32 %v4891_v21, %v766_v4  ;;  %v798_v6 = vsel %vm733_vm0, %v780_v49, 0.0  ;;  %802 = vadd.xlane.f32.xlu0 %v801_v19  ;;  %v1458_v21 = vld [vmem:[%s5594_s24] sm:$0xff] }
 0x18f   : > { %799 = vadd.xlane.f32.xlu1 %v798_v6  ;;  %v1441_v44 = vadd.f32 %v4908_v61, %v1403_v3  ;;  %4058 = vmatprep.subr.bf16.mxu1 %v4057_v28  ;;  %v1460_v61 = vld [vmem:[%s5594_s24 + $0x10] sm:$0xff] }
 0x190   : > { %v782_v58 = vmul.f32 %v5043_v18, %v5043_v18 }
 0x191   : > { %v4059_v31 = vpack.c.bf16 %v1441_v44, %v1440_v13 }
 0x192   : > { %v804_v9 = vsel %vm733_vm0, %v782_v58, 0.0 }
 0x193   : > { %4060 = vmatpush3.bf16.msra.mxu1 %v4059_v31  ;;  %805 = vadd.xlane.f32.xlu1 %v804_v9 }
 0x196   : > { %1527 = vmatmul.mubr.f32.vlgmr.msra.gmra.mrb[0].mxu1 %v1458_v21 }
 0x197   : > { %1531 = vmatprep.mubr.f32.mxu1 %v1461_v29 }
 0x19a   : > { %1532 = vmatmul.mubr.f32.gmra.mrb[2].mxu1 %v1460_v61  ;;  %v4109_v61 = vld [vmem:[%s5571_s8 + $0x8] sm:$0xff]  }
 0x20f   : > { %v785_v48 = vpop.xlane.xlu0 %784 }
 0x210   : > { %v807_v46 = vmul.f32 0.03125, %v785_v48 }
 0x212   : > { %v815_v22 = vadd.f32 1e-05, %v807_v46 }
 0x213   : > { %v791_v47 = vpop.xlane.xlu0 %790 }
 0x214   : > { %v788_v42 = vpop.xlane.xlu1 %787  ;;  %4180 = vrsqrt.f32 %v815_v22  ;;  %v809_v23 = vmul.f32 0.03125, %v791_v47 }
 0x215   : > { %v808_v45 = vmul.f32 0.03125, %v788_v42 }
 0x216   : > { %v817_v36 = vadd.f32 1e-05, %v809_v23 }
 0x217   : > { %v816_v20 = vadd.f32 1e-05, %v808_v45  ;;  %v797_v37 = vpop.xlane.xlu0 %796 }
 0x218   : > { %v794_v59 = vpop.xlane.xlu1 %793  ;;  %v811_v53 = vmul.f32 0.03125, %v797_v37 }
 0x219   : > { %4182 = vrsqrt.f32 %v816_v20  ;;  %v810_v34 = vmul.f32 0.03125, %v794_v59 }
 0x21a   : > { %4184 = vrsqrt.f32 %v817_v36  ;;  %v819_v26 = vadd.f32 1e-05, %v811_v53 }
 0x21b   : > { %v818_v5 = vadd.f32 1e-05, %v810_v34  ;;  %v803_v12 = vpop.xlane.xlu0 %802 }
 0x21c   : > { %v800_v2 = vpop.xlane.xlu1 %799  ;;  %v813_v38 = vmul.f32 0.03125, %v803_v12 }
 0x21d   : > { %4186 = vrsqrt.f32 %v818_v5  ;;  %v812_v16 = vmul.f32 0.03125, %v800_v2 }
 0x21e   : > { %4188 = vrsqrt.f32 %v819_v26  ;;  %v4181_v51 = vpop.eup %4180  ;;  %v821_v17 = vadd.f32 1e-05, %v813_v38 }
 0x21f   : > { %v820_v8 = vadd.f32 1e-05, %v812_v16  ;;  %v831_v55 = vmul.f32 %v4181_v51, %v4979_v57 }
 0x220   : > { %v806_v32 = vpop.xlane.xlu1 %805 }
 0x221   : > { %4190 = vrsqrt.f32 %v820_v8  ;;  %v814_v24 = vmul.f32 0.03125, %v806_v32  ;;  %v845_v43 = vmul.f32 %v3617_v50, %v831_v55  ;;  %v3627_v8 = vld [vmem:[%s5572_s9] ss:$0 sm:$0xff] }
 0x222   : > { %4192 = vrsqrt.f32 %v821_v17 }
 0x223   : > { %v4183_v25 = vpop.eup %4182  ;;  %v822_v62 = vadd.f32 1e-05, %v814_v24  ;;  %v859_v49 = vadd.f32 %v3618_v11, %v845_v43 }
 0x224   : > { %v4185_v63 = vpop.eup %4184  ;;  %v832_v56 = vmul.f32 %v4183_v25, %v4990_v0 }
 0x225   : > { %4194 = vrsqrt.f32 %v822_v62  ;;  %v833_v57 = vmul.f32 %v4185_v63, %v4993_v35 }
 0x226   : > { %v846_v60 = vmul.f32 %v3617_v50, %v832_v56 }
 0x227   : > { %v4187_v54 = vpop.eup %4186  ;;  %v847_v30 = vmul.f32 %v3617_v50, %v833_v57 }
 0x228   : > { %v4189_v7 = vpop.eup %4188  ;;  %v834_v4 = vmul.f32 %v4187_v54, %v5007_v52  ;;  %v860_v39 = vadd.f32 %v3618_v11, %v846_v60  ;;  %v4108_v52 = vld [vmem:[%s5571_s8] sm:$0xff]  }
 0x229   : > { %v835_v1 = vmul.f32 %v4189_v7, %v5010_v14  ;;  %v861_v28 = vadd.f32 %v3618_v11, %v847_v30  ;;  %v4110_v30 = vld [vmem:[%s5575_s12] sm:$0xff]  }
 0x22a   : > { %v867_v10 = vpack.c.bf16 %v860_v39, %v859_v49  ;;  %v848_v0 = vmul.f32 %v3617_v50, %v834_v4 }
 0x22b   : > { %v4191_v3 = vpop.eup %4190  ;;  %v849_v13 = vmul.f32 %v3617_v50, %v835_v1  ;;  %v4111_v1 = vld [vmem:[%s5575_s12 + $0x8] sm:$0xff]  }
 0x22c   : > { %v4193_v6 = vpop.eup %4192  ;;  %v836_v19 = vmul.f32 %v4191_v3, %v5025_v40  ;;  %3865 = vmatprep.mubr.msk.bf16.mxu0 %vm733_vm0, %v867_v10  ;;  %v862_v35 = vadd.f32 %v3618_v11, %v848_v0 }
 0x22d   : > { %v837_v44 = vmul.f32 %v4193_v6, %v5028_v41  ;;  %v863_v21 = vadd.f32 %v3618_v11, %v849_v13  ;;  %v3631_v13 = vld [vmem:[%s5573_s10] ss:$0 sm:$0xff] }
 0x22e   : > { %v868_v58 = vpack.c.bf16 %v862_v35, %v861_v28  ;;  %v850_v31 = vmul.f32 %v3617_v50, %v836_v19 }
 0x22f   : > { %v4195_v14 = vpop.eup %4194  ;;  %v851_v29 = vmul.f32 %v3617_v50, %v837_v44 }
 0x230   : > { %v838_v9 = vmul.f32 %v4195_v14, %v5043_v18  ;;  %3866 = vmatmul.mubr.msk.bf16.vlgmr.msra.gmra.mrb[0].mxu0 %vm733_vm0, %v868_v58  ;;  %v864_v40 = vadd.f32 %v3618_v11, %v850_v31  ;;  %v3632_v58 = vld [vmem:[%s5574_s11] ss:$0 sm:$0xff] }
 0x231   : > { %3874 = vmatpush3.bf16.msra.mxu0 %v4108_v52  ;;  %v865_v15 = vadd.f32 %v3618_v11, %v851_v29 }
 0x232   : > { %v869_v41 = vpack.c.bf16 %v864_v40, %v863_v21  ;;  %v852_v27 = vmul.f32 %v3617_v50, %v838_v9  ;;  %3875 = vmatprep.subr.bf16.mxu0 %v4364_v33 }
 0x234   : > { %3869 = vmatprep.mubr.msk.bf16.mxu0 %vm733_vm0, %v869_v41  ;;  %v866_v48 = vadd.f32 %v3618_v11, %v852_v27 }
 0x235   : > { %3876 = vmatpush3.bf16.msra.mxu0 %v4109_v61 }
 0x236   : > { %v870_v18 = vpack.c.bf16 %v866_v48, %v865_v15  ;;  %3881 = vmatprep.subr.bf16.mxu0 %v4364_v33 }
 0x238   : > { %3870 = vmatmul.mubr.msk.bf16.gmra.mrb[4].mxu0 %vm733_vm0, %v870_v18 }
 0x239   : > { %3877 = vmatprep.mubr.msk.bf16.mxu0 %vm4365_vm1, %v4364_v33 }
 0x269   : > { %v3780_v46 = vpop.f32.mrb[0].mxu1 }
 0x26a   : > { %v3781_v22 = vpop.f32.mrb[1].mxu1 }
 0x26b   : > { %v3782_v42 = vadd.f32 %v3781_v22, %v3780_v46 }
 0x26d   : > { %v3783_v47 = vpop.f32.mrb[2].mxu1 }
 0x26e   : > { %v3784_v45 = vpop.f32.mrb[3].mxu1 }
 0x26f   : > { %v3785_v23 = vadd.f32 %v3784_v45, %v3783_v47 }
 0x271   : > { %v1537_v20 = vpack.c.bf16 %v3785_v23, %v3782_v42 }
 0x273   : > { %3878 = vmatmul.mubr.msk.bf16.vlgmr.msra.gmra.mrb[8].mxu0 %vm733_vm0, %v1537_v20 }
 0x274   : > { %3885 = vmatprep.mubr.msk.bf16.mxu0 %vm4365_vm1, %v4364_v33  ;;  %3882 = vmatpush3.bf16.msra.mxu0 %v4110_v30 }
 0x275   : > { %3883 = vmatprep.subr.bf16.mxu0 %v4364_v33 }
 0x278   : > { %3884 = vmatpush3.bf16.msra.mxu0 %v4111_v1 }
 0x279   : > { %3889 = vmatprep.subr.bf16.mxu0 %v4364_v33 }
 0x303   : > { %v3867_v36 = vpop.f32.mrb[0].mxu0 }
 0x304   : > { %v933_v59 = vpop.f32.mrb[1].mxu0 }
 0x305   : > { %v3868_v37 = vpop.f32.mrb[2].mxu0 }
 0x306   : > { %v5099_v34 = vpack.c.bf16 %v3868_v37, %v3867_v36  ;;  %v936_v53 = vpop.f32.mrb[3].mxu0 }
 0x307   : > { %v5101_v5 = vpack.c.bf16 %v936_v53, %v933_v59 }
 0x309   : > { %3899 = vmatprep.mubr.msk.bf16.mxu1 %vm1795_vm2, %v5101_v5 }
 0x30b   : > { %v3871_v26 = vpop.f32.mrb[4].mxu0 }
 0x30c   : > { %v949_v2 = vpop.f32.mrb[5].mxu0 }
 0x30d   : > { %v3872_v12 = vpop.f32.mrb[6].mxu0 }
 0x30e   : > { %v5105_v16 = vpack.c.bf16 %v3872_v12, %v3871_v26  ;;  %v952_v38 = vpop.f32.mrb[7].mxu0  ;;  %v4112_v26 = vld [vmem:[%s5576_s13] sm:$0xff]   ;;  %v4113_v12 = vld [vmem:[%s5576_s13 + $0x8] sm:$0xff]  }
 0x30f   : > { %v5107_v51 = vpack.c.bf16 %v952_v38, %v949_v2 }
 0x346   : > { %v1598_v17 = vpop.f32.mrb[8].mxu0 }
 0x347   : > { %v1599_v32 = vadd.f32 %v3627_v8, %v1598_v17  ;;  %v3879_v55 = vpop.f32.mrb[9].mxu0 }
 0x348   : > { %v1601_v24 = vpop.f32.mrb[10].mxu0 }
 0x349   : > { %v1602_v50 = vadd.f32 %v3627_v8, %v1601_v24  ;;  %v3880_v25 = vpop.f32.mrb[11].mxu0  ;;  %v1607_v62 = vsel %vm733_vm0, %v1599_v32, 0.0 }
 0x34a   : > { %1608 = vadd.xlane.f32.xlu0 %v1607_v62 }
 0x34b   : > { %v1610_v63 = vsel %vm733_vm0, %v1602_v50, 0.0 }
 0x34c   : > { %1611 = vadd.xlane.f32.xlu1 %v1610_v63 }
 0x3d7   : > { %v1609_v56 = vpop.xlane.xlu0 %1608 }
 0x3d8   : > { %v1613_v43 = vmul.f32 0.03125, %v1609_v56 }
 0x3d9   : > { %v1612_v11 = vpop.xlane.xlu1 %1611 }
 0x3da   : > { %v1615_v57 = vsub.f32 %v1599_v32, %v1613_v43  ;;  %v1614_v60 = vmul.f32 0.03125, %v1612_v11 }
 0x3dc   : > { %v1616_v54 = vsub.f32 %v1602_v50, %v1614_v60  ;;  %v1617_v7 = vmul.f32 %v1615_v57, %v1615_v57 }
 0x3de   : > { %v1619_v4 = vsel %vm733_vm0, %v1617_v7, 0.0  ;;  %v1618_v49 = vmul.f32 %v1616_v54, %v1616_v54 }
 0x3df   : > { %1620 = vadd.xlane.f32.xlu0 %v1619_v4 }
 0x3e0   : > { %v1622_v39 = vsel %vm733_vm0, %v1618_v49, 0.0 }
 0x3e1   : > { %1623 = vadd.xlane.f32.xlu1 %v1622_v39 }
 0x3f2   : > { %2055 = vrot.lane.b32.xlu1 %v5101_v5, %s4366_s5 }
 0x3f6   : > { %2057 = vrot.lane.b32.xlu1 %v5099_v34, %s4366_s5 }
 0x3fa   : > { %2059 = vrot.lane.b32.xlu1 %v5107_v51, %s4366_s5 }
 0x46c   : > { %v1621_v10 = vpop.xlane.xlu0 %1620 }
 0x46d   : > { %v1625_v0 = vmul.f32 0.03125, %v1621_v10 }
 0x46e   : > { %v1624_v3 = vpop.xlane.xlu1 %1623 }
 0x46f   : > { %v1627_v6 = vadd.f32 1e-05, %v1625_v0  ;;  %v1626_v19 = vmul.f32 0.03125, %v1624_v3 }
 0x471   : > { %4196 = vrsqrt.f32 %v1627_v6  ;;  %v1628_v28 = vadd.f32 1e-05, %v1626_v19 }
 0x472   : > { %v2056_v56 = vpop.permute.xlu1 %2055 }
 0x473   : > { %4198 = vrsqrt.f32 %v1628_v28 }
 0x47b   : > { %v4197_v35 = vpop.eup %4196 }
 0x47c   : > { %v1631_v44 = vmul.f32 %v4197_v35, %v1615_v57  ;;  %v2058_v57 = vpop.permute.xlu1 %2057 }
 0x47d   : > { %v4199_v52 = vpop.eup %4198 }
 0x47e   : > { %v1639_v31 = vmul.f32 %v3631_v13, %v1631_v44  ;;  %v1632_v14 = vmul.f32 %v4199_v52, %v1616_v54 }
 0x480   : > { %v1647_v9 = vadd.f32 %v3632_v58, %v1639_v31  ;;  %v1640_v21 = vmul.f32 %v3631_v13, %v1632_v14  ;;  %v2060_v60 = vpop.permute.xlu1 %2059 }
 0x482   : > { %v1648_v40 = vadd.f32 %v3632_v58, %v1640_v21  ;;  %v1651_v29 = vmul.f32 0.044715, %v1647_v9  ;;  %v1649_v20 = vmul.f32 0.5, %v1647_v9 }
 0x484   : > { %v1652_v61 = vmul.f32 0.044715, %v1648_v40  ;;  %v1653_v41 = vmul.f32 %v1651_v29, %v1647_v9  ;;  %v1650_v36 = vmul.f32 0.5, %v1648_v40 }
 0x486   : > { %v1654_v27 = vmul.f32 %v1652_v61, %v1648_v40  ;;  %v1655_v15 = vmul.f32 %v1653_v41, %v1647_v9 }
 0x488   : > { %v1656_v48 = vmul.f32 %v1654_v27, %v1648_v40  ;;  %v1657_v18 = vadd.f32 %v1655_v15, %v1647_v9 }
 0x48a   : > { %v1658_v46 = vadd.f32 %v1656_v48, %v1648_v40  ;;  %v1659_v22 = vmul.f32 0.7978846, %v1657_v18 }
 0x48c   : > { %v1660_v42 = vmul.f32 0.7978846, %v1658_v46  ;;  %4200 = vtanh.f32 %v1659_v22 }
 0x48e   : > { %4202 = vtanh.f32 %v1660_v42 }
 0x496   : > { %v4201_v47 = vpop.eup %4200 }
 0x497   : > { %v1663_v45 = vadd.f32 1.0, %v4201_v47 }
 0x498   : > { %v4203_v23 = vpop.eup %4202 }
 0x499   : > { %v1664_v59 = vadd.f32 1.0, %v4203_v23  ;;  %v1665_v37 = vmul.f32 %v1663_v45, %v1649_v20 }
 0x49b   : > { %v1666_v53 = vmul.f32 %v1664_v59, %v1650_v36 }
 0x49d   : > { %v1667_v2 = vpack.c.bf16 %v1666_v53, %v1665_v37 }
 0x49f   : > { %3886 = vmatmul.mubr.msk.bf16.vlgmr.msra.gmra.mrb[12].mxu0 %vm733_vm0, %v1667_v2 }
 0x4a0   : > { %3890 = vmatpush3.bf16.msra.mxu0 %v4112_v26  ;;  %3893 = vmatprep.mubr.msk.bf16.mxu0 %vm4365_vm1, %v4364_v33 }
 0x4a1   : > { %3891 = vmatprep.subr.bf16.mxu0 %v4364_v33 }
 0x4a4   : > { %3892 = vmatpush3.bf16.msra.mxu0 %v4113_v12 }
 0x4a7   : > { %3894 = vmatmul.mubr.msk.bf16.vlgmr.msra.gmra.mrb[16].mxu0 %vm733_vm0, %v1667_v2 }
 0x572   : > { %v1721_v38 = vpop.f32.mrb[12].mxu0 }
 0x573   : > { %v3887_v8 = vpop.f32.mrb[13].mxu0 }
 0x574   : > { %v1724_v17 = vpop.f32.mrb[14].mxu0 }
 0x575   : > { %v5147_v32 = vpack.c.bf16 %v1724_v17, %v1721_v38  ;;  %v3888_v55 = vpop.f32.mrb[15].mxu0 }
 0x577   : > { %2064 = vrot.lane.b32.xlu0 %v5147_v32, %s4366_s5  ;;  %4085 = vmatprep.subr.msk.bf16.mxu1 %vm1795_vm2, %v5147_v32  ;;  %v1809_v24 = vsel %vm1795_vm2, %v5147_v32, 0 }
 0x578   : > { %3898 = vmatpush3.bf16.xpose.msra.mxu1 %v1809_v24 }
 0x57a   : > { %v1778_v33 = vpop.f32.mrb[16].mxu0 }
 0x57b   : > { %2061 = vrot.lane.b32.xlu0 %v5105_v16, %s4366_s5  ;;  %v3895_v50 = vpop.f32.mrb[17].mxu0 }
 0x57c   : > { %v1781_v25 = vpop.f32.mrb[18].mxu0 }
 0x57d   : > { %v5157_v62 = vpack.c.bf16 %v1781_v25, %v1778_v33  ;;  %v3896_v63 = vpop.f32.mrb[19].mxu0 }
 0x57f   : > { %3900 = vmatmul.mubr.msk.bf16.vlgmr.msra.gmra.mrb[4].mxu1 %vm1795_vm2, %v5099_v34  ;;  %3907 = vmatprep.subr.bf16.mxu0 %v5157_v62 }
 0x580   : > { %3903 = vmatprep.mubr.msk.bf16.mxu1 %vm1795_vm2, %v5107_v51  ;;  %3908 = vmatpush3.bf16.msra.mxu0 %v5157_v62 }
 0x587   : > { %3904 = vmatmul.mubr.msk.bf16.gmra.mrb[8].mxu1 %vm1795_vm2, %v5105_v16 }
 0x588   : > { %3919 = vmatprep.mubr.msk.bf16.mxu1 %vm1795_vm2, %v2056_v56 }
 0x5e9   : > { %v2065_v43 = vpop.permute.xlu0 %2064 }
 0x5ea   : > { %4086 = vmatprep.subr.msk.bf16.mxu1 %vm1795_vm2, %v2065_v43  ;;  %v2079_v11 = vsel %vm1795_vm2, %v2065_v43, 0 }
 0x5eb   : > { %3918 = vmatpush3.bf16.xpose.msra.mxu1 %v2079_v11 }
 0x5ed   : > { %v2062_v54 = vpop.permute.xlu0 %2061 }
 0x5f2   : > { %3920 = vmatmul.mubr.msk.bf16.vlgmr.msra.gmra.mrb[12].mxu1 %vm1795_vm2, %v2058_v57 }
 0x5f3   : > { %3923 = vmatprep.mubr.msk.bf16.mxu1 %vm1795_vm2, %v2060_v60 }
 0x5fa   : > { %3924 = vmatmul.mubr.msk.bf16.gmra.mrb[16].mxu1 %vm1795_vm2, %v2062_v54 }
 0x652   : > { %v5173_v7 = vpop.f32.mrb[4].mxu1 }
 0x653   : > { %v5175_v4 = vpop.f32.mrb[5].mxu1  ;;  %v1883_v49 = vsel %vm1876_vm3, %v5173_v7, -inf }
 0x654   : > { %1884 = vmax.xlane.f32.xlu0 %v1883_v49  ;;  %v3902_v39 = vpop.f32.mrb[6].mxu1  ;;  %v1877_v30 = vsel %vm1876_vm3, %v5175_v4, -inf }
 0x655   : > { %1878 = vmax.xlane.f32.xlu1 %v1877_v30  ;;  %v1848_v1 = vpop.f32.mrb[7].mxu1  ;;  %v1886_v6 = vsel %vm1876_vm3, %v3902_v39, -inf }
 0x656   : > { %v1880_v10 = vsel %vm1876_vm3, %v1848_v1, -inf }
 0x658   : > { %1881 = vmax.xlane.f32.xlu0 %v1880_v10 }
 0x65a   : > { %v5182_v0 = vpop.f32.mrb[8].mxu1 }
 0x65b   : > { %v5184_v3 = vpop.f32.mrb[9].mxu1  ;;  %v1895_v44 = vsel %vm1876_vm3, %v5182_v0, -inf }
 0x65c   : > { %1887 = vmax.xlane.f32.xlu0 %v1886_v6  ;;  %v3906_v19 = vpop.f32.mrb[10].mxu1  ;;  %v1889_v28 = vsel %vm1876_vm3, %v5184_v3, -inf }
 0x65d   : > { %1890 = vmax.xlane.f32.xlu1 %v1889_v28  ;;  %v1864_v35 = vpop.f32.mrb[11].mxu1  ;;  %v1898_v52 = vsel %vm1876_vm3, %v3906_v19, -inf }
 0x65e   : > { %v1892_v13 = vsel %vm1876_vm3, %v1864_v35, -inf }
 0x660   : > { %1893 = vmax.xlane.f32.xlu0 %v1892_v13 }
 0x661   : > { %1896 = vmax.xlane.f32.xlu1 %v1895_v44 }
 0x664   : > { %1899 = vmax.xlane.f32.xlu0 %v1898_v52 }
 0x6c5   : > { %v5193_v58 = vpop.f32.mrb[12].mxu1 }
 0x6c6   : > { %v5195_v31 = vpop.f32.mrb[13].mxu1  ;;  %v2152_v29 = vsel %vm1876_vm3, %v5193_v58, -inf }
 0x6c7   : > { %v5197_v14 = vpop.f32.mrb[14].mxu1  ;;  %v2146_v9 = vsel %vm1876_vm3, %v5195_v31, -inf }
 0x6c8   : > { %2147 = vmax.xlane.f32.xlu1 %v2146_v9  ;;  %v5201_v21 = vpop.f32.mrb[15].mxu1  ;;  %v2155_v41 = vsel %vm1876_vm3, %v5197_v14, -inf }
 0x6c9   : > { %v2149_v40 = vsel %vm1876_vm3, %v5201_v21, -inf }
 0x6ca   : > { %2150 = vmax.xlane.f32.xlu0 %v2149_v40 }
 0x6cc   : > { %2153 = vmax.xlane.f32.xlu1 %v2152_v29 }
 0x6cd   : > { %v5207_v61 = vpop.f32.mrb[16].mxu1 }
 0x6ce   : > { %v5211_v27 = vpop.f32.mrb[17].mxu1  ;;  %2156 = vmax.xlane.f32.xlu0 %v2155_v41  ;;  %v2164_v22 = vsel %vm1876_vm3, %v5207_v61, -inf }
 0x6cf   : > { %v5213_v15 = vpop.f32.mrb[18].mxu1  ;;  %v2158_v48 = vsel %vm1876_vm3, %v5211_v27, -inf }
 0x6d0   : > { %2159 = vmax.xlane.f32.xlu1 %v2158_v48  ;;  %v5217_v18 = vpop.f32.mrb[19].mxu1  ;;  %v2167_v42 = vsel %vm1876_vm3, %v5213_v15, -inf }
 0x6d1   : > { %v2161_v46 = vsel %vm1876_vm3, %v5217_v18, -inf }
 0x6d2   : > { %2162 = vmax.xlane.f32.xlu0 %v2161_v46 }
 0x6d4   : > { %2165 = vmax.xlane.f32.xlu1 %v2164_v22 }
 0x6d6   : > { %2168 = vmax.xlane.f32.xlu0 %v2167_v42 }
 0x6e1   : > { %v1885_v47 = vpop.xlane.xlu0 %1884 }
 0x6e2   : > { %v1879_v26 = vpop.xlane.xlu1 %1878  ;;  %v1903_v17 = vsub.f32 %v5173_v7, %v1885_v47 }
 0x6e3   : > { %v1901_v50 = vsub.f32 %v5175_v4, %v1879_v26 }
 0x6e4   : > { %v1913_v33 = vmul.f32 1.442695, %v1903_v17 }
 0x6e5   : > { %v1882_v45 = vpop.xlane.xlu0 %1881  ;;  %2239 = vrot.lane.b32.xlu1 %v5157_v62, %s4366_s5  ;;  %v1909_v11 = vmul.f32 1.442695, %v1901_v50  ;;  %s4367_s5 = smov 112  }
 0x6e6   : > { %v1902_v23 = vsub.f32 %v1848_v1, %v1882_v45 }
 0x6e8   : > { %v1911_v59 = vmul.f32 1.442695, %v1902_v23 }
 0x6e9   : > { %v1888_v20 = vpop.xlane.xlu0 %1887 }
 0x6ea   : > { %v1904_v36 = vsub.f32 %v3902_v39, %v1888_v20  ;;  %v1891_v38 = vpop.xlane.xlu1 %1890 }
 0x6eb   : > { %v1905_v54 = vsub.f32 %v5184_v3, %v1891_v38 }
 0x6ec   : > { %v1915_v37 = vmul.f32 1.442695, %v1904_v36 }
 0x6ed   : > { %v1894_v53 = vpop.xlane.xlu0 %1893  ;;  %v1917_v30 = vmul.f32 1.442695, %v1905_v54 }
 0x6ee   : > { %4204 = vpow2.f32 %v1915_v37  ;;  %v1906_v2 = vsub.f32 %v1864_v35, %v1894_v53  ;;  %v1897_v63 = vpop.xlane.xlu1 %1896 }
 0x6ef   : > { %4206 = vpow2.f32 %v1911_v59  ;;  %v1907_v57 = vsub.f32 %v5182_v0, %v1897_v63 }
 0x6f0   : > { %v1919_v55 = vmul.f32 1.442695, %v1906_v2 }
 0x6f1   : > { %v1900_v12 = vpop.xlane.xlu0 %1899  ;;  %v1921_v7 = vmul.f32 1.442695, %v1907_v57 }
 0x6f2   : > { %v1908_v8 = vsub.f32 %v3906_v19, %v1900_v12 }
 0x6f4   : > { %v1923_v24 = vmul.f32 1.442695, %v1908_v8 }
 0x6f6   : > { %4208 = vpow2.f32 %v1923_v24 }
 0x6f7   : > { %4210 = vpow2.f32 %v1919_v55 }
 0x6f8   : > { %v5229_v25 = vpop.eup %4204  ;;  %4212 = vpow2.f32 %v1913_v33 }
 0x6f9   : > { %v1934_v56 = vsel %vm1876_vm3, %v5229_v25, 0.0  ;;  %v5233_v43 = vpop.eup %4206  ;;  %4214 = vpow2.f32 %v1909_v11 }
 0x6fa   : > { %1935 = vadd.xlane.f32.xlu0 %v1934_v56  ;;  %v1928_v60 = vsel %vm1876_vm3, %v5233_v43, 0.0  ;;  %4216 = vpow2.f32 %v1921_v7 }
 0x6fb   : > { %4218 = vpow2.f32 %v1917_v30 }
 0x6fe   : > { %1929 = vadd.xlane.f32.xlu0 %v1928_v60 }
 0x700   : > { %v5239_v4 = vpop.eup %4208 }
 0x701   : > { %v1946_v49 = vsel %vm1876_vm3, %v5239_v4, 0.0  ;;  %v5243_v39 = vpop.eup %4210 }
 0x702   : > { %1947 = vadd.xlane.f32.xlu0 %v1946_v49  ;;  %v5245_v1 = vpop.eup %4212  ;;  %v1940_v10 = vsel %vm1876_vm3, %v5243_v39, 0.0 }
 0x703   : > { %v1931_v0 = vsel %vm1876_vm3, %v5245_v1, 0.0  ;;  %v5251_v3 = vpop.eup %4214 }
 0x704   : > { %v1925_v6 = vsel %vm1876_vm3, %v5251_v3, 0.0  ;;  %v5255_v19 = vpop.eup %4216 }
 0x705   : > { %v1943_v28 = vsel %vm1876_vm3, %v5255_v19, 0.0  ;;  %v5259_v35 = vpop.eup %4218 }
 0x706   : > { %1941 = vadd.xlane.f32.xlu0 %v1940_v10  ;;  %v1937_v13 = vsel %vm1876_vm3, %v5259_v35, 0.0 }
 0x709   : > { %1932 = vadd.xlane.f32.xlu1 %v1931_v0 }
 0x70d   : > { %1926 = vadd.xlane.f32.xlu1 %v1925_v6 }
 0x711   : > { %1944 = vadd.xlane.f32.xlu1 %v1943_v28 }
 0x715   : > { %1938 = vadd.xlane.f32.xlu1 %v1937_v13 }
 0x755   : > { %v2148_v44 = vpop.xlane.xlu1 %2147 }
 0x756   : > { %v2170_v52 = vsub.f32 %v5195_v31, %v2148_v44 }
 0x757   : > { %v2151_v9 = vpop.xlane.xlu0 %2150 }
 0x758   : > { %v2171_v29 = vsub.f32 %v5201_v21, %v2151_v9  ;;  %v2178_v48 = vmul.f32 1.442695, %v2170_v52 }
 0x759   : > { %v2154_v40 = vpop.xlane.xlu1 %2153 }
 0x75a   : > { %v2172_v41 = vsub.f32 %v5193_v58, %v2154_v40  ;;  %v2180_v45 = vmul.f32 1.442695, %v2171_v29 }
 0x75b   : > { %v2157_v46 = vpop.xlane.xlu0 %2156 }
 0x75c   : > { %v2182_v22 = vmul.f32 1.442695, %v2172_v41  ;;  %v2173_v42 = vsub.f32 %v5197_v14, %v2157_v46 }
 0x75d   : > { %v2160_v47 = vpop.xlane.xlu1 %2159 }
 0x75e   : > { %4220 = vpow2.f32 %v2182_v22  ;;  %v2184_v23 = vmul.f32 1.442695, %v2173_v42  ;;  %v2174_v20 = vsub.f32 %v5211_v27, %v2160_v47 }
 0x75f   : > { %4222 = vpow2.f32 %v2178_v48  ;;  %v2163_v36 = vpop.xlane.xlu0 %2162 }
 0x760   : > { %4224 = vpow2.f32 %v2184_v23  ;;  %v2175_v21 = vsub.f32 %v5217_v18, %v2163_v36  ;;  %v2186_v59 = vmul.f32 1.442695, %v2174_v20 }
 0x761   : > { %v2166_v31 = vpop.xlane.xlu1 %2165  ;;  %4226 = vpow2.f32 %v2180_v45 }
 0x762   : > { %v2176_v58 = vsub.f32 %v5207_v61, %v2166_v31  ;;  %v2188_v2 = vmul.f32 1.442695, %v2175_v21 }
 0x763   : > { %v2169_v37 = vpop.xlane.xlu0 %2168 }
 0x764   : > { %v2190_v53 = vmul.f32 1.442695, %v2176_v58  ;;  %v2177_v14 = vsub.f32 %v5213_v15, %v2169_v37 }
 0x765   : > { %v5271_v26 = vpop.permute.xlu1 %2239 }
 0x766   : > { %4228 = vpow2.f32 %v2190_v53  ;;  %v2192_v12 = vmul.f32 1.442695, %v2177_v14  ;;  %3927 = vmatprep.subr.bf16.mxu0 %v5271_v26 }
 0x767   : > { %4230 = vpow2.f32 %v2186_v59 }
 0x768   : > { %v5274_v27 = vpop.eup %4220  ;;  %4232 = vpow2.f32 %v2192_v12 }
 0x769   : > { %v5276_v38 = vpop.eup %4222  ;;  %v2200_v61 = vsel %vm1876_vm3, %v5274_v27, 0.0  ;;  %4234 = vpow2.f32 %v2188_v2 }
 0x76a   : > { %v5280_v18 = vpop.eup %4224  ;;  %2201 = vadd.xlane.f32.xlu1 %v2200_v61  ;;  %v2194_v17 = vsel %vm1876_vm3, %v5276_v38, 0.0 }
 0x76b   : > { %v2203_v15 = vsel %vm1876_vm3, %v5280_v18, 0.0  ;;  %v5284_v8 = vpop.eup %4226 }
 0x76c   : > { %2204 = vadd.xlane.f32.xlu0 %v2203_v15  ;;  %v2197_v55 = vsel %vm1876_vm3, %v5284_v8, 0.0 }
 0x76e   : > { %2195 = vadd.xlane.f32.xlu1 %v2194_v17 }
 0x770   : > { %v5290_v24 = vpop.eup %4228  ;;  %2198 = vadd.xlane.f32.xlu0 %v2197_v55 }
 0x771   : > { %v5292_v33 = vpop.eup %4230  ;;  %v2212_v50 = vsel %vm1876_vm3, %v5290_v24, 0.0 }
 0x772   : > { %v5296_v63 = vpop.eup %4232  ;;  %2213 = vadd.xlane.f32.xlu1 %v2212_v50  ;;  %v2206_v57 = vsel %vm1876_vm3, %v5292_v33, 0.0 }
 0x773   : > { %v2215_v56 = vsel %vm1876_vm3, %v5296_v63, 0.0  ;;  %v5300_v11 = vpop.eup %4234 }
 0x774   : > { %2216 = vadd.xlane.f32.xlu0 %v2215_v56  ;;  %v2209_v60 = vsel %vm1876_vm3, %v5300_v11, 0.0 }
 0x776   : > { %2207 = vadd.xlane.f32.xlu1 %v2206_v57 }
 0x778   : > { %2210 = vadd.xlane.f32.xlu0 %v2209_v60 }
 0x787   : > { %2485 = vrot.lane.b32.xlu1 %v5101_v5, %s4367_s5  ;;  %v1936_v54 = vpop.xlane.xlu0 %1935 }
 0x78b   : > { %2487 = vrot.lane.b32.xlu1 %v5099_v34, %s4367_s5  ;;  %v1930_v7 = vpop.xlane.xlu0 %1929 }
 0x78e   : > { %2493 = vrot.lane.b32.xlu0 %v5147_v32, %s4367_s5 }
 0x78f   : > { %2489 = vrot.lane.b32.xlu1 %v5107_v51, %s4367_s5  ;;  %v1948_v30 = vpop.xlane.xlu0 %1947 }
 0x792   : > { %2491 = vrot.lane.b32.xlu0 %v5105_v16, %s4367_s5 }
 0x793   : > { %v1942_v0 = vpop.xlane.xlu0 %1941 }
 0x796   : > { %v1933_v49 = vpop.xlane.xlu1 %1932 }
 0x797   : > { %4236 = vrcp.f32 %v1933_v49 }
 0x798   : > { %4238 = vrcp.f32 %v1930_v7 }
 0x799   : > { %4240 = vrcp.f32 %v1936_v54 }
 0x79a   : > { %v1927_v10 = vpop.xlane.xlu1 %1926 }
 0x79b   : > { %4242 = vrcp.f32 %v1927_v10 }
 0x79e   : > { %v1945_v6 = vpop.xlane.xlu1 %1944 }
 0x79f   : > { %4244 = vrcp.f32 %v1945_v6 }
 0x7a0   : > { %4246 = vrcp.f32 %v1942_v0 }
 0x7a1   : > { %v4237_v28 = vpop.eup %4236  ;;  %4248 = vrcp.f32 %v1948_v30 }
 0x7a2   : > { %v1939_v13 = vpop.xlane.xlu1 %1938  ;;  %v4239_v44 = vpop.eup %4238  ;;  %v1959_v40 = vmul.f32 %v4237_v28, %v5245_v1  ;;  %v1785_v28 = vld [vmem:[%s5577_s14] sm:$0xff] }
 0x7a3   : > { %4250 = vrcp.f32 %v1939_v13  ;;  %v4241_v52 = vpop.eup %4240  ;;  %v1958_v41 = vmul.f32 %v4239_v44, %v5233_v43  ;;  %v2050_v13 = vpack.c.bf16 %v1785_v28, %v1785_v28 }
 0x7a4   : > { %v1960_v48 = vmul.f32 %v4241_v52, %v5229_v25 }
 0x7a5   : > { %v4243_v9 = vpop.eup %4242 }
 0x7a6   : > { %v1957_v29 = vmul.f32 %v4243_v9, %v5251_v3  ;;  %v1966_v22 = vpack.c.bf16 %v1960_v48, %v1959_v40 }
 0x7a8   : > { %v1965_v46 = vpack.c.bf16 %v1958_v41, %v1957_v29 }
 0x7a9   : > { %v4245_v42 = vpop.eup %4244 }
 0x7aa   : > { %3909 = vmatprep.mubr.msk.bf16.mxu0 %vm1876_vm3, %v1965_v46  ;;  %v4247_v47 = vpop.eup %4246  ;;  %v1963_v1 = vmul.f32 %v4245_v42, %v5255_v19 }
 0x7ab   : > { %3910 = vmatmul.mubr.msk.bf16.vlgmr.msra.gmra.mrb[20].mxu0 %vm1876_vm3, %v1966_v22  ;;  %v4249_v45 = vpop.eup %4248  ;;  %v1962_v43 = vmul.f32 %v4247_v47, %v5243_v39 }
 0x7ac   : > { %3928 = vmatpush3.bf16.msra.mxu0 %v5271_v26  ;;  %v1964_v25 = vmul.f32 %v4249_v45, %v5239_v4 }
 0x7ad   : > { %v4251_v23 = vpop.eup %4250 }
 0x7ae   : > { %v1961_v3 = vmul.f32 %v4251_v23, %v5259_v35  ;;  %v1968_v36 = vpack.c.bf16 %v1964_v25, %v1963_v1 }
 0x7b0   : > { %v1967_v20 = vpack.c.bf16 %v1962_v43, %v1961_v3 }
 0x7b2   : > { %3913 = vmatprep.mubr.msk.bf16.mxu0 %vm1876_vm3, %v1967_v20 }
 0x7b3   : > { %3914 = vmatmul.mubr.msk.bf16.gmra.mrb[24].mxu0 %vm1876_vm3, %v1968_v36  ;;  %v2418_v36 = vsel %vm2336_vm4, %v2050_v13, 0 }
 0x7f7   : > { %v2202_v31 = vpop.xlane.xlu1 %2201 }
 0x7f9   : > { %v2205_v21 = vpop.xlane.xlu0 %2204 }
 0x7fa   : > { %4252 = vrcp.f32 %v2205_v21 }
 0x7fb   : > { %v2196_v58 = vpop.xlane.xlu1 %2195 }
 0x7fc   : > { %4254 = vrcp.f32 %v2196_v58 }
 0x7fd   : > { %4256 = vrcp.f32 %v2202_v31  ;;  %v2199_v59 = vpop.xlane.xlu0 %2198 }
 0x7fe   : > { %4258 = vrcp.f32 %v2199_v59 }
 0x7ff   : > { %v2214_v19 = vpop.xlane.xlu1 %2213 }
 0x801   : > { %v2217_v35 = vpop.xlane.xlu0 %2216 }
 0x802   : > { %4260 = vrcp.f32 %v2217_v35 }
 0x803   : > { %v2208_v39 = vpop.xlane.xlu1 %2207 }
 0x804   : > { %4262 = vrcp.f32 %v2208_v39  ;;  %v4253_v4 = vpop.eup %4252 }
 0x805   : > { %4264 = vrcp.f32 %v2214_v19  ;;  %v2211_v37 = vpop.xlane.xlu0 %2210  ;;  %v2229_v2 = vmul.f32 %v4253_v4, %v5280_v18 }
 0x806   : > { %v4255_v53 = vpop.eup %4254  ;;  %4266 = vrcp.f32 %v2211_v37 }
 0x807   : > { %v4257_v14 = vpop.eup %4256  ;;  %v2226_v61 = vmul.f32 %v4255_v53, %v5276_v38  ;;  %v2486_v7 = vpop.permute.xlu1 %2485 }
 0x808   : > { %v4259_v26 = vpop.eup %4258  ;;  %v2228_v17 = vmul.f32 %v4257_v14, %v5274_v27 }
 0x809   : > { %v2494_v12 = vpop.permute.xlu0 %2493  ;;  %v2227_v15 = vmul.f32 %v4259_v26, %v5284_v8 }
 0x80a   : > { %4089 = vmatprep.subr.msk.bf16.mxu0 %vm1795_vm2, %v2494_v12  ;;  %v2235_v50 = vpack.c.bf16 %v2229_v2, %v2228_v17  ;;  %v2508_v60 = vsel %vm1795_vm2, %v2494_v12, 0 }
 0x80b   : > { %v2234_v55 = vpack.c.bf16 %v2227_v15, %v2226_v61  ;;  %v2488_v0 = vpop.permute.xlu1 %2487 }
 0x80c   : > { %v4261_v56 = vpop.eup %4260 }
 0x80d   : > { %3929 = vmatprep.mubr.msk.bf16.mxu0 %vm1876_vm3, %v2234_v55  ;;  %v2233_v38 = vmul.f32 %v4261_v56, %v5296_v63 }
 0x80e   : > { %v4263_v57 = vpop.eup %4262  ;;  %3930 = vmatmul.mubr.msk.bf16.vlgmr.msra.gmra.mrb[28].mxu0 %vm1876_vm3, %v2235_v50 }
 0x80f   : > { %v4265_v18 = vpop.eup %4264  ;;  %3958 = vmatpush3.bf16.xpose.msra.mxu0 %v2508_v60  ;;  %v2230_v8 = vmul.f32 %v4263_v57, %v5292_v33  ;;  %v2490_v6 = vpop.permute.xlu1 %2489 }
 0x810   : > { %v4267_v54 = vpop.eup %4266  ;;  %v2232_v49 = vmul.f32 %v4265_v18, %v5290_v24  ;;  %v2492_v33 = vpop.permute.xlu0 %2491  ;;  %v1786_v24 = vld [vmem:[%s5577_s14 + $0x8] sm:$0xff] }
 0x811   : > { %v2231_v27 = vmul.f32 %v4267_v54, %v5300_v11  ;;  %v2323_v63 = vpack.c.bf16 %v1786_v24, %v1786_v24 }
 0x812   : > { %v2237_v10 = vpack.c.bf16 %v2233_v38, %v2232_v49 }
 0x813   : > { %v2236_v30 = vpack.c.bf16 %v2231_v27, %v2230_v8  ;;  %4087 = vmatprep.subr.msk.bf16.mxu1 %vm2336_vm4, %v2323_v63  ;;  %v2338_v11 = vsel %vm2336_vm4, %v2323_v63, 0 }
 0x814   : > { %3938 = vmatpush3.bf16.msra.mxu1 %v2338_v11 }
 0x815   : > { %3933 = vmatprep.mubr.msk.bf16.mxu0 %vm1876_vm3, %v2236_v30  ;;  %4088 = vmatprep.subr.msk.bf16.mxu1 %vm2336_vm4, %v2050_v13 }
 0x816   : > { %3934 = vmatmul.mubr.msk.bf16.gmra.mrb[32].mxu0 %vm1876_vm3, %v2237_v10 }
 0x817   : > { %3959 = vmatprep.mubr.msk.bf16.mxu0 %vm1795_vm2, %v2486_v7 }
 0x81e   : > { %3960 = vmatmul.mubr.msk.bf16.vlgmr.msra.gmra.mrb[36].mxu0 %vm1795_vm2, %v2488_v0 }
 0x81f   : > { %3963 = vmatprep.mubr.msk.bf16.mxu0 %vm1795_vm2, %v2490_v6 }
 0x826   : > { %3964 = vmatmul.mubr.msk.bf16.gmra.mrb[40].mxu0 %vm1795_vm2, %v2492_v33 }
 0x87e   : > { %v3911_v44 = vpop.f32.mrb[20].mxu0 }
 0x87f   : > { %v2015_v52 = vpop.f32.mrb[21].mxu0 }
 0x880   : > { %v3912_v9 = vpop.f32.mrb[22].mxu0 }
 0x881   : > { %v2047_v40 = vpack.c.bf16 %v3912_v9, %v3911_v44  ;;  %v2018_v29 = vpop.f32.mrb[23].mxu0 }
 0x882   : > { %v2046_v41 = vpack.c.bf16 %v2018_v29, %v2015_v52 }
 0x886   : > { %v3915_v48 = vpop.f32.mrb[24].mxu0 }
 0x887   : > { %v2031_v46 = vpop.f32.mrb[25].mxu0 }
 0x888   : > { %v3916_v22 = vpop.f32.mrb[26].mxu0 }
 0x889   : > { %v2049_v42 = vpack.c.bf16 %v3916_v22, %v3915_v48  ;;  %v2034_v47 = vpop.f32.mrb[27].mxu0 }
 0x88a   : > { %v2048_v45 = vpack.c.bf16 %v2034_v47, %v2031_v46 }
 0x8e1   : > { %v3931_v23 = vpop.f32.mrb[28].mxu0 }
 0x8e2   : > { %v2288_v1 = vpop.f32.mrb[29].mxu0 }
 0x8e3   : > { %v3932_v3 = vpop.f32.mrb[30].mxu0 }
 0x8e4   : > { %v2320_v43 = vpack.c.bf16 %v3932_v3, %v3931_v23  ;;  %v2291_v25 = vpop.f32.mrb[31].mxu0 }
 0x8e5   : > { %v2319_v20 = vpack.c.bf16 %v2291_v25, %v2288_v1 }
 0x8e7   : > { %3939 = vmatprep.mubr.msk.bf16.mxu1 %vm1795_vm2, %v2319_v20 }
 0x8e8   : > { %3940 = vmatmul.mubr.msk.bf16.vlgmr.msra.gmra.mrb[20].mxu1 %vm1795_vm2, %v2320_v43 }
 0x8e9   : > { %v3935_v31 = vpop.f32.mrb[32].mxu0  ;;  %3948 = vmatpush3.bf16.msra.mxu1 %v2418_v36 }
 0x8ea   : > { %v2304_v21 = vpop.f32.mrb[33].mxu0 }
 0x8eb   : > { %v3936_v58 = vpop.f32.mrb[34].mxu0 }
 0x8ec   : > { %v2322_v59 = vpack.c.bf16 %v3936_v58, %v3935_v31  ;;  %v2307_v19 = vpop.f32.mrb[35].mxu0 }
 0x8ed   : > { %v2321_v35 = vpack.c.bf16 %v2307_v19, %v2304_v21 }
 0x8ef   : > { %3943 = vmatprep.mubr.msk.bf16.mxu1 %vm1795_vm2, %v2321_v35 }
 0x8f0   : > { %3944 = vmatmul.mubr.msk.bf16.gmra.mrb[24].mxu1 %vm1795_vm2, %v2322_v59 }
 0x8f1   : > { %3949 = vmatprep.mubr.msk.bf16.mxu1 %vm1795_vm2, %v2046_v41  ;;  %v3961_v39 = vpop.f32.mrb[36].mxu0 }
 0x8f2   : > { %v2544_v4 = vpop.f32.mrb[37].mxu0  ;;  %v2581_v37 = vsel %vm1876_vm3, %v3961_v39, -inf }
 0x8f3   : > { %2582 = vmax.xlane.f32.xlu0 %v2581_v37  ;;  %v3962_v53 = vpop.f32.mrb[38].mxu0  ;;  %v2575_v14 = vsel %vm1876_vm3, %v2544_v4, -inf }
 0x8f4   : > { %2576 = vmax.xlane.f32.xlu1 %v2575_v14  ;;  %v2547_v26 = vpop.f32.mrb[39].mxu0  ;;  %v2584_v15 = vsel %vm1876_vm3, %v3962_v53, -inf }
 0x8f5   : > { %v2578_v2 = vsel %vm1876_vm3, %v2547_v26, -inf }
 0x8f7   : > { %2579 = vmax.xlane.f32.xlu0 %v2578_v2 }
 0x8f8   : > { %3950 = vmatmul.mubr.msk.bf16.vlgmr.msra.gmra.mrb[20].mxu1 %vm1795_vm2, %v2047_v40 }
 0x8f9   : > { %3953 = vmatprep.mubr.msk.bf16.mxu1 %vm1795_vm2, %v2048_v45  ;;  %v3965_v12 = vpop.f32.mrb[40].mxu0 }
 0x8fa   : > { %v2560_v61 = vpop.f32.mrb[41].mxu0  ;;  %v2593_v57 = vsel %vm1876_vm3, %v3965_v12, -inf }
 0x8fb   : > { %2585 = vmax.xlane.f32.xlu0 %v2584_v15  ;;  %v3966_v17 = vpop.f32.mrb[42].mxu0  ;;  %v2587_v55 = vsel %vm1876_vm3, %v2560_v61, -inf }
 0x8fc   : > { %2588 = vmax.xlane.f32.xlu1 %v2587_v55  ;;  %v2563_v50 = vpop.f32.mrb[43].mxu0  ;;  %v2596_v60 = vsel %vm1876_vm3, %v3966_v17, -inf }
 0x8fd   : > { %v2590_v56 = vsel %vm1876_vm3, %v2563_v50, -inf }
 0x8ff   : > { %2591 = vmax.xlane.f32.xlu0 %v2590_v56 }
 0x900   : > { %2594 = vmax.xlane.f32.xlu1 %v2593_v57  ;;  %3954 = vmatmul.mubr.msk.bf16.gmra.mrb[24].mxu1 %vm1795_vm2, %v2049_v42 }
 0x903   : > { %2597 = vmax.xlane.f32.xlu0 %v2596_v60 }
 0x911   : > { %2667 = vrot.lane.b32.xlu1 %v5157_v62, %s4367_s5 }
 0x980   : > { %v2583_v18 = vpop.xlane.xlu0 %2582 }
 0x981   : > { %v2601_v54 = vsub.f32 %v3961_v39, %v2583_v18  ;;  %v2577_v38 = vpop.xlane.xlu1 %2576 }
 0x982   : > { %v2599_v8 = vsub.f32 %v2544_v4, %v2577_v38 }
 0x983   : > { %v2611_v27 = vmul.f32 1.442695, %v2601_v54 }
 0x984   : > { %v2607_v7 = vmul.f32 1.442695, %v2599_v8  ;;  %v2580_v49 = vpop.xlane.xlu0 %2579 }
 0x985   : > { %4268 = vpow2.f32 %v2611_v27  ;;  %v2600_v30 = vsub.f32 %v2547_v26, %v2580_v49 }
 0x986   : > { %4270 = vpow2.f32 %v2607_v7 }
 0x987   : > { %v2609_v33 = vmul.f32 1.442695, %v2600_v30 }
 0x988   : > { %v2586_v10 = vpop.xlane.xlu0 %2585 }
 0x989   : > { %v2602_v0 = vsub.f32 %v3962_v53, %v2586_v10  ;;  %v2589_v6 = vpop.xlane.xlu1 %2588 }
 0x98a   : > { %v2603_v63 = vsub.f32 %v2560_v61, %v2589_v6 }
 0x98b   : > { %v2613_v24 = vmul.f32 1.442695, %v2602_v0 }
 0x98c   : > { %v2592_v11 = vpop.xlane.xlu0 %2591  ;;  %v2615_v9 = vmul.f32 1.442695, %v2603_v63 }
 0x98d   : > { %4272 = vpow2.f32 %v2613_v24  ;;  %v2595_v28 = vpop.xlane.xlu1 %2594  ;;  %v2604_v52 = vsub.f32 %v2563_v50, %v2592_v11  ;;  %v1787_v24 = vld [vmem:[%s5577_s14 + $0x10] sm:$0xff] }
 0x98e   : > { %v2605_v13 = vsub.f32 %v3965_v12, %v2595_v28  ;;  %4274 = vpow2.f32 %v2609_v33  ;;  %v2751_v63 = vpack.c.bf16 %v1787_v24, %v1787_v24 }
 0x98f   : > { %v5375_v44 = vpop.eup %4268  ;;  %v2617_v42 = vmul.f32 1.442695, %v2604_v52 }
 0x990   : > { %v2619_v40 = vmul.f32 1.442695, %v2605_v13  ;;  %v2598_v29 = vpop.xlane.xlu0 %2597  ;;  %v2629_v41 = vsel %vm1876_vm3, %v5375_v44, 0.0  ;;  %v4271_v48 = vpop.eup %4270  ;;  %4090 = vmatprep.subr.msk.bf16.mxu1 %vm2336_vm4, %v2751_v63  ;;  %v2765_v11 = vsel %vm2336_vm4, %v2751_v63, 0 }
 0x991   : > { %v2606_v46 = vsub.f32 %v3966_v17, %v2598_v29  ;;  %2630 = vadd.xlane.f32.xlu1 %v2629_v41  ;;  %v2668_v22 = vpop.permute.xlu1 %2667  ;;  %v2623_v45 = vsel %vm1876_vm3, %v4271_v48, 0.0  ;;  %3978 = vmatpush3.bf16.msra.mxu1 %v2765_v11 }
 0x992   : > { %4276 = vpow2.f32 %v2619_v40  ;;  %3967 = vmatprep.subr.bf16.mxu0 %v2668_v22 }
 0x993   : > { %v2621_v47 = vmul.f32 1.442695, %v2606_v46  ;;  %3968 = vmatpush3.bf16.msra.mxu0 %v2668_v22  ;;  %4278 = vpow2.f32 %v2615_v9 }
 0x995   : > { %4280 = vpow2.f32 %v2621_v47  ;;  %2624 = vadd.xlane.f32.xlu1 %v2623_v45 }
 0x996   : > { %4282 = vpow2.f32 %v2617_v42 }
 0x997   : > { %v4273_v23 = vpop.eup %4272 }
 0x998   : > { %v2632_v1 = vsel %vm1876_vm3, %v4273_v23, 0.0  ;;  %v4275_v3 = vpop.eup %4274 }
 0x999   : > { %2633 = vadd.xlane.f32.xlu0 %v2632_v1  ;;  %v2626_v25 = vsel %vm1876_vm3, %v4275_v3, 0.0 }
 0x99c   : > { %v4277_v43 = vpop.eup %4276 }
 0x99d   : > { %2627 = vadd.xlane.f32.xlu0 %v2626_v25  ;;  %v2641_v20 = vsel %vm1876_vm3, %v4277_v43, 0.0  ;;  %v4279_v36 = vpop.eup %4278 }
 0x99e   : > { %2642 = vadd.xlane.f32.xlu1 %v2641_v20  ;;  %v2635_v59 = vsel %vm1876_vm3, %v4279_v36, 0.0 }
 0x99f   : > { %v4281_v31 = vpop.eup %4280 }
 0x9a0   : > { %v2644_v21 = vsel %vm1876_vm3, %v4281_v31, 0.0  ;;  %v4283_v58 = vpop.eup %4282 }
 0x9a1   : > { %2645 = vadd.xlane.f32.xlu0 %v2644_v21  ;;  %v2638_v19 = vsel %vm1876_vm3, %v4283_v58, 0.0 }
 0x9a2   : > { %2636 = vadd.xlane.f32.xlu1 %v2635_v59 }
 0x9a5   : > { %2639 = vadd.xlane.f32.xlu0 %v2638_v19 }
 0x9b3   : > { %2840 = vrot.lane.b32.xlu1 %v5101_v5, %s4368_s4 }
 0x9b7   : > { %2842 = vrot.lane.b32.xlu1 %v5099_v34, %s4368_s4 }
 0x9bb   : > { %2844 = vrot.lane.b32.xlu1 %v5107_v51, %s4368_s4  ;;  %2848 = vrot.lane.b32.xlu0 %v5147_v32, %s4368_s4 }
 0x9bf   : > { %2846 = vrot.lane.b32.xlu0 %v5105_v16, %s4368_s4 }
 0xa1e   : > { %v2631_v35 = vpop.xlane.xlu1 %2630 }
 0xa22   : > { %v2625_v39 = vpop.xlane.xlu1 %2624 }
 0xa26   : > { %v2634_v4 = vpop.xlane.xlu0 %2633 }
 0xa27   : > { %4284 = vrcp.f32 %v2634_v4 }
 0xa28   : > { %4286 = vrcp.f32 %v2625_v39 }
 0xa29   : > { %4288 = vrcp.f32 %v2631_v35 }
 0xa2a   : > { %v2628_v37 = vpop.xlane.xlu0 %2627 }
 0xa2b   : > { %4290 = vrcp.f32 %v2628_v37  ;;  %v2643_v5 = vpop.xlane.xlu1 %2642 }
 0xa2e   : > { %v2646_v53 = vpop.xlane.xlu0 %2645 }
 0xa2f   : > { %v2637_v34 = vpop.xlane.xlu1 %2636  ;;  %4292 = vrcp.f32 %v2646_v53 }
 0xa30   : > { %4294 = vrcp.f32 %v2637_v34 }
 0xa31   : > { %v4285_v51 = vpop.eup %4284  ;;  %4296 = vrcp.f32 %v2643_v5 }
 0xa32   : > { %v2640_v14 = vpop.xlane.xlu0 %2639  ;;  %v4287_v32 = vpop.eup %4286  ;;  %v2658_v2 = vmul.f32 %v4285_v51, %v4273_v23 }
 0xa33   : > { %4298 = vrcp.f32 %v2640_v14  ;;  %v4289_v26 = vpop.eup %4288  ;;  %v2655_v61 = vmul.f32 %v4287_v32, %v4271_v48  ;;  %v2841_v7 = vpop.permute.xlu1 %2840 }
 0xa34   : > { %v2657_v17 = vmul.f32 %v4289_v26, %v5375_v44 }
 0xa35   : > { %v4291_v16 = vpop.eup %4290 }
 0xa36   : > { %v2849_v12 = vpop.permute.xlu0 %2848  ;;  %v2656_v15 = vmul.f32 %v4291_v16, %v4275_v3  ;;  %v2664_v50 = vpack.c.bf16 %v2658_v2, %v2657_v17 }
 0xa37   : > { %4091 = vmatprep.subr.msk.bf16.mxu0 %vm1795_vm2, %v2849_v12  ;;  %v2863_v60 = vsel %vm1795_vm2, %v2849_v12, 0  ;;  %v2843_v0 = vpop.permute.xlu1 %2842 }
 0xa38   : > { %v2663_v55 = vpack.c.bf16 %v2656_v15, %v2655_v61 }
 0xa39   : > { %v4293_v56 = vpop.eup %4292 }
 0xa3a   : > { %3969 = vmatprep.mubr.msk.bf16.mxu0 %vm1876_vm3, %v2663_v55  ;;  %v4295_v57 = vpop.eup %4294  ;;  %v2662_v38 = vmul.f32 %v4293_v56, %v4281_v31  ;;  %v2847_v33 = vpop.permute.xlu0 %2846 }
 0xa3b   : > { %3970 = vmatmul.mubr.msk.bf16.vlgmr.msra.gmra.mrb[44].mxu0 %vm1876_vm3, %v2664_v50  ;;  %v4297_v18 = vpop.eup %4296  ;;  %v2659_v8 = vmul.f32 %v4295_v57, %v4279_v36  ;;  %v2845_v6 = vpop.permute.xlu1 %2844 }
 0xa3c   : > { %3988 = vmatpush3.bf16.xpose.msra.mxu0 %v2863_v60  ;;  %v2661_v49 = vmul.f32 %v4297_v18, %v4277_v43 }
 0xa3d   : > { %v4299_v54 = vpop.eup %4298 }
 0xa3e   : > { %v2660_v27 = vmul.f32 %v4299_v54, %v4283_v58  ;;  %v2666_v10 = vpack.c.bf16 %v2662_v38, %v2661_v49 }
 0xa40   : > { %v2665_v30 = vpack.c.bf16 %v2660_v27, %v2659_v8 }
 0xa42   : > { %3973 = vmatprep.mubr.msk.bf16.mxu0 %vm1876_vm3, %v2665_v30 }
 0xa43   : > { %3974 = vmatmul.mubr.msk.bf16.gmra.mrb[48].mxu0 %vm1876_vm3, %v2666_v10 }
 0xa44   : > { %3989 = vmatprep.mubr.msk.bf16.mxu0 %vm1795_vm2, %v2841_v7 }
 0xa4b   : > { %3990 = vmatmul.mubr.msk.bf16.vlgmr.msra.gmra.mrb[52].mxu0 %vm1795_vm2, %v2843_v0 }
 0xa4c   : > { %3993 = vmatprep.mubr.msk.bf16.mxu0 %vm1795_vm2, %v2845_v6 }
 0xa53   : > { %3994 = vmatmul.mubr.msk.bf16.gmra.mrb[56].mxu0 %vm1795_vm2, %v2847_v33 }
 0xb0e   : > { %v3971_v28 = vpop.f32.mrb[44].mxu0 }
 0xb0f   : > { %v2716_v13 = vpop.f32.mrb[45].mxu0 }
 0xb10   : > { %v3972_v44 = vpop.f32.mrb[46].mxu0 }
 0xb11   : > { %v2748_v52 = vpack.c.bf16 %v3972_v44, %v3971_v28  ;;  %v2719_v9 = vpop.f32.mrb[47].mxu0 }
 0xb12   : > { %v2747_v40 = vpack.c.bf16 %v2719_v9, %v2716_v13 }
 0xb14   : > { %3979 = vmatprep.mubr.msk.bf16.mxu1 %vm1795_vm2, %v2747_v40 }
 0xb15   : > { %3980 = vmatmul.mubr.msk.bf16.vlgmr.msra.gmra.mrb[20].mxu1 %vm1795_vm2, %v2748_v52 }
 0xb16   : > { %v3975_v29 = vpop.f32.mrb[48].mxu0 }
 0xb17   : > { %v2732_v41 = vpop.f32.mrb[49].mxu0 }
 0xb18   : > { %v3976_v48 = vpop.f32.mrb[50].mxu0 }
 0xb19   : > { %v2750_v46 = vpack.c.bf16 %v3976_v48, %v3975_v29  ;;  %v2735_v22 = vpop.f32.mrb[51].mxu0 }
 0xb1a   : > { %v2749_v42 = vpack.c.bf16 %v2735_v22, %v2732_v41 }
 0xb1c   : > { %3983 = vmatprep.mubr.msk.bf16.mxu1 %vm1795_vm2, %v2749_v42 }
 0xb1d   : > { %3984 = vmatmul.mubr.msk.bf16.gmra.mrb[24].mxu1 %vm1795_vm2, %v2750_v46 }
 0xb1e   : > { %v3991_v47 = vpop.f32.mrb[52].mxu0 }
 0xb1f   : > { %v2899_v45 = vpop.f32.mrb[53].mxu0  ;;  %v2936_v23 = vsel %vm1876_vm3, %v3991_v47, -inf }
 0xb20   : > { %2937 = vmax.xlane.f32.xlu0 %v2936_v23  ;;  %v3992_v1 = vpop.f32.mrb[54].mxu0  ;;  %v2930_v3 = vsel %vm1876_vm3, %v2899_v45, -inf }
 0xb21   : > { %2931 = vmax.xlane.f32.xlu1 %v2930_v3  ;;  %v2902_v43 = vpop.f32.mrb[55].mxu0  ;;  %v2939_v31 = vsel %vm1876_vm3, %v3992_v1, -inf }
 0xb22   : > { %v2933_v25 = vsel %vm1876_vm3, %v2902_v43, -inf }
 0xb24   : > { %2934 = vmax.xlane.f32.xlu0 %v2933_v25 }
 0xb26   : > { %v3995_v20 = vpop.f32.mrb[56].mxu0 }
 0xb27   : > { %v2915_v36 = vpop.f32.mrb[57].mxu0  ;;  %v2948_v35 = vsel %vm1876_vm3, %v3995_v20, -inf }
 0xb28   : > { %2940 = vmax.xlane.f32.xlu0 %v2939_v31  ;;  %v3996_v21 = vpop.f32.mrb[58].mxu0  ;;  %v2942_v58 = vsel %vm1876_vm3, %v2915_v36, -inf }
 0xb29   : > { %2943 = vmax.xlane.f32.xlu1 %v2942_v58  ;;  %v2918_v59 = vpop.f32.mrb[59].mxu0  ;;  %v2951_v39 = vsel %vm1876_vm3, %v3996_v21, -inf }
 0xb2a   : > { %v2945_v19 = vsel %vm1876_vm3, %v2918_v59, -inf }
 0xb2c   : > { %2946 = vmax.xlane.f32.xlu0 %v2945_v19 }
 0xb2d   : > { %2949 = vmax.xlane.f32.xlu1 %v2948_v35 }
 0xb30   : > { %2952 = vmax.xlane.f32.xlu0 %v2951_v39 }
 0xbad   : > { %v2938_v4 = vpop.xlane.xlu0 %2937 }
 0xbae   : > { %v2956_v37 = vsub.f32 %v3991_v47, %v2938_v4  ;;  %v2932_v5 = vpop.xlane.xlu1 %2931 }
 0xbaf   : > { %v2954_v53 = vsub.f32 %v2899_v45, %v2932_v5 }
 0xbb0   : > { %v2966_v34 = vmul.f32 1.442695, %v2956_v37 }
 0xbb1   : > { %v2962_v51 = vmul.f32 1.442695, %v2954_v53  ;;  %v2935_v14 = vpop.xlane.xlu0 %2934 }
 0xbb2   : > { %4300 = vpow2.f32 %v2966_v34  ;;  %v2955_v32 = vsub.f32 %v2902_v43, %v2935_v14 }
 0xbb3   : > { %4302 = vpow2.f32 %v2962_v51  ;;  %v1788_v51 = vld [vmem:[%s5577_s14 + $0x18] sm:$0xff] }
 0xbb4   : > { %v2964_v26 = vmul.f32 1.442695, %v2955_v32  ;;  %v3106_v14 = vpack.c.bf16 %v1788_v51, %v1788_v51 }
 0xbb5   : > { %v2941_v16 = vpop.xlane.xlu0 %2940 }
 0xbb6   : > { %4304 = vpow2.f32 %v2964_v26  ;;  %v2957_v2 = vsub.f32 %v3992_v1, %v2941_v16  ;;  %v2944_v12 = vpop.xlane.xlu1 %2943  ;;  %v3120_v32 = vsel %vm2336_vm4, %v3106_v14, 0 }
 0xbb7   : > { %v2958_v15 = vsub.f32 %v2915_v36, %v2944_v12 }
 0xbb8   : > { %v2968_v61 = vmul.f32 1.442695, %v2957_v2 }
 0xbb9   : > { %v2947_v17 = vpop.xlane.xlu0 %2946  ;;  %v2970_v18 = vmul.f32 1.442695, %v2958_v15 }
 0xbba   : > { %4306 = vpow2.f32 %v2968_v61  ;;  %v2959_v55 = vsub.f32 %v2918_v59, %v2947_v17  ;;  %v2950_v50 = vpop.xlane.xlu1 %2949 }
 0xbbb   : > { %v2960_v56 = vsub.f32 %v3995_v20, %v2950_v50 }
 0xbbc   : > { %v4301_v57 = vpop.eup %4300  ;;  %v2972_v60 = vmul.f32 1.442695, %v2959_v55 }
 0xbbd   : > { %v2974_v54 = vmul.f32 1.442695, %v2960_v56  ;;  %v2953_v38 = vpop.xlane.xlu0 %2952  ;;  %v2984_v8 = vsel %vm1876_vm3, %v4301_v57, 0.0  ;;  %v4303_v27 = vpop.eup %4302 }
 0xbbe   : > { %4308 = vpow2.f32 %v2972_v60  ;;  %v2961_v7 = vsub.f32 %v3996_v21, %v2953_v38  ;;  %2985 = vadd.xlane.f32.xlu1 %v2984_v8  ;;  %v2978_v10 = vsel %vm1876_vm3, %v4303_v27, 0.0  ;;  %v4348_v38 = vld [vmem:[%s4846_s22 + $0x10] sm:$0xff] }
 0xbbf   : > { %4310 = vpow2.f32 %v2974_v54  ;;  %v3687_v54 = vld [vmem:[%s5578_s15] ss:$0 sm:$0xff] }
 0xbc0   : > { %v4305_v49 = vpop.eup %4304  ;;  %v2976_v30 = vmul.f32 1.442695, %v2961_v7  ;;  %4312 = vpow2.f32 %v2970_v18  ;;  %v4349_v7 = vld [vmem:[%s4846_s22] sm:$0xff] }
 0xbc1   : > { %v2981_v0 = vsel %vm1876_vm3, %v4305_v49, 0.0 }
 0xbc2   : > { %4314 = vpow2.f32 %v2976_v30  ;;  %2979 = vadd.xlane.f32.xlu1 %v2978_v10  ;;  %2982 = vadd.xlane.f32.xlu0 %v2981_v0  ;;  %v4350_v0 = vld [vmem:[%s4846_s22 + $0x18] sm:$0xff] }
 0xbc4   : > { %v4307_v6 = vpop.eup %4306 }
 0xbc5   : > { %v2987_v33 = vsel %vm1876_vm3, %v4307_v6, 0.0 }
 0xbc6   : > { %2988 = vadd.xlane.f32.xlu0 %v2987_v33 }
 0xbc8   : > { %v4309_v24 = vpop.eup %4308 }
 0xbc9   : > { %v4311_v63 = vpop.eup %4310  ;;  %v2993_v11 = vsel %vm1876_vm3, %v4309_v24, 0.0 }
 0xbca   : > { %2994 = vadd.xlane.f32.xlu0 %v2993_v11  ;;  %v2996_v28 = vsel %vm1876_vm3, %v4311_v63, 0.0  ;;  %v4313_v13 = vpop.eup %4312 }
 0xbcb   : > { %2997 = vadd.xlane.f32.xlu1 %v2996_v28  ;;  %v2990_v9 = vsel %vm1876_vm3, %v4313_v13, 0.0 }
 0xbcc   : > { %v4315_v44 = vpop.eup %4314 }
 0xbcd   : > { %v2999_v52 = vsel %vm1876_vm3, %v4315_v44, 0.0 }
 0xbce   : > { %3000 = vadd.xlane.f32.xlu0 %v2999_v52 }
 0xbcf   : > { %2991 = vadd.xlane.f32.xlu1 %v2990_v9  ;;  %v4352_v9 = vld [vmem:[%s4846_s22 + $0x30] sm:$0xff] }
 0xbe0   : > { %3022 = vrot.lane.b32.xlu1 %v5157_v62, %s4368_s4 }
 0xc4b   : > { %v2986_v40 = vpop.xlane.xlu1 %2985 }
 0xc4f   : > { %v2980_v29 = vpop.xlane.xlu1 %2979  ;;  %v2983_v41 = vpop.xlane.xlu0 %2982 }
 0xc50   : > { %4316 = vrcp.f32 %v2980_v29 }
 0xc51   : > { %4318 = vrcp.f32 %v2983_v41 }
 0xc52   : > { %4320 = vrcp.f32 %v2986_v40 }
 0xc53   : > { %v2989_v48 = vpop.xlane.xlu0 %2988 }
 0xc54   : > { %4322 = vrcp.f32 %v2989_v48  ;;  %v4353_v48 = vld [vmem:[%s4846_s22 + $0x20] sm:$0xff] }
 0xc57   : > { %v2995_v46 = vpop.xlane.xlu0 %2994 }
 0xc58   : > { %v2998_v22 = vpop.xlane.xlu1 %2997  ;;  %4324 = vrcp.f32 %v2995_v46 }
 0xc59   : > { %4326 = vrcp.f32 %v2998_v22 }
 0xc5a   : > { %v4317_v42 = vpop.eup %4316 }
 0xc5b   : > { %v4319_v47 = vpop.eup %4318  ;;  %v3001_v45 = vpop.xlane.xlu0 %3000  ;;  %v3010_v23 = vmul.f32 %v4317_v42, %v4303_v27 }
 0xc5c   : > { %4328 = vrcp.f32 %v3001_v45  ;;  %v2992_v1 = vpop.xlane.xlu1 %2991  ;;  %v3011_v3 = vmul.f32 %v4319_v47, %v4305_v49  ;;  %v4321_v62 = vpop.eup %4320  ;;  %v4354_v47 = vld [vmem:[%s4846_s22 + $0x38] sm:$0xff] }
 0xc5d   : > { %4330 = vrcp.f32 %v2992_v1  ;;  %v3012_v31 = vmul.f32 %v4321_v62, %v4301_v57 }
 0xc5e   : > { %v4323_v43 = vpop.eup %4322  ;;  %v3018_v25 = vpack.c.bf16 %v3011_v3, %v3010_v23  ;;  %v4355_v3 = vld [vmem:[%s4846_s22 + $0x28] sm:$0xff] }
 0xc5f   : > { %v3013_v20 = vmul.f32 %v4323_v43, %v4307_v6 }
 0xc60   : > { %3999 = vmatprep.mubr.msk.bf16.mxu1 %vm1876_vm3, %v3018_v25  ;;  %v3023_v36 = vpop.permute.xlu1 %3022 }
 0xc61   : > { %3997 = vmatprep.subr.bf16.mxu1 %v3023_v36  ;;  %v3019_v21 = vpack.c.bf16 %v3013_v20, %v3012_v31 }
 0xc62   : > { %3998 = vmatpush3.bf16.msra.mxu1 %v3023_v36  ;;  %v4325_v58 = vpop.eup %4324 }
 0xc63   : > { %v4327_v59 = vpop.eup %4326  ;;  %v3015_v37 = vmul.f32 %v4325_v58, %v4309_v24  ;;  %4092 = vmatprep.subr.msk.bf16.mxu1 %vm2336_vm4, %v3106_v14 }
 0xc64   : > { %v3016_v5 = vmul.f32 %v4327_v59, %v4311_v63  ;;  %v4351_v63 = vld [vmem:[%s4846_s22 + $0x8] sm:$0xff]  ;;  %s689_s22 = scalar_lea.vmem %s5584_s21, %s3710_s28 }
 0xc65   : > { %4000 = vmatmul.mubr.msk.bf16.vlgmr.msra.gmra.mrb[28].mxu1 %vm1876_vm3, %v3019_v21 }
 0xc66   : > { %v4329_v19 = vpop.eup %4328  ;;  %4008 = vmatpush3.bf16.msra.mxu1 %v3120_v32 }
 0xc67   : > { %v4331_v35 = vpop.eup %4330  ;;  %v3017_v39 = vmul.f32 %v4329_v19, %v4315_v44 }
 0xc68   : > { %v3014_v4 = vmul.f32 %v4331_v35, %v4313_v13 }
 0xc69   : > { %v3021_v34 = vpack.c.bf16 %v3017_v39, %v3016_v5 }
 0xc6a   : > { %v3020_v53 = vpack.c.bf16 %v3015_v37, %v3014_v4 }
 0xc6c   : > { %4003 = vmatprep.mubr.msk.bf16.mxu1 %vm1876_vm3, %v3020_v53 }
 0xc6d   : > { %4004 = vmatmul.mubr.msk.bf16.gmra.mrb[32].mxu1 %vm1876_vm3, %v3021_v34 }
 0xd38   : > { %v4001_v26 = vpop.f32.mrb[28].mxu1 }
 0xd39   : > { %v3071_v16 = vpop.f32.mrb[29].mxu1 }
 0xd3a   : > { %v4002_v2 = vpop.f32.mrb[30].mxu1 }
 0xd3b   : > { %v3103_v12 = vpack.c.bf16 %v4002_v2, %v4001_v26  ;;  %v3074_v61 = vpop.f32.mrb[31].mxu1 }
 0xd3c   : > { %v3102_v15 = vpack.c.bf16 %v3074_v61, %v3071_v16 }
 0xd3e   : > { %4009 = vmatprep.mubr.msk.bf16.mxu1 %vm1795_vm2, %v3102_v15 }
 0xd3f   : > { %4010 = vmatmul.mubr.msk.bf16.vlgmr.msra.gmra.mrb[20].mxu1 %vm1795_vm2, %v3103_v12 }
 0xd40   : > { %v4005_v17 = vpop.f32.mrb[32].mxu1 }
 0xd41   : > { %v3087_v55 = vpop.f32.mrb[33].mxu1 }
 0xd42   : > { %v4006_v50 = vpop.f32.mrb[34].mxu1 }
 0xd43   : > { %v3105_v56 = vpack.c.bf16 %v4006_v50, %v4005_v17  ;;  %v3090_v57 = vpop.f32.mrb[35].mxu1 }
 0xd44   : > { %v3104_v60 = vpack.c.bf16 %v3090_v57, %v3087_v55 }
 0xd46   : > { %4013 = vmatprep.mubr.msk.bf16.mxu1 %vm1795_vm2, %v3104_v60 }
 0xd47   : > { %4014 = vmatmul.mubr.msk.bf16.gmra.mrb[24].mxu1 %vm1795_vm2, %v3105_v56 }
 0xe12   : > { %v4011_v18 = vpop.f32.mrb[20].mxu1 }
 0xe13   : > { %v3197_v8 = vadd.f32 %v4348_v38, %v4011_v18  ;;  %v3156_v27 = vpop.f32.mrb[21].mxu1 }
 0xe14   : > { %v3195_v49 = vadd.f32 %v4349_v7, %v3156_v27  ;;  %v4012_v30 = vpop.f32.mrb[22].mxu1 }
 0xe15   : > { %v3212_v10 = vadd.f32 %v3687_v54, %v3197_v8  ;;  %v3198_v6 = vadd.f32 %v4350_v0, %v4012_v30  ;;  %v3159_v33 = vpop.f32.mrb[23].mxu1 }
 0xe16   : > { %v3210_v24 = vadd.f32 %v3687_v54, %v3195_v49  ;;  %v3196_v11 = vadd.f32 %v4351_v63, %v3159_v33 }
 0xe17   : > { %3220 = vst.msk [vmem:[%s5456_s29 + $0x10] sm:$0xff] %vm733_vm0, %v3212_v10  ;;  %v3213_v28 = vadd.f32 %v3687_v54, %v3198_v6  ;;  %v3234_v13 = vsel %vm733_vm0, %v3212_v10, 0.0 }
 0xe18   : > { %3218 = vst.msk [vmem:[%s5456_s29] sm:$0xff] %vm733_vm0, %v3210_v24  ;;  %v3211_v44 = vadd.f32 %v3687_v54, %v3196_v11  ;;  %3235 = vadd.xlane.f32.xlu0 %v3234_v13  ;;  %v3228_v41 = vsel %vm733_vm0, %v3210_v24, 0.0 }
 0xe19   : > { %3221 = vst.msk [vmem:[%s5456_s29 + $0x18] sm:$0xff] %vm733_vm0, %v3213_v28  ;;  %v3237_v25 = vsel %vm733_vm0, %v3213_v28, 0.0 }
 0xe1a   : > { %3219 = vst.msk [vmem:[%s5456_s29 + $0x8] sm:$0xff] %vm733_vm0, %v3211_v44  ;;  %v4015_v52 = vpop.f32.mrb[24].mxu1  ;;  %v3231_v31 = vsel %vm733_vm0, %v3211_v44, 0.0 }
 0xe1b   : > { %v3201_v40 = vadd.f32 %v4352_v9, %v4015_v52  ;;  %v3172_v29 = vpop.f32.mrb[25].mxu1  ;;  %v4115_v52 = vld [vmem:[%s5581_s18 + $0x8] sm:$0xff]  }
 0xe1c   : > { %v3199_v46 = vadd.f32 %v4353_v48, %v3172_v29  ;;  %3229 = vadd.xlane.f32.xlu0 %v3228_v41  ;;  %v4016_v22 = vpop.f32.mrb[26].mxu1 }
 0xe1d   : > { %v3216_v42 = vadd.f32 %v3687_v54, %v3201_v40  ;;  %v3202_v45 = vadd.f32 %v4354_v47, %v4016_v22  ;;  %v3175_v23 = vpop.f32.mrb[27].mxu1 }
 0xe1e   : > { %v3214_v1 = vadd.f32 %v3687_v54, %v3199_v46  ;;  %v3200_v62 = vadd.f32 %v4355_v3, %v3175_v23 }
 0xe1f   : > { %3224 = vst.msk [vmem:[%s5456_s29 + $0x30] sm:$0xff] %vm733_vm0, %v3216_v42  ;;  %v3217_v43 = vadd.f32 %v3687_v54, %v3202_v45  ;;  %v3246_v21 = vsel %vm733_vm0, %v3216_v42, 0.0 }
 0xe20   : > { %3222 = vst.msk [vmem:[%s5456_s29 + $0x20] sm:$0xff] %vm733_vm0, %v3214_v1  ;;  %v3215_v20 = vadd.f32 %v3687_v54, %v3200_v62  ;;  %3238 = vadd.xlane.f32.xlu0 %v3237_v25  ;;  %v3240_v36 = vsel %vm733_vm0, %v3214_v1, 0.0 }
 0xe21   : > { %3225 = vst.msk [vmem:[%s5456_s29 + $0x38] sm:$0xff] %vm733_vm0, %v3217_v43  ;;  %3241 = vadd.xlane.f32.xlu1 %v3240_v36  ;;  %v3249_v59 = vsel %vm733_vm0, %v3217_v43, 0.0 }
 0xe22   : > { %3223 = vst.msk [vmem:[%s5456_s29 + $0x28] sm:$0xff] %vm733_vm0, %v3215_v20  ;;  %v3243_v58 = vsel %vm733_vm0, %v3215_v20, 0.0 }
 0xe24   : > { %3232 = vadd.xlane.f32.xlu0 %v3231_v31 }
 0xe28   : > { %3247 = vadd.xlane.f32.xlu0 %v3246_v21 }
 0xe2c   : > { %3244 = vadd.xlane.f32.xlu0 %v3243_v58 }
 0xe30   : > { %3250 = vadd.xlane.f32.xlu0 %v3249_v59 }
 0xea5   : > { %v3236_v19 = vpop.xlane.xlu0 %3235 }
 0xea6   : > { %v3254_v35 = vmul.f32 0.03125, %v3236_v19 }
 0xea8   : > { %v5489_v39 = vsub.f32 %v3212_v10, %v3254_v35 }
 0xea9   : > { %v3230_v4 = vpop.xlane.xlu0 %3229 }
 0xeaa   : > { %v3252_v37 = vmul.f32 0.03125, %v3230_v4  ;;  %v3270_v5 = vmul.f32 %v5489_v39, %v5489_v39 }
 0xeac   : > { %v5493_v53 = vsub.f32 %v3210_v24, %v3252_v37  ;;  %v3282_v34 = vsel %vm733_vm0, %v3270_v5, 0.0 }
 0xead   : > { %v3239_v51 = vpop.xlane.xlu0 %3238  ;;  %3283 = vadd.xlane.f32.xlu0 %v3282_v34 }
 0xeae   : > { %v3255_v14 = vmul.f32 0.03125, %v3239_v51  ;;  %v3242_v32 = vpop.xlane.xlu1 %3241  ;;  %v3268_v26 = vmul.f32 %v5493_v53, %v5493_v53 }
 0xeaf   : > { %v3256_v2 = vmul.f32 0.03125, %v3242_v32 }
 0xeb0   : > { %v5498_v16 = vsub.f32 %v3213_v28, %v3255_v14  ;;  %v3276_v12 = vsel %vm733_vm0, %v3268_v26, 0.0  ;;  %v3688_v14 = vld [vmem:[%s5579_s16] ss:$0 sm:$0xff] }
 0xeb1   : > { %v3233_v61 = vpop.xlane.xlu0 %3232  ;;  %3277 = vadd.xlane.f32.xlu0 %v3276_v12  ;;  %v5503_v55 = vsub.f32 %v3214_v1, %v3256_v2 }
 0xeb2   : > { %v3253_v15 = vmul.f32 0.03125, %v3233_v61  ;;  %v3271_v17 = vmul.f32 %v5498_v16, %v5498_v16 }
 0xeb3   : > { %v3272_v8 = vmul.f32 %v5503_v55, %v5503_v55 }
 0xeb4   : > { %v5505_v50 = vsub.f32 %v3211_v44, %v3253_v15  ;;  %v3285_v56 = vsel %vm733_vm0, %v3271_v17, 0.0  ;;  %v4114_v44 = vld [vmem:[%s5581_s18] sm:$0xff]  }
 0xeb5   : > { %v3248_v57 = vpop.xlane.xlu0 %3247  ;;  %3286 = vadd.xlane.f32.xlu0 %v3285_v56  ;;  %v3288_v0 = vsel %vm733_vm0, %v3272_v8, 0.0  ;;  %4017 = vmatprep.subr.bf16.mxu0 %v4114_v44 }
 0xeb6   : > { %v3258_v60 = vmul.f32 0.03125, %v3248_v57  ;;  %v3269_v18 = vmul.f32 %v5505_v50, %v5505_v50  ;;  %4018 = vmatpush3.bf16.msra.mxu0 %v4114_v44 }
 0xeb7   : > { %4019 = vmatprep.subr.bf16.mxu0 %v4115_v52 }
 0xeb8   : > { %v5510_v54 = vsub.f32 %v3216_v42, %v3258_v60  ;;  %v3279_v38 = vsel %vm733_vm0, %v3269_v18, 0.0 }
 0xeb9   : > { %3280 = vadd.xlane.f32.xlu0 %v3279_v38  ;;  %v3245_v27 = vpop.xlane.xlu0 %3244 }
 0xeba   : > { %v3257_v7 = vmul.f32 0.03125, %v3245_v27  ;;  %v3274_v49 = vmul.f32 %v5510_v54, %v5510_v54  ;;  %4020 = vmatpush3.bf16.msra.mxu0 %v4115_v52 }
 0xebc   : > { %v5517_v30 = vsub.f32 %v3215_v20, %v3257_v7  ;;  %v3294_v10 = vsel %vm733_vm0, %v3274_v49, 0.0 }
 0xebd   : > { %3295 = vadd.xlane.f32.xlu1 %v3294_v10  ;;  %3289 = vadd.xlane.f32.xlu0 %v3288_v0  ;;  %v3251_v6 = vpop.xlane.xlu0 %3250 }
 0xebe   : > { %v3259_v33 = vmul.f32 0.03125, %v3251_v6  ;;  %v3273_v24 = vmul.f32 %v5517_v30, %v5517_v30 }
 0xec0   : > { %v5523_v63 = vsub.f32 %v3217_v43, %v3259_v33  ;;  %v3291_v11 = vsel %vm733_vm0, %v3273_v24, 0.0 }
 0xec1   : > { %3292 = vadd.xlane.f32.xlu0 %v3291_v11 }
 0xec2   : > { %v3275_v28 = vmul.f32 %v5523_v63, %v5523_v63 }
 0xec4   : > { %v3297_v13 = vsel %vm733_vm0, %v3275_v28, 0.0 }
 0xec5   : > { %3298 = vadd.xlane.f32.xlu0 %v3297_v13 }
 0xf3a   : > { %v3284_v9 = vpop.xlane.xlu0 %3283 }
 0xf3b   : > { %v3302_v40 = vmul.f32 0.03125, %v3284_v9  ;;  %v3690_v9 = vld [vmem:[%s5582_s19] ss:$0 sm:$0xff] }
 0xf3d   : > { %v3310_v46 = vadd.f32 1e-05, %v3302_v40 }
 0xf3e   : > { %v3278_v29 = vpop.xlane.xlu0 %3277 }
 0xf3f   : > { %v3300_v41 = vmul.f32 0.03125, %v3278_v29 }
 0xf41   : > { %v3308_v48 = vadd.f32 1e-05, %v3300_v41 }
 0xf42   : > { %v3287_v22 = vpop.xlane.xlu0 %3286 }
 0xf43   : > { %v3303_v42 = vmul.f32 0.03125, %v3287_v22  ;;  %4332 = vrsqrt.f32 %v3308_v48 }
 0xf44   : > { %4334 = vrsqrt.f32 %v3310_v46 }
 0xf45   : > { %v3311_v47 = vadd.f32 1e-05, %v3303_v42 }
 0xf46   : > { %v3281_v45 = vpop.xlane.xlu0 %3280 }
 0xf47   : > { %4336 = vrsqrt.f32 %v3311_v47  ;;  %v3301_v23 = vmul.f32 0.03125, %v3281_v45 }
 0xf49   : > { %v3309_v1 = vadd.f32 1e-05, %v3301_v23 }
 0xf4a   : > { %v3296_v3 = vpop.xlane.xlu1 %3295  ;;  %v3290_v62 = vpop.xlane.xlu0 %3289 }
 0xf4b   : > { %4338 = vrsqrt.f32 %v3309_v1  ;;  %v3306_v43 = vmul.f32 0.03125, %v3296_v3  ;;  %v3304_v25 = vmul.f32 0.03125, %v3290_v62 }
 0xf4d   : > { %v3314_v20 = vadd.f32 1e-05, %v3306_v43  ;;  %v3312_v36 = vadd.f32 1e-05, %v3304_v25  ;;  %v4333_v21 = vpop.eup %4332 }
 0xf4e   : > { %v3293_v31 = vpop.xlane.xlu0 %3292  ;;  %v4335_v59 = vpop.eup %4334  ;;  %v3324_v4 = vmul.f32 %v4333_v21, %v5493_v53  ;;  %v3689_v53 = vld [vmem:[%s5580_s17] ss:$0 sm:$0xff] }
 0xf4f   : > { %v3305_v58 = vmul.f32 0.03125, %v3293_v31  ;;  %4340 = vrsqrt.f32 %v3312_v36  ;;  %v3326_v34 = vmul.f32 %v4335_v59, %v5489_v39 }
 0xf50   : > { %4342 = vrsqrt.f32 %v3314_v20  ;;  %v3338_v61 = vmul.f32 %v3688_v14, %v3324_v4 }
 0xf51   : > { %v4337_v19 = vpop.eup %4336  ;;  %v3313_v35 = vadd.f32 1e-05, %v3305_v58  ;;  %v3340_v15 = vmul.f32 %v3688_v14, %v3326_v34 }
 0xf52   : > { %v3327_v37 = vmul.f32 %v4337_v19, %v5498_v16  ;;  %v3299_v5 = vpop.xlane.xlu0 %3298  ;;  %v3352_v56 = vadd.f32 %v3689_v53, %v3338_v61 }
 0xf53   : > { %4344 = vrsqrt.f32 %v3313_v35  ;;  %v3307_v51 = vmul.f32 0.03125, %v3299_v5  ;;  %v3354_v18 = vadd.f32 %v3689_v53, %v3340_v15 }
 0xf54   : > { %v3341_v26 = vmul.f32 %v3688_v14, %v3327_v37 }
 0xf55   : > { %v4339_v32 = vpop.eup %4338  ;;  %v3315_v2 = vadd.f32 1e-05, %v3307_v51 }
 0xf56   : > { %v3325_v12 = vmul.f32 %v4339_v32, %v5505_v50  ;;  %v3355_v39 = vadd.f32 %v3689_v53, %v3341_v26 }
 0xf57   : > { %4346 = vrsqrt.f32 %v3315_v2 }
 0xf58   : > { %v3339_v16 = vmul.f32 %v3688_v14, %v3325_v12  ;;  %v3361_v7 = vpack.c.bf16 %v3355_v39, %v3354_v18 }
 0xf59   : > { %v4341_v17 = vpop.eup %4340 }
 0xf5a   : > { %v3353_v57 = vadd.f32 %v3689_v53, %v3339_v16  ;;  %v4343_v60 = vpop.eup %4342  ;;  %v3328_v38 = vmul.f32 %v4341_v17, %v5503_v55 }
 0xf5b   : > { %v3330_v50 = vmul.f32 %v4343_v60, %v5510_v54 }
 0xf5c   : > { %v3360_v8 = vpack.c.bf16 %v3353_v57, %v3352_v56  ;;  %v3342_v10 = vmul.f32 %v3688_v14, %v3328_v38 }
 0xf5d   : > { %v4345_v27 = vpop.eup %4344  ;;  %v3344_v55 = vmul.f32 %v3688_v14, %v3330_v50 }
 0xf5e   : > { %v3329_v49 = vmul.f32 %v4345_v27, %v5517_v30  ;;  %4021 = vmatprep.mubr.msk.bf16.mxu0 %vm733_vm0, %v3360_v8  ;;  %v3356_v24 = vadd.f32 %v3689_v53, %v3342_v10 }
 0xf5f   : > { %4022 = vmatmul.mubr.msk.bf16.vlgmr.msra.gmra.mrb[60].mxu0 %vm733_vm0, %v3361_v7  ;;  %v3358_v54 = vadd.f32 %v3689_v53, %v3344_v55 }
 0xf60   : > { %v3343_v0 = vmul.f32 %v3688_v14, %v3329_v49 }
 0xf61   : > { %v4347_v6 = vpop.eup %4346 }
 0xf62   : > { %v3331_v33 = vmul.f32 %v4347_v6, %v5523_v63  ;;  %v3357_v11 = vadd.f32 %v3689_v53, %v3343_v0 }
 0xf64   : > { %v3362_v28 = vpack.c.bf16 %v3357_v11, %v3356_v24  ;;  %v3345_v13 = vmul.f32 %v3688_v14, %v3331_v33 }
 0xf66   : > { %4025 = vmatprep.mubr.msk.bf16.mxu0 %vm733_vm0, %v3362_v28  ;;  %v3359_v44 = vadd.f32 %v3689_v53, %v3345_v13 }
 0xf68   : > { %v3363_v30 = vpack.c.bf16 %v3359_v44, %v3358_v54 }
 0xf6a   : > { %4026 = vmatmul.mubr.msk.bf16.gmra.mrb[64].mxu0 %vm733_vm0, %v3363_v30 }
0x1032   : > { %v4023_v52 = vpop.f32.mrb[60].mxu0 }
0x1033   : > { %v3433_v40 = vpop.f32.mrb[61].mxu0  ;;  %v3442_v29 = vadd.f32 %v4023_v52, %v3690_v9 }
0x1034   : > { %v4024_v63 = vpop.f32.mrb[62].mxu0  ;;  %v3434_v46 = vadd.f32 %v3690_v9, %v3433_v40 }
0x1035   : > { %v3445_v41 = vadd.f32 %v4024_v63, %v3690_v9  ;;  %v3436_v48 = vpop.f32.mrb[63].mxu0 }
0x1036   : > { %v3437_v22 = vadd.f32 %v3690_v9, %v3436_v48 }
0x1037   : > { %v3727_v42 = vpack.c.bf16 %v3445_v41, %v3442_v29 }
0x1038   : > { %v3722_v47 = vpack.c.bf16 %v3437_v22, %v3434_v46 }
0x1039   : > { %3739 = vst [vmem:[%s689_s22 + $0x8] sm:$0xff] %v3727_v42  }
0x103a   : > { %3723 = vst [vmem:[%s689_s22] sm:$0xff] %v3722_v47  }
0x103d   : > { %v4027_v45 = vpop.f32.mrb[64].mxu0 }
0x103e   : > { %v3449_v23 = vpop.f32.mrb[65].mxu0  ;;  %v3458_v3 = vadd.f32 %v4027_v45, %v3690_v9 }
0x103f   : > { %v4028_v1 = vpop.f32.mrb[66].mxu0  ;;  %v3450_v25 = vadd.f32 %v3690_v9, %v3449_v23 }
0x1040   : > { %v3461_v62 = vadd.f32 %v4028_v1, %v3690_v9  ;;  %v3452_v43 = vpop.f32.mrb[67].mxu0 }
0x1041   : > { %v3453_v20 = vadd.f32 %v3690_v9, %v3452_v43 }
0x1042   : > { %v3737_v36 = vpack.c.bf16 %v3461_v62, %v3458_v3 }
0x1043   : > { %v3732_v31 = vpack.c.bf16 %v3453_v20, %v3450_v25 }
0x1044   : > { %3741 = vst [vmem:[%s689_s22 + $0x18] sm:$0xff] %v3737_v36  }
0x1045   : > { %3740 = vst [vmem:[%s689_s22 + $0x10] sm:$0xff] %v3732_v31  }
0x1046 PF: > { %s32_s2 = sadd.s32 1, %s4362_s2  }
0x1047   : > { %p29_p4 = scmp.ge.s32.totalorder %s32_s2, 4  }
0x1049   :  { %31 = sbr.rel (!%p29_p4) target bundleno = 7 (0x7), region = 145 }

</bundles_post_ra>
